<compile_context>
chip_gen: v6e
topology: v6e:2x2x1
jax: 0.10.0
libtpu: 0.0.40
codegen_flags: <defaults>
</compile_context>

<pallas_src>
import functools

import jax
import jax.numpy as jnp
from jax.experimental import pallas as pl
from jax.experimental.pallas import tpu as pltpu

Z_DIM = 100
HIDDEN = 128
IM_DIM = 784

Z_PAD = 128    # 100 -> 128 : aligned MXU contraction dim for layer 1
IM_PAD = 896   # 784 -> 896 : lane-dense (multiple of 128) output stores

# Padded / logical in-out feature dims of the 5 linear layers.
_DIMS = (Z_PAD, HIDDEN, HIDDEN * 2, HIDDEN * 4, HIDDEN * 8, IM_PAD)
_LOGICAL_DIMS = (Z_DIM, HIDDEN, HIDDEN * 2, HIDDEN * 4, HIDDEN * 8, IM_DIM)

MIN_TILE = 16  # bf16 native tile is (16, 128): round batch tiles to 16 rows
BATCH = 8      # small example batch for the __main__ check


def _cdiv(a, b):
    return (a + b - 1) // b


def _round_up(x, m):
    return _cdiv(x, m) * m


def _generator_mlp_kernel(x_ref,
                          w1_ref, b1_ref,
                          w2_ref, b2_ref,
                          w3_ref, b3_ref,
                          w4_ref, b4_ref,
                          w5_ref, b5_ref,
                          o_ref):
    """Fused 5-layer MLP on one batch tile: 4x (matmul+bias+ReLU), matmul+bias+sigmoid."""
    h = x_ref[...]  # already bf16 (cast once in the wrapper)

    def linear_relu(h, w_ref, b_ref):
        y = jnp.dot(h, w_ref[...], preferred_element_type=jnp.float32)
        y = y + b_ref[...]                     # (1, out) broadcasts over batch rows
        return jnp.maximum(y, 0.0).astype(jnp.bfloat16)

    h = linear_relu(h, w1_ref, b1_ref)
    h = linear_relu(h, w2_ref, b2_ref)
    h = linear_relu(h, w3_ref, b3_ref)
    h = linear_relu(h, w4_ref, b4_ref)

    logits = jnp.dot(h, w5_ref[...], preferred_element_type=jnp.float32)
    logits = logits + b5_ref[...]
    o_ref[...] = jax.nn.sigmoid(logits).astype(o_ref.dtype)  # bf16 store


@functools.partial(jax.jit, static_argnames=("tm",))
def generator_forward(noise, params, *, tm=512):
    """noise: (N, 100) f32; params: flat tuple (w1, b1, ..., w5, b5), padded shapes.

    Returns (N, 784) f32.
    """
    n, zin = noise.shape

    # Balanced batch tiling: rows per tile rounded to 16, capped at `tm`, and at
    # least 2 tiles whenever the batch allows it (keeps both v7x TensorCores busy
    # and avoids up-to-2x padding waste at awkward batch sizes).
    n_tiles = max(1, _cdiv(n, tm))
    if n >= 2 * MIN_TILE:
        n_tiles = max(n_tiles, 2)
    tm_eff = _round_up(_cdiv(n, n_tiles), MIN_TILE)
    n_pad = tm_eff * n_tiles

    # Pad noise features 100 -> 128 and batch n -> n_pad; cast to bf16 here
    # (halves per-tile input DMA and removes an in-kernel VPU cast).
    noise_p = jnp.zeros((n_pad, Z_PAD), jnp.bfloat16)
    noise_p = noise_p.at[:n, :zin].set(noise.astype(jnp.bfloat16))

    # Batch-tiled input/output; weights & biases resident with a single buffer
    # (constant block index -> no re-DMA, so a second pipeline buffer is waste).
    in_specs = [pl.BlockSpec((tm_eff, Z_PAD), lambda i: (i, 0))]
    for li in range(5):
        din, dout = _DIMS[li], _DIMS[li + 1]
        in_specs.append(pl.BlockSpec((din, dout), lambda i: (0, 0),
                                     pipeline_mode=pl.Buffered(1)))   # weight
        in_specs.append(pl.BlockSpec((1, dout), lambda i: (0, 0),
                                     pipeline_mode=pl.Buffered(1)))   # bias
    out_spec = pl.BlockSpec((tm_eff, IM_PAD), lambda i: (i, 0))

    # Advisory cost estimate for XLA's scheduler (bf16 I/O streams).
    flops = 2 * n_pad * sum(_DIMS[i] * _DIMS[i + 1] for i in range(5))
    w_bytes = sum(_DIMS[i] * _DIMS[i + 1] * 2 + _DIMS[i + 1] * 4 for i in range(5))
    bytes_accessed = w_bytes + n_pad * Z_PAD * 2 + n_pad * IM_PAD * 2

    out_p = pl.pallas_call(
        _generator_mlp_kernel,
        out_shape=jax.ShapeDtypeStruct((n_pad, IM_PAD), jnp.bfloat16),
        grid=(n_tiles,),
        in_specs=in_specs,
        out_specs=out_spec,
        compiler_params=pltpu.CompilerParams(
            dimension_semantics=("parallel",),      # shard batch tiles over TCs
            vmem_limit_bytes=32 * 1024 * 1024,      # explicit (v5e default is 16 MiB)
        ),
        cost_estimate=pl.CostEstimate(
            flops=flops,
            transcendentals=n_pad * IM_PAD,
            bytes_accessed=bytes_accessed,
        ),
    )(noise_p, *params)

    # Padded cols 784..895 contain sigmoid(0)=0.5 and padded batch rows are
    # dead work; both get sliced off here. Cast back to f32 to match the
    # original module's output dtype (the slice copy moves bf16 = half bytes).
    return out_p[:n, :IM_DIM].astype(jnp.float32)


def init_params(key, std=0.02):
    """Synthetic init mirroring normal_init: N(0, std) weights, zero biases.

    Weights are stored transposed vs PyTorch, i.e. (in_features, out_features),
    zero-padded to (Z_PAD, ...) / (..., IM_PAD) and cast to bfloat16. Biases are
    (1, out_pad) f32 rows (padded tail is zero).
    """
    params = []
    for li in range(5):
        key, sub = jax.random.split(key)
        din, dout = _LOGICAL_DIMS[li], _LOGICAL_DIMS[li + 1]
        dpin, dpout = _DIMS[li], _DIMS[li + 1]
        w = jax.random.normal(sub, (din, dout), dtype=jnp.float32) * std
        w_pad = jnp.zeros((dpin, dpout), jnp.float32).at[:din, :dout].set(w)
        params.append(w_pad.astype(jnp.bfloat16))
        params.append(jnp.zeros((1, dpout), jnp.float32))
    return tuple(params)


def _reference_forward(noise, params):
    """Pure-JAX f32 reference (same bf16 weights upcast to f32)."""
    n, zin = noise.shape
    h = jnp.zeros((n, Z_PAD), jnp.float32).at[:, :zin].set(noise)
    for i in range(4):
        w = params[2 * i].astype(jnp.float32)
        b = params[2 * i + 1]
        h = jnp.maximum(h @ w + b, 0.0)
    w = params[8].astype(jnp.float32)
    b = params[9]
    return jax.nn.sigmoid(h @ w + b)[:, :IM_DIM]


if __name__ == "__main__":
    key = jax.random.PRNGKey(0)
    k_noise, k_params = jax.random.split(key)

    noise = jax.random.normal(k_noise, (BATCH, Z_DIM), dtype=jnp.float32)
    params = init_params(k_params)

    out = generator_forward(noise, params)
    out = jax.block_until_ready(out)

    assert out.shape == (BATCH, IM_DIM), out.shape
    assert out.dtype == jnp.float32, out.dtype
    ref = _reference_forward(noise, params)
    # bf16 matmuls/activations/output with f32 accumulation -> looser tolerance
    # than a pure-f32 pipeline.
    assert jnp.allclose(out, ref, atol=2e-2, rtol=2e-2), "mismatch vs reference"

    print("KERNEL_OK")
</pallas_src>

<mosaic_0001>
module attributes {stable_mosaic.version = 11 : i64} {
  func.func @_generator_mlp_kernel(%arg0: i32, %arg1: memref<16x128xbf16, #tpu.memory_space<vmem>>, %arg2: memref<128x128xbf16, #tpu.memory_space<vmem>>, %arg3: memref<1x128xf32, #tpu.memory_space<vmem>>, %arg4: memref<128x256xbf16, #tpu.memory_space<vmem>>, %arg5: memref<1x256xf32, #tpu.memory_space<vmem>>, %arg6: memref<256x512xbf16, #tpu.memory_space<vmem>>, %arg7: memref<1x512xf32, #tpu.memory_space<vmem>>, %arg8: memref<512x1024xbf16, #tpu.memory_space<vmem>>, %arg9: memref<1x1024xf32, #tpu.memory_space<vmem>>, %arg10: memref<1024x896xbf16, #tpu.memory_space<vmem>>, %arg11: memref<1x896xf32, #tpu.memory_space<vmem>>, %arg12: memref<16x896xbf16, #tpu.memory_space<vmem>>) attributes {dimension_semantics = [#tpu.dimension_semantics<parallel>], iteration_bounds = array<i64: 1>, scalar_prefetch = 0 : i64, scratch_operands = 0 : i64, tpu.core_type = #tpu.core_type<tc>, window_params = [{transform_indices = @transform_0, window_bounds = array<i64: 16, 128>}, {pipeline_mode = #tpu.pipeline_mode<synchronous>, transform_indices = @transform_1, window_bounds = array<i64: 128, 128>}, {pipeline_mode = #tpu.pipeline_mode<synchronous>, transform_indices = @transform_2, window_bounds = array<i64: 1, 128>}, {pipeline_mode = #tpu.pipeline_mode<synchronous>, transform_indices = @transform_3, window_bounds = array<i64: 128, 256>}, {pipeline_mode = #tpu.pipeline_mode<synchronous>, transform_indices = @transform_4, window_bounds = array<i64: 1, 256>}, {pipeline_mode = #tpu.pipeline_mode<synchronous>, transform_indices = @transform_5, window_bounds = array<i64: 256, 512>}, {pipeline_mode = #tpu.pipeline_mode<synchronous>, transform_indices = @transform_6, window_bounds = array<i64: 1, 512>}, {pipeline_mode = #tpu.pipeline_mode<synchronous>, transform_indices = @transform_7, window_bounds = array<i64: 512, 1024>}, {pipeline_mode = #tpu.pipeline_mode<synchronous>, transform_indices = @transform_8, window_bounds = array<i64: 1, 1024>}, {pipeline_mode = #tpu.pipeline_mode<synchronous>, transform_indices = @transform_9, window_bounds = array<i64: 1024, 896>}, {pipeline_mode = #tpu.pipeline_mode<synchronous>, transform_indices = @transform_10, window_bounds = array<i64: 1, 896>}, {transform_indices = @transform_11, window_bounds = array<i64: 16, 896>}]} {
    %c0 = arith.constant 0 : index
    %c0_0 = arith.constant 0 : index
    %0 = vector.load %arg1[%c0, %c0_0] : memref<16x128xbf16, #tpu.memory_space<vmem>>, vector<16x128xbf16>
    %c0_1 = arith.constant 0 : index
    %c0_2 = arith.constant 0 : index
    %1 = vector.load %arg2[%c0_1, %c0_2] : memref<128x128xbf16, #tpu.memory_space<vmem>>, vector<128x128xbf16>
    %cst = arith.constant dense<0.000000e+00> : vector<16x128xf32>
    %2 = tpu.matmul %0, %1, %cst {dimension_numbers = #tpu.dot_dimension_numbers<[1], [0], [0], [1], [0, 0, 1, 1], [], []>} : vector<16x128xbf16>, vector<128x128xbf16>, vector<16x128xf32> -> vector<16x128xf32>
    %c0_3 = arith.constant 0 : index
    %c0_4 = arith.constant 0 : index
    %3 = vector.load %arg3[%c0_3, %c0_4] : memref<1x128xf32, #tpu.memory_space<vmem>>, vector<1x128xf32>
    %4 = vector.broadcast %3 : vector<1x128xf32> to vector<16x128xf32>
    %5 = arith.addf %2, %4 : vector<16x128xf32>
    %cst_5 = arith.constant 0.000000e+00 : f32
    %6 = vector.broadcast %cst_5 : f32 to vector<16x128xf32>
    %7 = arith.maximumf %5, %6 : vector<16x128xf32>
    %8 = arith.truncf %7 : vector<16x128xf32> to vector<16x128xbf16>
    %c0_6 = arith.constant 0 : index
    %c0_7 = arith.constant 0 : index
    %9 = vector.load %arg4[%c0_6, %c0_7] : memref<128x256xbf16, #tpu.memory_space<vmem>>, vector<128x256xbf16>
    %cst_8 = arith.constant dense<0.000000e+00> : vector<16x256xf32>
    %10 = tpu.matmul %8, %9, %cst_8 {dimension_numbers = #tpu.dot_dimension_numbers<[1], [0], [0], [1], [0, 0, 1, 1], [], []>} : vector<16x128xbf16>, vector<128x256xbf16>, vector<16x256xf32> -> vector<16x256xf32>
    %c0_9 = arith.constant 0 : index
    %c0_10 = arith.constant 0 : index
    %11 = vector.load %arg5[%c0_9, %c0_10] : memref<1x256xf32, #tpu.memory_space<vmem>>, vector<1x256xf32>
    %12 = vector.broadcast %11 : vector<1x256xf32> to vector<16x256xf32>
    %13 = arith.addf %10, %12 : vector<16x256xf32>
    %cst_11 = arith.constant 0.000000e+00 : f32
    %14 = vector.broadcast %cst_11 : f32 to vector<16x256xf32>
    %15 = arith.maximumf %13, %14 : vector<16x256xf32>
    %16 = arith.truncf %15 : vector<16x256xf32> to vector<16x256xbf16>
    %c0_12 = arith.constant 0 : index
    %c0_13 = arith.constant 0 : index
    %17 = vector.load %arg6[%c0_12, %c0_13] : memref<256x512xbf16, #tpu.memory_space<vmem>>, vector<256x512xbf16>
    %cst_14 = arith.constant dense<0.000000e+00> : vector<16x512xf32>
    %18 = tpu.matmul %16, %17, %cst_14 {dimension_numbers = #tpu.dot_dimension_numbers<[1], [0], [0], [1], [0, 0, 1, 1], [], []>} : vector<16x256xbf16>, vector<256x512xbf16>, vector<16x512xf32> -> vector<16x512xf32>
    %c0_15 = arith.constant 0 : index
    %c0_16 = arith.constant 0 : index
    %19 = vector.load %arg7[%c0_15, %c0_16] : memref<1x512xf32, #tpu.memory_space<vmem>>, vector<1x512xf32>
    %20 = vector.broadcast %19 : vector<1x512xf32> to vector<16x512xf32>
    %21 = arith.addf %18, %20 : vector<16x512xf32>
    %cst_17 = arith.constant 0.000000e+00 : f32
    %22 = vector.broadcast %cst_17 : f32 to vector<16x512xf32>
    %23 = arith.maximumf %21, %22 : vector<16x512xf32>
    %24 = arith.truncf %23 : vector<16x512xf32> to vector<16x512xbf16>
    %c0_18 = arith.constant 0 : index
    %c0_19 = arith.constant 0 : index
    %25 = vector.load %arg8[%c0_18, %c0_19] : memref<512x1024xbf16, #tpu.memory_space<vmem>>, vector<512x1024xbf16>
    %cst_20 = arith.constant dense<0.000000e+00> : vector<16x1024xf32>
    %26 = tpu.matmul %24, %25, %cst_20 {dimension_numbers = #tpu.dot_dimension_numbers<[1], [0], [0], [1], [0, 0, 1, 1], [], []>} : vector<16x512xbf16>, vector<512x1024xbf16>, vector<16x1024xf32> -> vector<16x1024xf32>
    %c0_21 = arith.constant 0 : index
    %c0_22 = arith.constant 0 : index
    %27 = vector.load %arg9[%c0_21, %c0_22] : memref<1x1024xf32, #tpu.memory_space<vmem>>, vector<1x1024xf32>
    %28 = vector.broadcast %27 : vector<1x1024xf32> to vector<16x1024xf32>
    %29 = arith.addf %26, %28 : vector<16x1024xf32>
    %cst_23 = arith.constant 0.000000e+00 : f32
    %30 = vector.broadcast %cst_23 : f32 to vector<16x1024xf32>
    %31 = arith.maximumf %29, %30 : vector<16x1024xf32>
    %32 = arith.truncf %31 : vector<16x1024xf32> to vector<16x1024xbf16>
    %c0_24 = arith.constant 0 : index
    %c0_25 = arith.constant 0 : index
    %33 = vector.load %arg10[%c0_24, %c0_25] : memref<1024x896xbf16, #tpu.memory_space<vmem>>, vector<1024x896xbf16>
    %cst_26 = arith.constant dense<0.000000e+00> : vector<16x896xf32>
    %34 = tpu.matmul %32, %33, %cst_26 {dimension_numbers = #tpu.dot_dimension_numbers<[1], [0], [0], [1], [0, 0, 1, 1], [], []>} : vector<16x1024xbf16>, vector<1024x896xbf16>, vector<16x896xf32> -> vector<16x896xf32>
    %c0_27 = arith.constant 0 : index
    %c0_28 = arith.constant 0 : index
    %35 = vector.load %arg11[%c0_27, %c0_28] : memref<1x896xf32, #tpu.memory_space<vmem>>, vector<1x896xf32>
    %36 = vector.broadcast %35 : vector<1x896xf32> to vector<16x896xf32>
    %37 = arith.addf %34, %36 : vector<16x896xf32>
    %38 = arith.negf %37 : vector<16x896xf32>
    %39 = math.exp %38 : vector<16x896xf32>
    %cst_29 = arith.constant 1.000000e+00 : f32
    %40 = vector.broadcast %cst_29 : f32 to vector<16x896xf32>
    %41 = arith.addf %40, %39 : vector<16x896xf32>
    %42 = arith.divf %40, %41 : vector<16x896xf32>
    %43 = arith.truncf %42 : vector<16x896xf32> to vector<16x896xbf16>
    %c0_30 = arith.constant 0 : index
    %c0_31 = arith.constant 0 : index
    %44 = vector.load %arg12[%c0_30, %c0_31] : memref<16x896xbf16, #tpu.memory_space<vmem>>, vector<16x896xbf16>
    tpu.vector_store %arg12[%c0_30, %c0_31], %43 {strides = array<i32>} : memref<16x896xbf16, #tpu.memory_space<vmem>>, vector<16x896xbf16>,
    return
  }
  func.func @transform_0(%arg0: i32) -> (i32, i32) {
    %c0_i32 = arith.constant 0 : i32
    %c0_i32_0 = arith.constant 0 : i32
    return %arg0, %c0_i32 : i32, i32
  }
  func.func @transform_1(%arg0: i32) -> (i32, i32) {
    %c0_i32 = arith.constant 0 : i32
    %c0_i32_0 = arith.constant 0 : i32
    %c0_i32_1 = arith.constant 0 : i32
    return %c0_i32, %c0_i32_0 : i32, i32
  }
  func.func @transform_2(%arg0: i32) -> (i32, i32) {
    %c0_i32 = arith.constant 0 : i32
    %c0_i32_0 = arith.constant 0 : i32
    %c0_i32_1 = arith.constant 0 : i32
    return %c0_i32, %c0_i32_0 : i32, i32
  }
  func.func @transform_3(%arg0: i32) -> (i32, i32) {
    %c0_i32 = arith.constant 0 : i32
    %c0_i32_0 = arith.constant 0 : i32
    %c0_i32_1 = arith.constant 0 : i32
    return %c0_i32, %c0_i32_0 : i32, i32
  }
  func.func @transform_4(%arg0: i32) -> (i32, i32) {
    %c0_i32 = arith.constant 0 : i32
    %c0_i32_0 = arith.constant 0 : i32
    %c0_i32_1 = arith.constant 0 : i32
    return %c0_i32, %c0_i32_0 : i32, i32
  }
  func.func @transform_5(%arg0: i32) -> (i32, i32) {
    %c0_i32 = arith.constant 0 : i32
    %c0_i32_0 = arith.constant 0 : i32
    %c0_i32_1 = arith.constant 0 : i32
    return %c0_i32, %c0_i32_0 : i32, i32
  }
  func.func @transform_6(%arg0: i32) -> (i32, i32) {
    %c0_i32 = arith.constant 0 : i32
    %c0_i32_0 = arith.constant 0 : i32
    %c0_i32_1 = arith.constant 0 : i32
    return %c0_i32, %c0_i32_0 : i32, i32
  }
  func.func @transform_7(%arg0: i32) -> (i32, i32) {
    %c0_i32 = arith.constant 0 : i32
    %c0_i32_0 = arith.constant 0 : i32
    %c0_i32_1 = arith.constant 0 : i32
    return %c0_i32, %c0_i32_0 : i32, i32
  }
  func.func @transform_8(%arg0: i32) -> (i32, i32) {
    %c0_i32 = arith.constant 0 : i32
    %c0_i32_0 = arith.constant 0 : i32
    %c0_i32_1 = arith.constant 0 : i32
    return %c0_i32, %c0_i32_0 : i32, i32
  }
  func.func @transform_9(%arg0: i32) -> (i32, i32) {
    %c0_i32 = arith.constant 0 : i32
    %c0_i32_0 = arith.constant 0 : i32
    %c0_i32_1 = arith.constant 0 : i32
    return %c0_i32, %c0_i32_0 : i32, i32
  }
  func.func @transform_10(%arg0: i32) -> (i32, i32) {
    %c0_i32 = arith.constant 0 : i32
    %c0_i32_0 = arith.constant 0 : i32
    %c0_i32_1 = arith.constant 0 : i32
    return %c0_i32, %c0_i32_0 : i32, i32
  }
  func.func @transform_11(%arg0: i32) -> (i32, i32) {
    %c0_i32 = arith.constant 0 : i32
    %c0_i32_0 = arith.constant 0 : i32
    return %arg0, %c0_i32 : i32, i32
  }
}

</mosaic_0001>

<bundles_post_ra>
// kernel: generator_forward.1
= control target key start
LH: loop header
LB: loop body
LE: loop exit
PB: predicated region body
PF: predicated region fallthrough
CT: control target
= control target key end

     0   :  { %16 = vsyncpa [#allocation3], 0  ;;  %s8862_s0 = inlined_call_operand.vmem [shape: bf16[16,128], index: 0, kind: input, shape index: {}]   ;;  %s8863_s1 = inlined_call_operand.hbm [shape: bf16[128,128], index: 1, kind: input, shape index: {}]   ;;  %s8864_s2 = inlined_call_operand.hbm [shape: f32[1,128], index: 2, kind: input, shape index: {}]   ;;  %s8865_s3 = inlined_call_operand.hbm [shape: bf16[128,256], index: 3, kind: input, shape index: {}]   ;;  %s8866_s4 = inlined_call_operand.hbm [shape: f32[1,256], index: 4, kind: input, shape index: {}]   ;;  %s8867_s5 = inlined_call_operand.hbm [shape: bf16[256,512], index: 5, kind: input, shape index: {}]   ;;  %s8868_s6 = inlined_call_operand.hbm [shape: f32[1,512], index: 6, kind: input, shape index: {}]   ;;  %s8869_s7 = inlined_call_operand.hbm [shape: bf16[512,1024], index: 7, kind: input, shape index: {}]   ;;  %s8870_s8 = inlined_call_operand.hbm [shape: f32[1,1024], index: 8, kind: input, shape index: {}]   ;;  %s8871_s9 = inlined_call_operand.hbm [shape: bf16[1024,896], index: 9, kind: input, shape index: {}]   ;;  %s8872_s10 = inlined_call_operand.hbm [shape: f32[1,896], index: 10, kind: input, shape index: {}]   ;;  %s8873_s11 = inlined_call_operand.vmem [shape: bf16[16,896], index: 11, kind: output, shape index: {}]  }
   0x1   :  { %17 = vsyncpa [#allocation5], 0 }
   0x2   :  { %18 = vsyncpa [#allocation8], 0 }
   0x3   :  { %19 = vsyncpa [#allocation11], 0 }
   0x4   :  { %20 = vsyncpa [#allocation14], 0 }
   0x5   :  { %21 = vsyncpa [#allocation17], 0  ;;  %s8575_s17 = smov [#allocation4]   ;;  %s8576_s19 = smov [#allocation7]  }
   0x6   :  { %s42_s18 = sshll.u32 %s8575_s17, 4  ;;  %s64_s20 = sshll.u32 %s8576_s19, 4  ;;  %s43_s18 = int_to_ptr.vmem [resolvable:$true] %s42_s18  ;;  %s65_s20 = int_to_ptr.vmem [resolvable:$true] %s64_s20 }
   0x7   :  { %s8371_s21 = scalar_lea.vmem %s43_s18, 16  ;;  %s8375_s22 = scalar_lea.vmem %s43_s18, 32 }
   0x8   :  { %p8372_p0 = scmp.ne.s32.totalorder %s43_s18, %s8371_s21  ;;  %p8376_p1 = scmp.lt.s32.totalorder %s43_s18, %s43_s18 }
   0x9   :  { %p8377_p2 = scmp.lt.s32.totalorder %s8375_s22, %s8371_s21 }
   0xb   :  { %p8378_p3 = por %p8377_p2, %p8376_p1 }
   0xd   :  { %p8379_p4 = pnand %p8378_p3, %p8372_p0 }
   0xf   :  { %8382 = shalt.err (!%p8379_p4)
}
  0x10   :  { %45 = dma.hbm_to_vmem [thread:$0]  %s8864_s2, 16, %s43_s18, [#allocation5]  }
  0x11   :  { %s8391_s25 = scalar_lea.vmem %s65_s20, 32  ;;  %p8396_p6 = scmp.lt.s32.totalorder %s65_s20, %s65_s20 }
  0x12   :  { %p8392_p5 = scmp.ne.s32.totalorder %s65_s20, %s8391_s25  ;;  %p8397_p7 = scmp.lt.s32.totalorder %s8391_s25, %s8391_s25 }
  0x14   :  { %p8398_p8 = por %p8397_p7, %p8396_p6 }
  0x16   :  { %p8399_p9 = pnand %p8398_p8, %p8392_p5 }
  0x18   :  { %8402 = shalt.err (!%p8399_p9)
}
  0x19   :  { %67 = dma.hbm_to_vmem [thread:$0]  %s8866_s4, 32, %s65_s20, [#allocation8]  }
  0x1a   :  { %s8577_s28 = smov [#allocation10]   ;;  %s8578_s30 = smov [#allocation13]  }
  0x1b   :  { %s86_s29 = sshll.u32 %s8577_s28, 4  ;;  %s108_s12 = sshll.u32 %s8578_s30, 4  ;;  %s87_s29 = int_to_ptr.vmem [resolvable:$true] %s86_s29  ;;  %s109_s12 = int_to_ptr.vmem [resolvable:$true] %s108_s12 }
  0x1c   :  { %s8411_s13 = scalar_lea.vmem %s87_s29, 64  ;;  %p8416_p11 = scmp.lt.s32.totalorder %s87_s29, %s87_s29 }
  0x1d   :  { %p8412_p10 = scmp.ne.s32.totalorder %s87_s29, %s8411_s13  ;;  %p8417_p12 = scmp.lt.s32.totalorder %s8411_s13, %s8411_s13 }
  0x1f   :  { %p8418_p13 = por %p8417_p12, %p8416_p11 }
  0x21   :  { %p8419_p0 = pnand %p8418_p13, %p8412_p10 }
  0x23   :  { %8422 = shalt.err (!%p8419_p0)
}
  0x24   :  { %89 = dma.hbm_to_vmem [thread:$0]  %s8868_s6, 64, %s87_s29, [#allocation11]  }
  0x25   :  { %s8431_s15 = scalar_lea.vmem %s109_s12, 128  ;;  %p8436_p2 = scmp.lt.s32.totalorder %s109_s12, %s109_s12 }
  0x26   :  { %p8432_p1 = scmp.ne.s32.totalorder %s109_s12, %s8431_s15  ;;  %p8437_p3 = scmp.lt.s32.totalorder %s8431_s15, %s8431_s15 }
  0x28   :  { %p8438_p4 = por %p8437_p3, %p8436_p2 }
  0x2a   :  { %p8439_p5 = pnand %p8438_p4, %p8432_p1 }
  0x2c   :  { %8442 = shalt.err (!%p8439_p5)
}
  0x2d   :  { %111 = dma.hbm_to_vmem [thread:$0]  %s8870_s8, 128, %s109_s12, [#allocation14]  }
  0x2e   :  { %s8579_s17 = smov [#allocation2]  }
  0x2f   :  { %s29_s18 = sshll.u32 %s8579_s17, 4  ;;  %s30_s18 = int_to_ptr.vmem [resolvable:$true] %s29_s18 }
  0x30   :  { %s8451_s19 = scalar_lea.vmem %s30_s18, 1024  ;;  %p8456_p7 = scmp.lt.s32.totalorder %s30_s18, %s30_s18 }
  0x31   :  { %p8452_p6 = scmp.ne.s32.totalorder %s30_s18, %s8451_s19  ;;  %p8457_p8 = scmp.lt.s32.totalorder %s8451_s19, %s8451_s19 }
  0x33   :  { %p8458_p9 = por %p8457_p8, %p8456_p7 }
  0x35   :  { %p8459_p10 = pnand %p8458_p9, %p8452_p6 }
  0x37   :  { %8462 = shalt.err (!%p8459_p10)
}
  0x38   :  { %s8580_s6 = smov 64   ;;  %s8581_s20 = smov 4  }
  0x39   :  { %35 = dma.hbm_to_vmem [thread:$0]  %s8863_s1, 1024, %s30_s18, [#allocation3], %s8580_s6, %s8580_s6, %s8581_s20  }
  0x3a   :  { %s8582_s23 = smov [#allocation6]  }
  0x3b   :  { %s51_s24 = sshll.u32 %s8582_s23, 4  ;;  %s52_s24 = int_to_ptr.vmem [resolvable:$true] %s51_s24 }
  0x3c   :  { %s8471_s8 = scalar_lea.vmem %s52_s24, 2048  ;;  %p8476_p12 = scmp.lt.s32.totalorder %s52_s24, %s52_s24 }
  0x3d   :  { %p8472_p11 = scmp.ne.s32.totalorder %s52_s24, %s8471_s8  ;;  %p8477_p13 = scmp.lt.s32.totalorder %s8471_s8, %s8471_s8 }
  0x3f   :  { %p8478_p0 = por %p8477_p13, %p8476_p12 }
  0x41   :  { %p8479_p1 = pnand %p8478_p0, %p8472_p11 }
  0x43   :  { %8482 = shalt.err (!%p8479_p1)
}
  0x44   :  { %s8583_s25 = smov 128   ;;  %s8584_s26 = smov 8  }
  0x45   :  { %57 = dma.hbm_to_vmem [thread:$0]  %s8865_s3, 2048, %s52_s24, [#allocation5], %s8583_s25, %s8583_s25, %s8584_s26  }
  0x46   :  { %s8585_s29 = smov [#allocation9]  }
  0x47   :  { %s73_s30 = sshll.u32 %s8585_s29, 4  ;;  %s74_s30 = int_to_ptr.vmem [resolvable:$true] %s73_s30 }
  0x48   :  { %s8491_s1 = scalar_lea.vmem %s74_s30, 8192  ;;  %p8496_p3 = scmp.lt.s32.totalorder %s74_s30, %s74_s30 }
  0x49   :  { %p8492_p2 = scmp.ne.s32.totalorder %s74_s30, %s8491_s1  ;;  %p8497_p4 = scmp.lt.s32.totalorder %s8491_s1, %s8491_s1 }
  0x4b   :  { %p8498_p5 = por %p8497_p4, %p8496_p3 }
  0x4d   :  { %p8499_p6 = pnand %p8498_p5, %p8492_p2 }
  0x4f   :  { %8502 = shalt.err (!%p8499_p6)
}
  0x50   :  { %s8586_s12 = smov 256   ;;  %s8587_s13 = smov 16  }
  0x51   :  { %79 = dma.hbm_to_vmem [thread:$0]  %s8867_s5, 8192, %s74_s30, [#allocation8], %s8586_s12, %s8586_s12, %s8587_s13  }
  0x52   :  { %s8588_s15 = smov [#allocation12]  }
  0x53   :  { %s95_s4 = sshll.u32 %s8588_s15, 4  ;;  %s96_s4 = int_to_ptr.vmem [resolvable:$true] %s95_s4 }
  0x54   :  { %s8511_s3 = scalar_lea.vmem %s96_s4, 32768  ;;  %p8516_p8 = scmp.lt.s32.totalorder %s96_s4, %s96_s4 }
  0x55   :  { %p8512_p7 = scmp.ne.s32.totalorder %s96_s4, %s8511_s3  ;;  %p8517_p9 = scmp.lt.s32.totalorder %s8511_s3, %s8511_s3 }
  0x57   :  { %p8518_p10 = por %p8517_p9, %p8516_p8 }
  0x59   :  { %p8519_p11 = pnand %p8518_p10, %p8512_p7 }
  0x5b   :  { %8522 = shalt.err (!%p8519_p11)
}
  0x5c   :  { %s8589_s16 = smov 512   ;;  %s8590_s17 = smov 32  }
  0x5d   :  { %101 = dma.hbm_to_vmem [thread:$0]  %s8869_s7, 32768, %s96_s4, [#allocation11], %s8589_s16, %s8589_s16, %s8590_s17  }
  0x5e   :  { %s8591_s6 = smov [#allocation15]  }
  0x5f   :  { %s117_s20 = sshll.u32 %s8591_s6, 4  ;;  %s118_s20 = int_to_ptr.vmem [resolvable:$true] %s117_s20 }
  0x60   :  { %s8531_s5 = scalar_lea.vmem %s118_s20, 57344  ;;  %p8536_p13 = scmp.lt.s32.totalorder %s118_s20, %s118_s20 }
  0x61   :  { %p8532_p12 = scmp.ne.s32.totalorder %s118_s20, %s8531_s5  ;;  %p8537_p0 = scmp.lt.s32.totalorder %s8531_s5, %s8531_s5 }
  0x63   :  { %p8538_p1 = por %p8537_p0, %p8536_p13 }
  0x65   :  { %p8539_p2 = pnand %p8538_p1, %p8532_p12 }
  0x67   :  { %8542 = shalt.err (!%p8539_p2)
}
  0x68   :  { %s8592_s21 = smov 448   ;;  %s8593_s22 = smov 28  }
  0x69   :  { %123 = dma.hbm_to_vmem [thread:$0]  %s8871_s9, 57344, %s118_s20, [#allocation14], %s8592_s21, %s8592_s21, %s8593_s22  }
  0x6a   :  { %s8594_s8 = smov [#allocation16]  }
  0x6b   :  { %s130_s25 = sshll.u32 %s8594_s8, 4  ;;  %s131_s25 = int_to_ptr.vmem [resolvable:$true] %s130_s25 }
  0x6c   :  { %s8551_s7 = scalar_lea.vmem %s131_s25, 112  ;;  %s8555_s26 = scalar_lea.vmem %s131_s25, 128 }
  0x6d   :  { %p8552_p3 = scmp.ne.s32.totalorder %s131_s25, %s8551_s7  ;;  %p8556_p4 = scmp.lt.s32.totalorder %s131_s25, %s131_s25 }
  0x6e   :  { %p8557_p5 = scmp.lt.s32.totalorder %s8555_s26, %s8551_s7 }
  0x70   :  { %p8558_p6 = por %p8557_p5, %p8556_p4 }
  0x72   :  { %p8559_p7 = pnand %p8558_p6, %p8552_p3 }
  0x74   :  { %8562 = shalt.err (!%p8559_p7)
}
  0x75   :  { %133 = dma.hbm_to_vmem [thread:$0]  %s8872_s10, 112, %s131_s25, [#allocation17]  }
  0x76   :  { %8563 = dma.done.wait [#allocation3], 1024  }
  0x77   :  { %8564 = vsyncadd [#allocation3], 4294966272 }
  0x78   :  { %8565 = dma.done.wait [#allocation5], 2064  }
  0x79   :  { %8566 = vsyncadd [#allocation5], 4294965232 }
  0x7a   :  { %8567 = dma.done.wait [#allocation8], 8224  }
  0x7b   :  { %8568 = vsyncadd [#allocation8], 4294959072 }
  0x7c   :  { %8569 = dma.done.wait [#allocation11], 32832  }
  0x7d   :  { %8570 = vsyncadd [#allocation11], 4294934464 }
  0x7e   :  { %8571 = dma.done.wait [#allocation14], 57472  }
  0x7f   :  { %8572 = vsyncadd [#allocation14], 4294909824 }
  0x80   :  { %8573 = dma.done.wait [#allocation17], 112  }
  0x81   :  { %8574 = vsyncadd [#allocation17], 4294967184  ;;  %v8595_v0 = vmov 0.0   ;;  %vm8596_vm0 = vmmov 0   ;;  %v7538_v1 = vld [vmem:[#allocation2 + $0x38] sm:$0xff]   ;;  %v7539_v2 = vld [vmem:[#allocation2 + $0x30] sm:$0xff]  }
  0x82   :  { %7495 = vmatprep.subr.bf16.mxu0 %v8595_v0  ;;  %7511 = vmatprep.mubr.msk.bf16.mxu0 %vm8596_vm0, %v8595_v0  ;;  %v7540_v3 = vld [vmem:[#allocation2 + $0x28] sm:$0xff]   ;;  %v7541_v4 = vld [vmem:[#allocation2 + $0x20] sm:$0xff]   ;;  %v7549_v6 = vld [vmem:[#allocation6 + $0x70] ss:$8 sps:$4 sm:$0xff]   ;;  %v8597_v26 = vmov 0  }
  0x83   :  { %7496 = vmatpush3.bf16.msra.mxu0 %v7538_v1  ;;  %v7547_v5 = vld [vmem:[#allocation6 + $0x74] ss:$8 sps:$4 sm:$0xff]   ;;  %v7550_v7 = vld [vmem:[#allocation6 + $0x64] ss:$8 sps:$4 sm:$0xff]   ;;  %v7552_v8 = vld [vmem:[#allocation6 + $0x60] ss:$8 sps:$4 sm:$0xff]   ;;  %428 = vmatprep.mubr.bf16.mxu1 %v8597_v26 }
  0x84   :  { %7497 = vmatprep.subr.bf16.mxu0 %v8595_v0  ;;  %396 = vmatprep.subr.bf16.mxu1 %v7547_v5  ;;  %v7553_v9 = vld [vmem:[#allocation6 + $0x54] ss:$8 sps:$4 sm:$0xff]   ;;  %v7555_v12 = vld [vmem:[#allocation6 + $0x50] ss:$8 sps:$4 sm:$0xff]   ;;  %v7556_v13 = vld [vmem:[#allocation6 + $0x44] ss:$8 sps:$4 sm:$0xff]  }
  0x85   :  { %397 = vmatpush1.bf16.msra.mxu1 %v7549_v6  ;;  %v7542_v10 = vld [vmem:[#allocation2 + $0x18] sm:$0xff]   ;;  %v7543_v11 = vld [vmem:[#allocation2 + $0x10] sm:$0xff]   ;;  %v7558_v14 = vld [vmem:[#allocation6 + $0x40] ss:$8 sps:$4 sm:$0xff]  }
  0x86   :  { %398 = vmatprep.subr.bf16.mxu1 %v7550_v7  ;;  %v7559_v15 = vld [vmem:[#allocation6 + $0x34] ss:$8 sps:$4 sm:$0xff]   ;;  %v7544_v16 = vld [vmem:[#allocation2 + $0x8] sm:$0xff]   ;;  %v7561_v17 = vld [vmem:[#allocation6 + $0x30] ss:$8 sps:$4 sm:$0xff]  }
  0x87   :  { %7498 = vmatpush3.bf16.msra.mxu0 %v7539_v2  ;;  %v7562_v18 = vld [vmem:[#allocation6 + $0x24] ss:$8 sps:$4 sm:$0xff]   ;;  %v7564_v21 = vld [vmem:[#allocation6 + $0x20] ss:$8 sps:$4 sm:$0xff]   ;;  %v7565_v22 = vld [vmem:[#allocation6 + $0x14] ss:$8 sps:$4 sm:$0xff]  }
  0x88   :  { %7499 = vmatprep.subr.bf16.mxu0 %v8595_v0  ;;  %v7545_v19 = vld [vmem:[#allocation2] sm:$0xff]   ;;  %v7567_v23 = vld [vmem:[#allocation6 + $0x10] ss:$8 sps:$4 sm:$0xff]  }
  0x89   :  { %399 = vmatpush1.bf16.msra.mxu1 %v7552_v8  ;;  %v7546_v20 = vld [vmem:[%s8862_s0] sm:$0xff]   ;;  %v7573_v28 = vld [vmem:[#allocation9 + $0xe4] ss:$16 sps:$4 sm:$0xff]   ;;  %v7574_v63 = vld [vmem:[#allocation9 + $0xe8] ss:$16 sps:$4 sm:$0xff]  }
  0x8a   :  { %400 = vmatprep.subr.bf16.mxu1 %v7553_v9  ;;  %v7568_v24 = vld [vmem:[#allocation6 + $0x4] ss:$8 sps:$4 sm:$0xff]   ;;  %v7570_v25 = vld [vmem:[#allocation6] ss:$8 sps:$4 sm:$0xff]   ;;  %v6574_v54 = vld [vmem:[#allocation4] ss:$0 sm:$0xff] }
  0x8b   :  { %7500 = vmatpush3.bf16.msra.mxu0 %v7540_v3  ;;  %v7571_v27 = vld [vmem:[#allocation9 + $0xe0] ss:$16 sps:$4 sm:$0xff]   ;;  %v7576_v29 = vld [vmem:[#allocation9 + $0xec] ss:$16 sps:$4 sm:$0xff]   ;;  %v7579_v30 = vld [vmem:[#allocation9 + $0xc4] ss:$16 sps:$4 sm:$0xff]  }
  0x8c   :  { %7501 = vmatprep.subr.bf16.mxu0 %v8595_v0  ;;  %v7577_v31 = vld [vmem:[#allocation9 + $0xc0] ss:$16 sps:$4 sm:$0xff]   ;;  %v7585_v32 = vld [vmem:[#allocation9 + $0xa4] ss:$16 sps:$4 sm:$0xff]   ;;  %v7582_v1 = vld [vmem:[#allocation9 + $0xcc] ss:$16 sps:$4 sm:$0xff]  }
  0x8d   :  { %401 = vmatpush1.bf16.msra.mxu1 %v7555_v12  ;;  %v7583_v33 = vld [vmem:[#allocation9 + $0xa0] ss:$16 sps:$4 sm:$0xff]   ;;  %v7591_v34 = vld [vmem:[#allocation9 + $0x84] ss:$16 sps:$4 sm:$0xff]   ;;  %v7580_v2 = vld [vmem:[#allocation9 + $0xc8] ss:$16 sps:$4 sm:$0xff]  }
  0x8e   :  { %402 = vmatprep.subr.bf16.mxu1 %v7556_v13  ;;  %v7589_v35 = vld [vmem:[#allocation9 + $0x80] ss:$16 sps:$4 sm:$0xff]   ;;  %v7597_v36 = vld [vmem:[#allocation9 + $0x64] ss:$16 sps:$4 sm:$0xff]   ;;  %v7588_v3 = vld [vmem:[#allocation9 + $0xac] ss:$16 sps:$4 sm:$0xff]  }
  0x8f   :  { %7502 = vmatpush3.bf16.msra.mxu0 %v7541_v4  ;;  %v7595_v37 = vld [vmem:[#allocation9 + $0x60] ss:$16 sps:$4 sm:$0xff]   ;;  %v7603_v38 = vld [vmem:[#allocation9 + $0x44] ss:$16 sps:$4 sm:$0xff]   ;;  %v7586_v4 = vld [vmem:[#allocation9 + $0xa8] ss:$16 sps:$4 sm:$0xff]  }
  0x90   :  { %7503 = vmatprep.subr.bf16.mxu0 %v8595_v0  ;;  %v7601_v39 = vld [vmem:[#allocation9 + $0x40] ss:$16 sps:$4 sm:$0xff]   ;;  %v7609_v40 = vld [vmem:[#allocation9 + $0x24] ss:$16 sps:$4 sm:$0xff]   ;;  %v7594_v5 = vld [vmem:[#allocation9 + $0x8c] ss:$16 sps:$4 sm:$0xff]  }
  0x91   :  { %403 = vmatpush1.bf16.msra.mxu1 %v7558_v14  ;;  %v7607_v41 = vld [vmem:[#allocation9 + $0x20] ss:$16 sps:$4 sm:$0xff]   ;;  %v7615_v42 = vld [vmem:[#allocation9 + $0x4] ss:$16 sps:$4 sm:$0xff]   ;;  %v7592_v6 = vld [vmem:[#allocation9 + $0x88] ss:$16 sps:$4 sm:$0xff]  }
  0x92   :  { %404 = vmatprep.subr.bf16.mxu1 %v7559_v15  ;;  %v7613_v43 = vld [vmem:[#allocation9] ss:$16 sps:$4 sm:$0xff]   ;;  %v7621_v44 = vld [vmem:[#allocation9 + $0x1e4] ss:$16 sps:$4 sm:$0xff]   ;;  %v7600_v7 = vld [vmem:[#allocation9 + $0x6c] ss:$16 sps:$4 sm:$0xff]  }
  0x93   :  { %7504 = vmatpush3.bf16.msra.mxu0 %v7542_v10  ;;  %v7619_v45 = vld [vmem:[#allocation9 + $0x1e0] ss:$16 sps:$4 sm:$0xff]   ;;  %v7627_v46 = vld [vmem:[#allocation9 + $0x1c4] ss:$16 sps:$4 sm:$0xff]   ;;  %v7598_v8 = vld [vmem:[#allocation9 + $0x68] ss:$16 sps:$4 sm:$0xff]  }
  0x94   :  { %7505 = vmatprep.subr.bf16.mxu0 %v8595_v0  ;;  %v7625_v47 = vld [vmem:[#allocation9 + $0x1c0] ss:$16 sps:$4 sm:$0xff]   ;;  %v7633_v48 = vld [vmem:[#allocation9 + $0x1a4] ss:$16 sps:$4 sm:$0xff]   ;;  %v7606_v9 = vld [vmem:[#allocation9 + $0x4c] ss:$16 sps:$4 sm:$0xff]  }
  0x95   :  { %405 = vmatpush1.bf16.msra.mxu1 %v7561_v17  ;;  %v7631_v49 = vld [vmem:[#allocation9 + $0x1a0] ss:$16 sps:$4 sm:$0xff]   ;;  %v7639_v50 = vld [vmem:[#allocation9 + $0x184] ss:$16 sps:$4 sm:$0xff]   ;;  %v7604_v10 = vld [vmem:[#allocation9 + $0x48] ss:$16 sps:$4 sm:$0xff]  }
  0x96   :  { %406 = vmatprep.subr.bf16.mxu1 %v7562_v18  ;;  %v7637_v51 = vld [vmem:[#allocation9 + $0x180] ss:$16 sps:$4 sm:$0xff]   ;;  %v7645_v52 = vld [vmem:[#allocation9 + $0x164] ss:$16 sps:$4 sm:$0xff]   ;;  %v7610_v12 = vld [vmem:[#allocation9 + $0x28] ss:$16 sps:$4 sm:$0xff]  }
  0x97   :  { %7506 = vmatpush3.bf16.msra.mxu0 %v7543_v11  ;;  %v7643_v53 = vld [vmem:[#allocation9 + $0x160] ss:$16 sps:$4 sm:$0xff]   ;;  %v7612_v11 = vld [vmem:[#allocation9 + $0x2c] ss:$16 sps:$4 sm:$0xff]   ;;  %v7616_v14 = vld [vmem:[#allocation9 + $0x8] ss:$16 sps:$4 sm:$0xff]  }
  0x98   :  { %7507 = vmatprep.subr.bf16.mxu0 %v8595_v0  ;;  %v7618_v13 = vld [vmem:[#allocation9 + $0xc] ss:$16 sps:$4 sm:$0xff]   ;;  %v7628_v18 = vld [vmem:[#allocation9 + $0x1c8] ss:$16 sps:$4 sm:$0xff]  }
  0x99   :  { %407 = vmatpush1.bf16.msra.mxu1 %v7564_v21  ;;  %v7624_v15 = vld [vmem:[#allocation9 + $0x1ec] ss:$16 sps:$4 sm:$0xff]  }
  0x9a   :  { %408 = vmatprep.subr.bf16.mxu1 %v7565_v22  ;;  %v7630_v17 = vld [vmem:[#allocation9 + $0x1cc] ss:$16 sps:$4 sm:$0xff]   ;;  %v7640_v22 = vld [vmem:[#allocation9 + $0x188] ss:$16 sps:$4 sm:$0xff]  }
  0x9b   :  { %7508 = vmatpush3.bf16.msra.mxu0 %v7544_v16  ;;  %v7622_v16 = vld [vmem:[#allocation9 + $0x1e8] ss:$16 sps:$4 sm:$0xff]   ;;  %v7642_v21 = vld [vmem:[#allocation9 + $0x18c] ss:$16 sps:$4 sm:$0xff]  }
  0x9c   :  { %7509 = vmatprep.subr.bf16.mxu0 %v8595_v0  ;;  %v7654_v26 = vld [vmem:[#allocation9 + $0x14c] ss:$16 sps:$4 sm:$0xff]  }
  0x9d   :  { %409 = vmatpush1.bf16.msra.mxu1 %v7567_v23  ;;  %v7648_v23 = vld [vmem:[#allocation9 + $0x16c] ss:$16 sps:$4 sm:$0xff]  }
  0x9e   :  { %410 = vmatprep.subr.bf16.mxu1 %v7568_v24  ;;  %v7646_v24 = vld [vmem:[#allocation9 + $0x168] ss:$16 sps:$4 sm:$0xff]  }
  0x9f   :  { %7510 = vmatpush3.bf16.msra.mxu0 %v7545_v19  ;;  %v7636_v19 = vld [vmem:[#allocation9 + $0x1ac] ss:$16 sps:$4 sm:$0xff]  }
  0xa0   :  { %851 = vmatprep.subr.bf16.mxu0 %v7573_v28  ;;  %v7652_v28 = vld [vmem:[#allocation9 + $0x148] ss:$16 sps:$4 sm:$0xff]  }
  0xa1   :  { %411 = vmatpush1.bf16.msra.mxu1 %v7570_v25  ;;  %v7651_v25 = vld [vmem:[#allocation9 + $0x144] ss:$16 sps:$4 sm:$0xff]  }
  0xa2   :  { %7512 = vmatmul.mubr.bf16.vlgmr.msra.gmra.mxu0 %v7546_v20  ;;  %894 = vmatprep.subr.bf16.mxu1 %v7576_v29  ;;  %v7634_v20 = vld [vmem:[#allocation9 + $0x1a8] ss:$16 sps:$4 sm:$0xff]   ;;  %v7657_v29 = vld [vmem:[#allocation9 + $0x124] ss:$16 sps:$4 sm:$0xff]  }
  0xa3   :  { %852 = vmatpush1.bf16.msra.mxu0 %v7571_v27  ;;  %v7649_v27 = vld [vmem:[#allocation9 + $0x140] ss:$16 sps:$4 sm:$0xff]  }
  0xa4   :  { %853 = vmatprep.subr.bf16.mxu0 %v7579_v30  ;;  %v7660_v30 = vld [vmem:[#allocation9 + $0x12c] ss:$16 sps:$4 sm:$0xff]  }
  0xa7   :  { %854 = vmatpush1.bf16.msra.mxu0 %v7577_v31  ;;  %v7655_v31 = vld [vmem:[#allocation9 + $0x120] ss:$16 sps:$4 sm:$0xff]  }
  0xa8   :  { %855 = vmatprep.subr.bf16.mxu0 %v7585_v32  ;;  %v7658_v32 = vld [vmem:[#allocation9 + $0x128] ss:$16 sps:$4 sm:$0xff]  }
  0xab   :  { %856 = vmatpush1.bf16.msra.mxu0 %v7583_v33  ;;  %v7663_v33 = vld [vmem:[#allocation9 + $0x104] ss:$16 sps:$4 sm:$0xff]  }
  0xac   :  { %857 = vmatprep.subr.bf16.mxu0 %v7591_v34  ;;  %v7666_v34 = vld [vmem:[#allocation9 + $0x10c] ss:$16 sps:$4 sm:$0xff]  }
  0xaf   :  { %858 = vmatpush1.bf16.msra.mxu0 %v7589_v35  ;;  %v7661_v35 = vld [vmem:[#allocation9 + $0x100] ss:$16 sps:$4 sm:$0xff]  }
  0xb0   :  { %859 = vmatprep.subr.bf16.mxu0 %v7597_v36  ;;  %v7664_v36 = vld [vmem:[#allocation9 + $0x108] ss:$16 sps:$4 sm:$0xff]  }
  0xb3   :  { %860 = vmatpush1.bf16.msra.mxu0 %v7595_v37  ;;  %v1005_v37 = vld [vmem:[#allocation12 + $0x1c0] sm:$0xff] }
  0xb4   :  { %861 = vmatprep.subr.bf16.mxu0 %v7603_v38  ;;  %v1009_v38 = vld [vmem:[#allocation12 + $0x1e0] sm:$0xff] }
  0xb7   :  { %862 = vmatpush1.bf16.msra.mxu0 %v7601_v39  ;;  %v1133_v39 = vld [vmem:[#allocation12 + $0x5c0] sm:$0xff] }
  0xb8   :  { %863 = vmatprep.subr.bf16.mxu0 %v7609_v40  ;;  %v6720_v40 = vcombine.low %v1005_v37, %v1009_v38 }
  0xbb   :  { %864 = vmatpush1.bf16.msra.mxu0 %v7607_v41  ;;  %v6721_v41 = vcombine.high %v1005_v37, %v1009_v38 }
  0xbc   :  { %865 = vmatprep.subr.bf16.mxu0 %v7615_v42  ;;  %v1137_v42 = vld [vmem:[#allocation12 + $0x5e0] sm:$0xff] }
  0xbf   :  { %866 = vmatpush1.bf16.msra.mxu0 %v7613_v43  ;;  %v6848_v43 = vcombine.low %v1133_v39, %v1137_v42 }
  0xc0   :  { %867 = vmatprep.subr.bf16.mxu0 %v7621_v44  ;;  %v6849_v44 = vcombine.high %v1133_v39, %v1137_v42  ;;  %v1085_v42 = vld [vmem:[#allocation12 + $0x440] sm:$0xff] }
  0xc3   :  { %868 = vmatpush2.bf16.msra.mxu0 %v7619_v45  ;;  %v306_v45 = vlaneseq }
  0xc4   :  { %869 = vmatprep.subr.bf16.mxu0 %v7627_v46 }
  0xc5   :  { %v8691_v46 = vshrl.u32 %v306_v45, 7 }
  0xc7   :  { %870 = vmatpush2.bf16.msra.mxu0 %v7625_v47  ;;  %v8694_v47 = vsub.s32 1, %v8691_v46 }
  0xc8   :  { %871 = vmatprep.subr.bf16.mxu0 %v7633_v48  ;;  %v8697_v48 = vsub.s32 0, %v8691_v46 }
  0xcb   :  { %872 = vmatpush2.bf16.msra.mxu0 %v7631_v49  ;;  %v304_v49 = vld [vmem:[#allocation7] sm:$0x3] }
  0xcc   :  { %873 = vmatprep.subr.bf16.mxu0 %v7639_v50 }
  0xcf   :  { %874 = vmatpush2.bf16.msra.mxu0 %v7637_v51  ;;  %v313_v51 = vrot.slane %v304_v49, %v8694_v47 }
  0xd0   :  { %875 = vmatprep.subr.bf16.mxu0 %v7645_v52  ;;  %v309_v52 = vrot.slane %v304_v49, %v8697_v48 }
  0xd3   :  { %876 = vmatpush2.bf16.msra.mxu0 %v7643_v53 }
  0xd4   :  { %877 = vmatprep.subr.bf16.mxu0 %v7651_v25  ;;  %v977_v25 = vld [vmem:[#allocation12 + $0xe0] sm:$0xff] }
  0xd7   :  { %878 = vmatpush2.bf16.msra.mxu0 %v7649_v27  ;;  %v1105_v27 = vld [vmem:[#allocation12 + $0x4e0] sm:$0xff] }
  0xd8   :  { %879 = vmatprep.subr.bf16.mxu0 %v7657_v29 }
  0xdb   :  { %880 = vmatpush2.bf16.msra.mxu0 %v7655_v31 }
  0xdc   :  { %881 = vmatprep.subr.bf16.mxu0 %v7663_v33  ;;  %v969_v33 = vld [vmem:[#allocation12 + $0xa0] sm:$0xff] }
  0xdf   :  { %882 = vmatpush2.bf16.msra.mxu0 %v7661_v35  ;;  %v1097_v35 = vld [vmem:[#allocation12 + $0x4a0] sm:$0xff] }
  0xe0   :  { %2527 = vmatprep.subr.bf16.mxu0 %v6721_v41  ;;  %v961_v41 = vld [vmem:[#allocation12 + $0x60] sm:$0xff] }
 0x162   :  { %v278_v55 = vpop.f32.mrf.mxu0 }
 0x163   :  { %v279_v57 = vadd.f32 %v6574_v54, %v278_v55 }
 0x164   :  { %v7513_v56 = vpop.f32.mrf.mxu0 }
 0x165   :  { %v285_v61 = vmax.f32 %v279_v57, 0.0 }
 0x166   :  { %v281_v58 = vpop.f32.mrf.mxu0 }
 0x167   :  { %v282_v59 = vadd.f32 %v6574_v54, %v281_v58 }
 0x168   :  { %v7514_v60 = vpop.f32.mrf.mxu0 }
 0x169   :  { %v286_v62 = vmax.f32 %v282_v59, 0.0 }
 0x16b   :  { %v287_v0 = vpack.c.bf16 %v286_v62, %v285_v61  ;;  %v997_v61 = vld [vmem:[#allocation12 + $0x180] sm:$0xff] }
 0x16d   :  { %429 = vmatmul.mubr.bf16.vlgmr.msra.gmra.mxu1 %v287_v0  ;;  %v1001_v0 = vld [vmem:[#allocation12 + $0x1a0] sm:$0xff] }
 0x16e   :  { %895 = vmatpush1.bf16.msra.mxu1 %v7574_v63 }
 0x16f   :  { %896 = vmatprep.subr.bf16.mxu1 %v7582_v1  ;;  %v1125_v1 = vld [vmem:[#allocation12 + $0x580] sm:$0xff] }
 0x172   :  { %897 = vmatpush1.bf16.msra.mxu1 %v7580_v2  ;;  %v1129_v2 = vld [vmem:[#allocation12 + $0x5a0] sm:$0xff] }
 0x173   :  { %898 = vmatprep.subr.bf16.mxu1 %v7588_v3 }
 0x176   :  { %899 = vmatpush1.bf16.msra.mxu1 %v7586_v4 }
 0x177   :  { %900 = vmatprep.subr.bf16.mxu1 %v7594_v5 }
 0x17a   :  { %901 = vmatpush1.bf16.msra.mxu1 %v7592_v6  ;;  %v6713_v6 = vcombine.high %v997_v61, %v1001_v0 }
 0x17b   :  { %902 = vmatprep.subr.bf16.mxu1 %v7600_v7  ;;  %v6841_v7 = vcombine.high %v1125_v1, %v1129_v2 }
 0x17e   :  { %903 = vmatpush1.bf16.msra.mxu1 %v7598_v8  ;;  %v989_v8 = vld [vmem:[#allocation12 + $0x140] sm:$0xff] }
 0x17f   :  { %904 = vmatprep.subr.bf16.mxu1 %v7606_v9  ;;  %v993_v9 = vld [vmem:[#allocation12 + $0x160] sm:$0xff] }
 0x182   :  { %905 = vmatpush1.bf16.msra.mxu1 %v7604_v10  ;;  %v1117_v10 = vld [vmem:[#allocation12 + $0x540] sm:$0xff] }
 0x183   :  { %906 = vmatprep.subr.bf16.mxu1 %v7612_v11  ;;  %v1121_v11 = vld [vmem:[#allocation12 + $0x560] sm:$0xff] }
 0x186   :  { %907 = vmatpush1.bf16.msra.mxu1 %v7610_v12  ;;  %v6712_v12 = vcombine.low %v997_v61, %v1001_v0  ;;  %v1197_v61 = vld [vmem:[#allocation12 + $0x7c0] sm:$0xff] }
 0x187   :  { %908 = vmatprep.subr.bf16.mxu1 %v7618_v13  ;;  %v6840_v13 = vcombine.low %v1125_v1, %v1129_v2 }
 0x18a   :  { %909 = vmatpush1.bf16.msra.mxu1 %v7616_v14  ;;  %v6705_v14 = vcombine.high %v989_v8, %v993_v9 }
 0x18b   :  { %910 = vmatprep.subr.bf16.mxu1 %v7624_v15  ;;  %v6833_v15 = vcombine.high %v1117_v10, %v1121_v11 }
 0x18e   :  { %911 = vmatpush2.bf16.msra.mxu1 %v7622_v16  ;;  %v981_v16 = vld [vmem:[#allocation12 + $0x100] sm:$0xff] }
 0x18f   :  { %912 = vmatprep.subr.bf16.mxu1 %v7630_v17  ;;  %v985_v17 = vld [vmem:[#allocation12 + $0x120] sm:$0xff] }
 0x192   :  { %913 = vmatpush2.bf16.msra.mxu1 %v7628_v18  ;;  %v1109_v18 = vld [vmem:[#allocation12 + $0x500] sm:$0xff] }
 0x193   :  { %914 = vmatprep.subr.bf16.mxu1 %v7636_v19  ;;  %v1113_v19 = vld [vmem:[#allocation12 + $0x520] sm:$0xff] }
 0x194   :  { %v6824_v29 = vcombine.low %v1109_v18, %v1113_v19 }
 0x196   :  { %915 = vmatpush2.bf16.msra.mxu1 %v7634_v20  ;;  %v6704_v20 = vcombine.low %v989_v8, %v993_v9 }
 0x197   :  { %916 = vmatprep.subr.bf16.mxu1 %v7642_v21  ;;  %v6832_v21 = vcombine.low %v1117_v10, %v1121_v11  ;;  %v1053_v11 = vld [vmem:[#allocation12 + $0x340] sm:$0xff] }
 0x19a   :  { %917 = vmatpush2.bf16.msra.mxu1 %v7640_v22  ;;  %v6697_v22 = vcombine.high %v981_v16, %v985_v17 }
 0x19b   :  { %918 = vmatprep.subr.bf16.mxu1 %v7648_v23  ;;  %v6825_v23 = vcombine.high %v1109_v18, %v1113_v19  ;;  %v1045_v19 = vld [vmem:[#allocation12 + $0x300] sm:$0xff] }
 0x19e   :  { %919 = vmatpush2.bf16.msra.mxu1 %v7646_v24  ;;  %v973_v24 = vld [vmem:[#allocation12 + $0xc0] sm:$0xff] }
 0x19f   :  { %920 = vmatprep.subr.bf16.mxu1 %v7654_v26  ;;  %v1101_v26 = vld [vmem:[#allocation12 + $0x4c0] sm:$0xff] }
 0x1a0   :  { %v6817_v31 = vcombine.high %v1101_v26, %v1105_v27  ;;  %v6816_v37 = vcombine.low %v1101_v26, %v1105_v27  ;;  %v1037_v27 = vld [vmem:[#allocation12 + $0x2c0] sm:$0xff] }
 0x1a2   :  { %921 = vmatpush2.bf16.msra.mxu1 %v7652_v28  ;;  %v6696_v28 = vcombine.low %v981_v16, %v985_v17 }
 0x1a3   :  { %922 = vmatprep.subr.bf16.mxu1 %v7660_v30  ;;  %v6689_v30 = vcombine.high %v973_v24, %v977_v25 }
 0x1a6   :  { %923 = vmatpush2.bf16.msra.mxu1 %v7658_v32  ;;  %v965_v32 = vld [vmem:[#allocation12 + $0x80] sm:$0xff] }
 0x1a7   :  { %924 = vmatprep.subr.bf16.mxu1 %v7666_v34  ;;  %v1093_v34 = vld [vmem:[#allocation12 + $0x480] sm:$0xff]  ;;  %v6681_v38 = vcombine.high %v965_v32, %v969_v33 }
 0x1a8   :  { %v6809_v39 = vcombine.high %v1093_v34, %v1097_v35  ;;  %v6808_v45 = vcombine.low %v1093_v34, %v1097_v35 }
 0x1aa   :  { %925 = vmatpush2.bf16.msra.mxu1 %v7664_v36  ;;  %v6688_v36 = vcombine.low %v973_v24, %v977_v25 }
 0x1ab   :  { %2570 = vmatprep.subr.bf16.mxu1 %v6849_v44  ;;  %v6680_v44 = vcombine.low %v965_v32, %v969_v33 }
 0x22d   :  { %v430_v50 = vpop.f32.mrf.mxu1 }
 0x22e   :  { %v431_v57 = vadd.f32 %v430_v50, %v309_v52 }
 0x22f   :  { %v432_v53 = vpop.f32.mrf.mxu1 }
 0x230   :  { %v433_v55 = vadd.f32 %v432_v53, %v313_v51  ;;  %v439_v3 = vmax.f32 %v431_v57, 0.0  ;;  %v1077_v53 = vld [vmem:[#allocation12 + $0x400] sm:$0xff] }
 0x231   :  { %v434_v54 = vpop.f32.mrf.mxu1 }
 0x232   :  { %v435_v56 = vadd.f32 %v434_v54, %v309_v52  ;;  %v440_v62 = vmax.f32 %v433_v55, 0.0  ;;  %v953_v52 = vld [vmem:[#allocation12 + $0x20] sm:$0xff] }
 0x233   :  { %v436_v58 = vpop.f32.mrf.mxu1  ;;  %v1081_v54 = vld [vmem:[#allocation12 + $0x420] sm:$0xff] }
 0x234   :  { %v437_v59 = vadd.f32 %v436_v58, %v313_v51  ;;  %v441_v60 = vmax.f32 %v435_v56, 0.0  ;;  %v949_v51 = vld [vmem:[#allocation12] sm:$0xff]  ;;  %v6793_v58 = vcombine.high %v1077_v53, %v1081_v54  ;;  %v6792_v0 = vcombine.low %v1077_v53, %v1081_v54 }
 0x235   :  { %v6665_v57 = vcombine.high %v949_v51, %v953_v52 }
 0x236   :  { %v442_v63 = vmax.f32 %v437_v59, 0.0  ;;  %v443_v5 = vpack.c.bf16 %v441_v60, %v439_v3  ;;  %v1069_v59 = vld [vmem:[#allocation12 + $0x3c0] sm:$0xff] }
 0x237   :  { %v1073_v60 = vld [vmem:[#allocation12 + $0x3e0] sm:$0xff] }
 0x238   :  { %v444_v4 = vpack.c.bf16 %v442_v63, %v440_v62  ;;  %v1201_v62 = vld [vmem:[#allocation12 + $0x7e0] sm:$0xff]  ;;  %v6664_v63 = vcombine.low %v949_v51, %v953_v52  ;;  %v6785_v1 = vcombine.high %v1069_v59, %v1073_v60 }
 0x239   :  { %v6913_v2 = vcombine.high %v1197_v61, %v1201_v62  ;;  %v1061_v3 = vld [vmem:[#allocation12 + $0x380] sm:$0xff]  ;;  %v6912_v8 = vcombine.low %v1197_v61, %v1201_v62 }
 0x23a   :  { %883 = vmatprep.mubr.bf16.mxu0 %v444_v4  ;;  %926 = vmatprep.mubr.bf16.mxu1 %v444_v4  ;;  %v1065_v4 = vld [vmem:[#allocation12 + $0x3a0] sm:$0xff] }
 0x23b   :  { %884 = vmatmul.mubr.bf16.vlgmr.msra.gmra.mxu0 %v443_v5  ;;  %927 = vmatmul.mubr.bf16.vlgmr.msra.gmra.mxu1 %v443_v5  ;;  %v1189_v5 = vld [vmem:[#allocation12 + $0x780] sm:$0xff]  ;;  %v6777_v9 = vcombine.high %v1061_v3, %v1065_v4 }
 0x23c   :  { %2528 = vmatpush1.bf16.msra.mxu0 %v6720_v40  ;;  %2571 = vmatpush1.bf16.msra.mxu1 %v6848_v43  ;;  %v957_v40 = vld [vmem:[#allocation12 + $0x40] sm:$0xff] }
 0x23d   :  { %2529 = vmatprep.subr.bf16.mxu0 %v6713_v6  ;;  %2572 = vmatprep.subr.bf16.mxu1 %v6841_v7  ;;  %v1089_v43 = vld [vmem:[#allocation12 + $0x460] sm:$0xff]  ;;  %v6673_v49 = vcombine.high %v957_v40, %v961_v41  ;;  %v6672_v55 = vcombine.low %v957_v40, %v961_v41  ;;  %v6784_v7 = vcombine.low %v1069_v59, %v1073_v60 }
 0x23e   :  { %v6801_v50 = vcombine.high %v1085_v42, %v1089_v43  ;;  %v6800_v56 = vcombine.low %v1085_v42, %v1089_v43  ;;  %v1193_v6 = vld [vmem:[#allocation12 + $0x7a0] sm:$0xff] }
 0x23f   :  { %v6905_v10 = vcombine.high %v1189_v5, %v1193_v6  ;;  %v6904_v16 = vcombine.low %v1189_v5, %v1193_v6  ;;  %v1161_v41 = vld [vmem:[#allocation12 + $0x6a0] sm:$0xff] }
 0x240   :  { %2530 = vmatpush1.bf16.msra.mxu0 %v6712_v12  ;;  %2573 = vmatpush1.bf16.msra.mxu1 %v6840_v13  ;;  %v1057_v12 = vld [vmem:[#allocation12 + $0x360] sm:$0xff] }
 0x241   :  { %2531 = vmatprep.subr.bf16.mxu0 %v6705_v14  ;;  %2574 = vmatprep.subr.bf16.mxu1 %v6833_v15  ;;  %v1181_v13 = vld [vmem:[#allocation12 + $0x740] sm:$0xff]  ;;  %v6776_v15 = vcombine.low %v1061_v3, %v1065_v4  ;;  %v6769_v17 = vcombine.high %v1053_v11, %v1057_v12  ;;  %v1138_v4 = vld [vmem:[#allocation12 + $0x5e8] sm:$0xff] }
 0x242   :  { %v1185_v14 = vld [vmem:[#allocation12 + $0x760] sm:$0xff] }
 0x243   :  { %v6897_v18 = vcombine.high %v1181_v13, %v1185_v14  ;;  %v6896_v24 = vcombine.low %v1181_v13, %v1185_v14  ;;  %v1153_v52 = vld [vmem:[#allocation12 + $0x660] sm:$0xff] }
 0x244   :  { %2532 = vmatpush1.bf16.msra.mxu0 %v6704_v20  ;;  %2575 = vmatpush1.bf16.msra.mxu1 %v6832_v21  ;;  %v1049_v20 = vld [vmem:[#allocation12 + $0x320] sm:$0xff] }
 0x245   :  { %2533 = vmatprep.subr.bf16.mxu0 %v6697_v22  ;;  %2576 = vmatprep.subr.bf16.mxu1 %v6825_v23  ;;  %v1173_v21 = vld [vmem:[#allocation12 + $0x700] sm:$0xff]  ;;  %v6768_v23 = vcombine.low %v1053_v11, %v1057_v12  ;;  %v6761_v25 = vcombine.high %v1045_v19, %v1049_v20 }
 0x246   :  { %v1177_v22 = vld [vmem:[#allocation12 + $0x720] sm:$0xff] }
 0x247   :  { %v6889_v26 = vcombine.high %v1173_v21, %v1177_v22  ;;  %v6888_v32 = vcombine.low %v1173_v21, %v1177_v22  ;;  %v1145_v60 = vld [vmem:[#allocation12 + $0x620] sm:$0xff] }
 0x248   :  { %2534 = vmatpush1.bf16.msra.mxu0 %v6696_v28  ;;  %2577 = vmatpush1.bf16.msra.mxu1 %v6824_v29  ;;  %v1041_v28 = vld [vmem:[#allocation12 + $0x2e0] sm:$0xff] }
 0x249   :  { %2535 = vmatprep.subr.bf16.mxu0 %v6689_v30  ;;  %2578 = vmatprep.subr.bf16.mxu1 %v6817_v31  ;;  %v1165_v29 = vld [vmem:[#allocation12 + $0x6c0] sm:$0xff]  ;;  %v6760_v31 = vcombine.low %v1045_v19, %v1049_v20  ;;  %v6753_v33 = vcombine.high %v1037_v27, %v1041_v28  ;;  %v6752_v35 = vcombine.low %v1037_v27, %v1041_v28 }
 0x24a   :  { %v1169_v30 = vld [vmem:[#allocation12 + $0x6e0] sm:$0xff] }
 0x24b   :  { %v6881_v34 = vcombine.high %v1165_v29, %v1169_v30 }
 0x24c   :  { %2536 = vmatpush1.bf16.msra.mxu0 %v6688_v36  ;;  %2579 = vmatpush1.bf16.msra.mxu1 %v6816_v37  ;;  %v6880_v36 = vcombine.low %v1165_v29, %v1169_v30  ;;  %v1029_v37 = vld [vmem:[#allocation12 + $0x280] sm:$0xff] }
 0x24d   :  { %2537 = vmatprep.subr.bf16.mxu0 %v6681_v38  ;;  %2580 = vmatprep.subr.bf16.mxu1 %v6809_v39  ;;  %v1033_v38 = vld [vmem:[#allocation12 + $0x2a0] sm:$0xff] }
 0x24e   :  { %v1157_v39 = vld [vmem:[#allocation12 + $0x680] sm:$0xff]  ;;  %v6745_v40 = vcombine.high %v1029_v37, %v1033_v38  ;;  %v6744_v42 = vcombine.low %v1029_v37, %v1033_v38  ;;  %v998_v37 = vld [vmem:[#allocation12 + $0x188] sm:$0xff] }
 0x24f   :  { %v6872_v43 = vcombine.low %v1157_v39, %v1161_v41 }
 0x250   :  { %2538 = vmatpush1.bf16.msra.mxu0 %v6680_v44  ;;  %2581 = vmatpush1.bf16.msra.mxu1 %v6808_v45  ;;  %v6873_v44 = vcombine.high %v1157_v39, %v1161_v41  ;;  %v1021_v45 = vld [vmem:[#allocation12 + $0x240] sm:$0xff]  ;;  %v1126_v41 = vld [vmem:[#allocation12 + $0x588] sm:$0xff] }
 0x251   :  { %2539 = vmatprep.subr.bf16.mxu0 %v6673_v49  ;;  %2582 = vmatprep.subr.bf16.mxu1 %v6801_v50  ;;  %v1025_v49 = vld [vmem:[#allocation12 + $0x260] sm:$0xff] }
 0x252   :  { %v1149_v50 = vld [vmem:[#allocation12 + $0x640] sm:$0xff]  ;;  %v6737_v51 = vcombine.high %v1021_v45, %v1025_v49  ;;  %v6736_v53 = vcombine.low %v1021_v45, %v1025_v49 }
 0x253   :  { %v6864_v54 = vcombine.low %v1149_v50, %v1153_v52 }
 0x254   :  { %2540 = vmatpush1.bf16.msra.mxu0 %v6672_v55  ;;  %2583 = vmatpush1.bf16.msra.mxu1 %v6800_v56  ;;  %v6865_v55 = vcombine.high %v1149_v50, %v1153_v52  ;;  %v1013_v56 = vld [vmem:[#allocation12 + $0x200] sm:$0xff]  ;;  %v990_v50 = vld [vmem:[#allocation12 + $0x148] sm:$0xff] }
 0x255   :  { %2541 = vmatprep.subr.bf16.mxu0 %v6665_v57  ;;  %2584 = vmatprep.subr.bf16.mxu1 %v6793_v58  ;;  %v1017_v57 = vld [vmem:[#allocation12 + $0x220] sm:$0xff] }
 0x256   :  { %v1141_v58 = vld [vmem:[#allocation12 + $0x600] sm:$0xff]  ;;  %v6729_v59 = vcombine.high %v1013_v56, %v1017_v57  ;;  %v6728_v61 = vcombine.low %v1013_v56, %v1017_v57 }
 0x257   :  { %v6856_v62 = vcombine.low %v1141_v58, %v1145_v60 }
 0x258   :  { %2542 = vmatpush1.bf16.msra.mxu0 %v6664_v63  ;;  %2585 = vmatpush1.bf16.msra.mxu1 %v6792_v0  ;;  %v6857_v63 = vcombine.high %v1141_v58, %v1145_v60  ;;  %v1006_v0 = vld [vmem:[#allocation12 + $0x1c8] sm:$0xff] }
 0x259   :  { %2543 = vmatprep.subr.bf16.mxu0 %v6785_v1  ;;  %2586 = vmatprep.subr.bf16.mxu1 %v6913_v2  ;;  %v1010_v1 = vld [vmem:[#allocation12 + $0x1e8] sm:$0xff] }
 0x25a   :  { %v1134_v2 = vld [vmem:[#allocation12 + $0x5c8] sm:$0xff]  ;;  %v6723_v3 = vcombine.high %v1006_v0, %v1010_v1  ;;  %v6722_v5 = vcombine.low %v1006_v0, %v1010_v1 }
 0x25b   :  { %v6850_v6 = vcombine.low %v1134_v2, %v1138_v4  ;;  %v982_v60 = vld [vmem:[#allocation12 + $0x108] sm:$0xff] }
 0x25c   :  { %2544 = vmatpush2.bf16.msra.mxu0 %v6784_v7  ;;  %2587 = vmatpush2.bf16.msra.mxu1 %v6912_v8  ;;  %v6851_v7 = vcombine.high %v1134_v2, %v1138_v4  ;;  %v8702_v8 = vsub.s32 3, %v8691_v46  ;;  %v974_v4 = vld [vmem:[#allocation12 + $0xc8] sm:$0xff] }
 0x25d   :  { %2545 = vmatprep.subr.bf16.mxu0 %v6777_v9  ;;  %2588 = vmatprep.subr.bf16.mxu1 %v6905_v10  ;;  %v8705_v9 = vsub.s32 2, %v8691_v46  ;;  %v509_v10 = vld [vmem:[#allocation10] sm:$0xf] }
 0x25e   :  { %v518_v13 = vrot.slane %v509_v10, %v8694_v47  ;;  %v526_v14 = vrot.slane %v509_v10, %v8702_v8 }
 0x260   :  { %2546 = vmatpush2.bf16.msra.mxu0 %v6776_v15  ;;  %2589 = vmatpush2.bf16.msra.mxu1 %v6904_v16  ;;  %v514_v15 = vrot.slane %v509_v10, %v8697_v48  ;;  %v522_v16 = vrot.slane %v509_v10, %v8705_v9 }
 0x261   :  { %2547 = vmatprep.subr.bf16.mxu0 %v6769_v17  ;;  %2590 = vmatprep.subr.bf16.mxu1 %v6897_v18 }
 0x264   :  { %2548 = vmatpush2.bf16.msra.mxu0 %v6768_v23  ;;  %2591 = vmatpush2.bf16.msra.mxu1 %v6896_v24 }
 0x265   :  { %2549 = vmatprep.subr.bf16.mxu0 %v6761_v25  ;;  %2592 = vmatprep.subr.bf16.mxu1 %v6889_v26 }
 0x268   :  { %2550 = vmatpush2.bf16.msra.mxu0 %v6760_v31  ;;  %2593 = vmatpush2.bf16.msra.mxu1 %v6888_v32 }
 0x269   :  { %2551 = vmatprep.subr.bf16.mxu0 %v6753_v33  ;;  %2594 = vmatprep.subr.bf16.mxu1 %v6881_v34 }
 0x26c   :  { %2552 = vmatpush2.bf16.msra.mxu0 %v6752_v35  ;;  %2595 = vmatpush2.bf16.msra.mxu1 %v6880_v36 }
 0x26d   :  { %2553 = vmatprep.subr.bf16.mxu0 %v6745_v40  ;;  %2596 = vmatprep.subr.bf16.mxu1 %v6873_v44  ;;  %v1002_v40 = vld [vmem:[#allocation12 + $0x1a8] sm:$0xff] }
 0x26e   :  { %v6714_v56 = vcombine.low %v998_v37, %v1002_v40 }
 0x270   :  { %2554 = vmatpush2.bf16.msra.mxu0 %v6744_v42  ;;  %2597 = vmatpush2.bf16.msra.mxu1 %v6872_v43  ;;  %v1130_v42 = vld [vmem:[#allocation12 + $0x5a8] sm:$0xff] }
 0x271   :  { %2555 = vmatprep.subr.bf16.mxu0 %v6737_v51  ;;  %2598 = vmatprep.subr.bf16.mxu1 %v6865_v55  ;;  %v6715_v51 = vcombine.high %v998_v37, %v1002_v40  ;;  %v6843_v52 = vcombine.high %v1126_v41, %v1130_v42  ;;  %v1122_v55 = vld [vmem:[#allocation12 + $0x568] sm:$0xff]  ;;  %v6842_v57 = vcombine.low %v1126_v41, %v1130_v42 }
 0x272   :  { %v1198_v40 = vld [vmem:[#allocation12 + $0x7c8] sm:$0xff] }
 0x273   :  { %v1202_v41 = vld [vmem:[#allocation12 + $0x7e8] sm:$0xff] }
 0x274   :  { %2556 = vmatpush2.bf16.msra.mxu0 %v6736_v53  ;;  %2599 = vmatpush2.bf16.msra.mxu1 %v6864_v54  ;;  %v994_v53 = vld [vmem:[#allocation12 + $0x168] sm:$0xff] }
 0x275   :  { %2557 = vmatprep.subr.bf16.mxu0 %v6729_v59  ;;  %2600 = vmatprep.subr.bf16.mxu1 %v6857_v63  ;;  %v1118_v54 = vld [vmem:[#allocation12 + $0x548] sm:$0xff]  ;;  %v6707_v58 = vcombine.high %v990_v50, %v994_v53  ;;  %v6706_v0 = vcombine.low %v990_v50, %v994_v53 }
 0x276   :  { %v6835_v59 = vcombine.high %v1118_v54, %v1122_v55  ;;  %v1114_v63 = vld [vmem:[#allocation12 + $0x528] sm:$0xff]  ;;  %v6834_v1 = vcombine.low %v1118_v54, %v1122_v55 }
 0x277   :  { %v1062_v53 = vld [vmem:[#allocation12 + $0x388] sm:$0xff] }
 0x278   :  { %2558 = vmatpush2.bf16.msra.mxu0 %v6728_v61  ;;  %2601 = vmatpush2.bf16.msra.mxu1 %v6856_v62  ;;  %v986_v61 = vld [vmem:[#allocation12 + $0x128] sm:$0xff] }
 0x279   :  { %2613 = vmatprep.subr.bf16.mxu0 %v6723_v3  ;;  %2656 = vmatprep.subr.bf16.mxu1 %v6851_v7  ;;  %v1110_v62 = vld [vmem:[#allocation12 + $0x508] sm:$0xff]  ;;  %v6699_v2 = vcombine.high %v982_v60, %v986_v61  ;;  %v6698_v10 = vcombine.low %v982_v60, %v986_v61 }
 0x27a   :  { %v6827_v3 = vcombine.high %v1110_v62, %v1114_v63  ;;  %v1106_v7 = vld [vmem:[#allocation12 + $0x4e8] sm:$0xff] }
 0x27b   :  { %v1066_v54 = vld [vmem:[#allocation12 + $0x3a8] sm:$0xff] }
 0x27c   :  { %v1190_v55 = vld [vmem:[#allocation12 + $0x788] sm:$0xff] }
 0x27d   :  { %v1054_v61 = vld [vmem:[#allocation12 + $0x348] sm:$0xff] }
 0x2fb   :  { %v885_v11 = vpop.f32.mrf.mxu0  ;;  %v928_v12 = vpop.f32.mrf.mxu1 }
 0x2fc   :  { %v886_v25 = vadd.f32 %v885_v11, %v514_v15  ;;  %v929_v26 = vadd.f32 %v928_v12, %v522_v16  ;;  %v6826_v11 = vcombine.low %v1110_v62, %v1114_v63  ;;  %v1058_v62 = vld [vmem:[#allocation12 + $0x368] sm:$0xff] }
 0x2fd   :  { %v887_v17 = vpop.f32.mrf.mxu0  ;;  %v930_v18 = vpop.f32.mrf.mxu1  ;;  %v1182_v63 = vld [vmem:[#allocation12 + $0x748] sm:$0xff] }
 0x2fe   :  { %v888_v21 = vadd.f32 %v887_v17, %v518_v13  ;;  %v931_v22 = vadd.f32 %v930_v18, %v526_v14  ;;  %v937_v38 = vmax.f32 %v886_v25, 0.0  ;;  %v939_v39 = vmax.f32 %v929_v26, 0.0  ;;  %v1098_v17 = vld [vmem:[#allocation12 + $0x4a8] sm:$0xff] }
 0x2ff   :  { %v889_v19 = vpop.f32.mrf.mxu0  ;;  %v932_v20 = vpop.f32.mrf.mxu1  ;;  %v1090_v25 = vld [vmem:[#allocation12 + $0x468] sm:$0xff] }
 0x300   :  { %v890_v23 = vadd.f32 %v889_v19, %v514_v15  ;;  %v933_v24 = vadd.f32 %v932_v20, %v522_v16  ;;  %v938_v33 = vmax.f32 %v888_v21, 0.0  ;;  %v940_v34 = vmax.f32 %v931_v22, 0.0  ;;  %v970_v15 = vld [vmem:[#allocation12 + $0xa8] sm:$0xff] }
 0x301   :  { %v891_v27 = vpop.f32.mrf.mxu0  ;;  %v934_v28 = vpop.f32.mrf.mxu1  ;;  %v1094_v16 = vld [vmem:[#allocation12 + $0x488] sm:$0xff] }
 0x302   :  { %v892_v29 = vadd.f32 %v891_v27, %v518_v13  ;;  %v935_v30 = vadd.f32 %v934_v28, %v526_v14  ;;  %v941_v31 = vmax.f32 %v890_v23, 0.0  ;;  %v943_v32 = vmax.f32 %v933_v24, 0.0  ;;  %v966_v14 = vld [vmem:[#allocation12 + $0x88] sm:$0xff] }
 0x303   :  { %v6683_v20 = vcombine.high %v966_v14, %v970_v15  ;;  %v6811_v21 = vcombine.high %v1094_v16, %v1098_v17  ;;  %v958_v22 = vld [vmem:[#allocation12 + $0x48] sm:$0xff]  ;;  %v6682_v26 = vcombine.low %v966_v14, %v970_v15  ;;  %v6810_v27 = vcombine.low %v1094_v16, %v1098_v17 }
 0x304   :  { %v942_v35 = vmax.f32 %v892_v29, 0.0  ;;  %v944_v36 = vmax.f32 %v935_v30, 0.0  ;;  %v8715_v45 = vpack.c.bf16 %v941_v31, %v937_v38  ;;  %v8717_v49 = vpack.c.bf16 %v943_v32, %v939_v39  ;;  %v962_v23 = vld [vmem:[#allocation12 + $0x68] sm:$0xff] }
 0x305   :  { %v1086_v24 = vld [vmem:[#allocation12 + $0x448] sm:$0xff]  ;;  %v6675_v28 = vcombine.high %v958_v22, %v962_v23 }
 0x306   :  { %v8711_v43 = vpack.c.bf16 %v942_v35, %v938_v33  ;;  %v8713_v44 = vpack.c.bf16 %v944_v36, %v940_v34  ;;  %v6803_v29 = vcombine.high %v1086_v24, %v1090_v25  ;;  %v950_v30 = vld [vmem:[#allocation12 + $0x8] sm:$0xff]  ;;  %v6674_v34 = vcombine.low %v958_v22, %v962_v23 }
 0x307   :  { %v954_v31 = vld [vmem:[#allocation12 + $0x28] sm:$0xff]  ;;  %v6802_v35 = vcombine.low %v1086_v24, %v1090_v25 }
 0x308   :  { %2559 = vmatprep.mubr.bf16.mxu0 %v8711_v43  ;;  %2602 = vmatprep.mubr.bf16.mxu1 %v8713_v44  ;;  %v1078_v32 = vld [vmem:[#allocation12 + $0x408] sm:$0xff]  ;;  %v6667_v36 = vcombine.high %v950_v30, %v954_v31  ;;  %v6666_v42 = vcombine.low %v950_v30, %v954_v31 }
 0x309   :  { %2560 = vmatmul.mubr.bf16.vlgmr.msra.gmra.mxu0 %v8715_v45  ;;  %2603 = vmatmul.mubr.bf16.vlgmr.msra.gmra.mxu1 %v8717_v49  ;;  %v1082_v33 = vld [vmem:[#allocation12 + $0x428] sm:$0xff] }
 0x30a   :  { %2614 = vmatpush1.bf16.msra.mxu0 %v6722_v5  ;;  %2657 = vmatpush1.bf16.msra.mxu1 %v6850_v6  ;;  %v978_v5 = vld [vmem:[#allocation12 + $0xe8] sm:$0xff]  ;;  %v6795_v37 = vcombine.high %v1078_v32, %v1082_v33  ;;  %v6794_v50 = vcombine.low %v1078_v32, %v1082_v33 }
 0x30b   :  { %2645 = vmatprep.mubr.bf16.mxu0 %v8711_v43  ;;  %2688 = vmatprep.mubr.bf16.mxu1 %v8713_v44  ;;  %v1102_v6 = vld [vmem:[#allocation12 + $0x4c8] sm:$0xff]  ;;  %v6691_v12 = vcombine.high %v974_v4, %v978_v5  ;;  %v6690_v18 = vcombine.low %v974_v4, %v978_v5 }
 0x30c   :  { %2615 = vmatprep.subr.bf16.mxu0 %v6715_v51  ;;  %2658 = vmatprep.subr.bf16.mxu1 %v6843_v52  ;;  %v6819_v13 = vcombine.high %v1102_v6, %v1106_v7  ;;  %v6818_v19 = vcombine.low %v1102_v6, %v1106_v7  ;;  %v1070_v38 = vld [vmem:[#allocation12 + $0x3c8] sm:$0xff]  ;;  %v6915_v52 = vcombine.high %v1198_v40, %v1202_v41 }
 0x30d   :  { %v1074_v39 = vld [vmem:[#allocation12 + $0x3e8] sm:$0xff] }
 0x30e   :  { %2616 = vmatpush1.bf16.msra.mxu0 %v6714_v56  ;;  %2659 = vmatpush1.bf16.msra.mxu1 %v6842_v57  ;;  %v6787_v51 = vcombine.high %v1070_v38, %v1074_v39  ;;  %v1194_v56 = vld [vmem:[#allocation12 + $0x7a8] sm:$0xff]  ;;  %v6786_v57 = vcombine.low %v1070_v38, %v1074_v39 }
 0x30f   :  { %2617 = vmatprep.subr.bf16.mxu0 %v6707_v58  ;;  %2660 = vmatprep.subr.bf16.mxu1 %v6835_v59  ;;  %v6914_v58 = vcombine.low %v1198_v40, %v1202_v41  ;;  %v6779_v59 = vcombine.high %v1062_v53, %v1066_v54  ;;  %v6907_v60 = vcombine.high %v1190_v55, %v1194_v56  ;;  %v1046_v5 = vld [vmem:[#allocation12 + $0x308] sm:$0xff] }
 0x310   :  { %v1050_v6 = vld [vmem:[#allocation12 + $0x328] sm:$0xff] }
 0x311   :  { %v1174_v7 = vld [vmem:[#allocation12 + $0x708] sm:$0xff] }
 0x312   :  { %2618 = vmatpush1.bf16.msra.mxu0 %v6706_v0  ;;  %2661 = vmatpush1.bf16.msra.mxu1 %v6834_v1  ;;  %v1186_v0 = vld [vmem:[#allocation12 + $0x768] sm:$0xff]  ;;  %v6778_v1 = vcombine.low %v1062_v53, %v1066_v54  ;;  %v1007_v54 = vld [vmem:[#allocation12 + $0x1d0] sm:$0xff] }
 0x313   :  { %2619 = vmatprep.subr.bf16.mxu0 %v6699_v2  ;;  %2662 = vmatprep.subr.bf16.mxu1 %v6827_v3  ;;  %v6906_v2 = vcombine.low %v1190_v55, %v1194_v56  ;;  %v6771_v3 = vcombine.high %v1054_v61, %v1058_v62  ;;  %v6899_v4 = vcombine.high %v1182_v63, %v1186_v0  ;;  %v1038_v15 = vld [vmem:[#allocation12 + $0x2c8] sm:$0xff]  ;;  %v1011_v55 = vld [vmem:[#allocation12 + $0x1f0] sm:$0xff] }
 0x314   :  { %v1042_v16 = vld [vmem:[#allocation12 + $0x2e8] sm:$0xff]  ;;  %v1135_v56 = vld [vmem:[#allocation12 + $0x5d0] sm:$0xff] }
 0x315   :  { %v1166_v17 = vld [vmem:[#allocation12 + $0x6c8] sm:$0xff] }
 0x316   :  { %2620 = vmatpush1.bf16.msra.mxu0 %v6698_v10  ;;  %2663 = vmatpush1.bf16.msra.mxu1 %v6826_v11  ;;  %v1178_v10 = vld [vmem:[#allocation12 + $0x728] sm:$0xff]  ;;  %v6770_v11 = vcombine.low %v1054_v61, %v1058_v62  ;;  %v999_v62 = vld [vmem:[#allocation12 + $0x190] sm:$0xff] }
 0x317   :  { %2621 = vmatprep.subr.bf16.mxu0 %v6691_v12  ;;  %2664 = vmatprep.subr.bf16.mxu1 %v6819_v13  ;;  %v6898_v12 = vcombine.low %v1182_v63, %v1186_v0  ;;  %v6763_v13 = vcombine.high %v1046_v5, %v1050_v6  ;;  %v6891_v14 = vcombine.high %v1174_v7, %v1178_v10  ;;  %v1030_v23 = vld [vmem:[#allocation12 + $0x288] sm:$0xff]  ;;  %v1003_v63 = vld [vmem:[#allocation12 + $0x1b0] sm:$0xff] }
 0x318   :  { %v1034_v24 = vld [vmem:[#allocation12 + $0x2a8] sm:$0xff]  ;;  %v1127_v0 = vld [vmem:[#allocation12 + $0x590] sm:$0xff] }
 0x319   :  { %v1158_v25 = vld [vmem:[#allocation12 + $0x688] sm:$0xff] }
 0x31a   :  { %2622 = vmatpush1.bf16.msra.mxu0 %v6690_v18  ;;  %2665 = vmatpush1.bf16.msra.mxu1 %v6818_v19  ;;  %v1170_v18 = vld [vmem:[#allocation12 + $0x6e8] sm:$0xff]  ;;  %v6762_v19 = vcombine.low %v1046_v5, %v1050_v6  ;;  %v991_v6 = vld [vmem:[#allocation12 + $0x150] sm:$0xff] }
 0x31b   :  { %2623 = vmatprep.subr.bf16.mxu0 %v6683_v20  ;;  %2666 = vmatprep.subr.bf16.mxu1 %v6811_v21  ;;  %v6890_v20 = vcombine.low %v1174_v7, %v1178_v10  ;;  %v6755_v21 = vcombine.high %v1038_v15, %v1042_v16  ;;  %v6883_v22 = vcombine.high %v1166_v17, %v1170_v18  ;;  %v1022_v31 = vld [vmem:[#allocation12 + $0x248] sm:$0xff]  ;;  %v995_v7 = vld [vmem:[#allocation12 + $0x170] sm:$0xff] }
 0x31c   :  { %v1026_v32 = vld [vmem:[#allocation12 + $0x268] sm:$0xff]  ;;  %v1119_v10 = vld [vmem:[#allocation12 + $0x550] sm:$0xff] }
 0x31d   :  { %v1150_v33 = vld [vmem:[#allocation12 + $0x648] sm:$0xff] }
 0x31e   :  { %2624 = vmatpush1.bf16.msra.mxu0 %v6682_v26  ;;  %2667 = vmatpush1.bf16.msra.mxu1 %v6810_v27  ;;  %v1162_v26 = vld [vmem:[#allocation12 + $0x6a8] sm:$0xff]  ;;  %v6754_v27 = vcombine.low %v1038_v15, %v1042_v16  ;;  %v983_v16 = vld [vmem:[#allocation12 + $0x110] sm:$0xff] }
 0x31f   :  { %2625 = vmatprep.subr.bf16.mxu0 %v6675_v28  ;;  %2668 = vmatprep.subr.bf16.mxu1 %v6803_v29  ;;  %v6882_v28 = vcombine.low %v1166_v17, %v1170_v18  ;;  %v6747_v29 = vcombine.high %v1030_v23, %v1034_v24  ;;  %v6875_v30 = vcombine.high %v1158_v25, %v1162_v26  ;;  %v1014_v39 = vld [vmem:[#allocation12 + $0x208] sm:$0xff]  ;;  %v987_v17 = vld [vmem:[#allocation12 + $0x130] sm:$0xff] }
 0x320   :  { %v1018_v40 = vld [vmem:[#allocation12 + $0x228] sm:$0xff]  ;;  %v1111_v18 = vld [vmem:[#allocation12 + $0x510] sm:$0xff] }
 0x321   :  { %v1142_v41 = vld [vmem:[#allocation12 + $0x608] sm:$0xff] }
 0x322   :  { %2626 = vmatpush1.bf16.msra.mxu0 %v6674_v34  ;;  %2669 = vmatpush1.bf16.msra.mxu1 %v6802_v35  ;;  %v1154_v34 = vld [vmem:[#allocation12 + $0x668] sm:$0xff]  ;;  %v6746_v35 = vcombine.low %v1030_v23, %v1034_v24  ;;  %v975_v24 = vld [vmem:[#allocation12 + $0xd0] sm:$0xff] }
 0x323   :  { %2627 = vmatprep.subr.bf16.mxu0 %v6667_v36  ;;  %2670 = vmatprep.subr.bf16.mxu1 %v6795_v37  ;;  %v6874_v36 = vcombine.low %v1158_v25, %v1162_v26  ;;  %v6739_v37 = vcombine.high %v1022_v31, %v1026_v32  ;;  %v6867_v38 = vcombine.high %v1150_v33, %v1154_v34  ;;  %v979_v25 = vld [vmem:[#allocation12 + $0xf0] sm:$0xff] }
 0x324   :  { %v1103_v26 = vld [vmem:[#allocation12 + $0x4d0] sm:$0xff] }
 0x326   :  { %2628 = vmatpush1.bf16.msra.mxu0 %v6666_v42  ;;  %2671 = vmatpush1.bf16.msra.mxu1 %v6794_v50  ;;  %v1146_v42 = vld [vmem:[#allocation12 + $0x628] sm:$0xff]  ;;  %v6738_v50 = vcombine.low %v1022_v31, %v1026_v32  ;;  %v967_v32 = vld [vmem:[#allocation12 + $0x90] sm:$0xff] }
 0x327   :  { %2629 = vmatprep.subr.bf16.mxu0 %v6787_v51  ;;  %2672 = vmatprep.subr.bf16.mxu1 %v6915_v52  ;;  %v6866_v51 = vcombine.low %v1150_v33, %v1154_v34  ;;  %v6731_v52 = vcombine.high %v1014_v39, %v1018_v40  ;;  %v6859_v53 = vcombine.high %v1142_v41, %v1146_v42  ;;  %v971_v33 = vld [vmem:[#allocation12 + $0xb0] sm:$0xff] }
 0x328   :  { %v1095_v34 = vld [vmem:[#allocation12 + $0x490] sm:$0xff] }
 0x32a   :  { %2630 = vmatpush2.bf16.msra.mxu0 %v6786_v57  ;;  %2673 = vmatpush2.bf16.msra.mxu1 %v6914_v58  ;;  %v1139_v57 = vld [vmem:[#allocation12 + $0x5f0] sm:$0xff]  ;;  %v6730_v58 = vcombine.low %v1014_v39, %v1018_v40 }
 0x32b   :  { %2631 = vmatprep.subr.bf16.mxu0 %v6779_v59  ;;  %2674 = vmatprep.subr.bf16.mxu1 %v6907_v60  ;;  %v6858_v59 = vcombine.low %v1142_v41, %v1146_v42  ;;  %v6725_v60 = vcombine.high %v1007_v54, %v1011_v55  ;;  %v6853_v61 = vcombine.high %v1135_v56, %v1139_v57  ;;  %v959_v40 = vld [vmem:[#allocation12 + $0x50] sm:$0xff] }
 0x32c   :  { %v963_v41 = vld [vmem:[#allocation12 + $0x70] sm:$0xff] }
 0x32d   :  { %v1087_v42 = vld [vmem:[#allocation12 + $0x450] sm:$0xff] }
 0x32e   :  { %2632 = vmatpush2.bf16.msra.mxu0 %v6778_v1  ;;  %2675 = vmatpush2.bf16.msra.mxu1 %v6906_v2  ;;  %v1131_v1 = vld [vmem:[#allocation12 + $0x5b0] sm:$0xff]  ;;  %v6724_v2 = vcombine.low %v1007_v54, %v1011_v55 }
 0x32f   :  { %2633 = vmatprep.subr.bf16.mxu0 %v6771_v3  ;;  %2676 = vmatprep.subr.bf16.mxu1 %v6899_v4  ;;  %v6852_v3 = vcombine.low %v1135_v56, %v1139_v57  ;;  %v6717_v4 = vcombine.high %v999_v62, %v1003_v63  ;;  %v6845_v5 = vcombine.high %v1127_v0, %v1131_v1  ;;  %v951_v55 = vld [vmem:[#allocation12 + $0x10] sm:$0xff] }
 0x330   :  { %v955_v56 = vld [vmem:[#allocation12 + $0x30] sm:$0xff] }
 0x331   :  { %v1079_v57 = vld [vmem:[#allocation12 + $0x410] sm:$0xff] }
 0x332   :  { %2634 = vmatpush2.bf16.msra.mxu0 %v6770_v11  ;;  %2677 = vmatpush2.bf16.msra.mxu1 %v6898_v12  ;;  %v1123_v11 = vld [vmem:[#allocation12 + $0x570] sm:$0xff]  ;;  %v6716_v12 = vcombine.low %v999_v62, %v1003_v63 }
 0x333   :  { %2635 = vmatprep.subr.bf16.mxu0 %v6763_v13  ;;  %2678 = vmatprep.subr.bf16.mxu1 %v6891_v14  ;;  %v6844_v13 = vcombine.low %v1127_v0, %v1131_v1  ;;  %v6709_v14 = vcombine.high %v991_v6, %v995_v7  ;;  %v6837_v15 = vcombine.high %v1119_v10, %v1123_v11  ;;  %v1071_v63 = vld [vmem:[#allocation12 + $0x3d0] sm:$0xff] }
 0x334   :  { %v1075_v0 = vld [vmem:[#allocation12 + $0x3f0] sm:$0xff] }
 0x335   :  { %v1199_v1 = vld [vmem:[#allocation12 + $0x7d0] sm:$0xff] }
 0x336   :  { %2636 = vmatpush2.bf16.msra.mxu0 %v6762_v19  ;;  %2679 = vmatpush2.bf16.msra.mxu1 %v6890_v20  ;;  %v1115_v19 = vld [vmem:[#allocation12 + $0x530] sm:$0xff]  ;;  %v6708_v20 = vcombine.low %v991_v6, %v995_v7 }
 0x337   :  { %2637 = vmatprep.subr.bf16.mxu0 %v6755_v21  ;;  %2680 = vmatprep.subr.bf16.mxu1 %v6883_v22  ;;  %v6836_v21 = vcombine.low %v1119_v10, %v1123_v11  ;;  %v6701_v22 = vcombine.high %v983_v16, %v987_v17  ;;  %v6829_v23 = vcombine.high %v1111_v18, %v1115_v19  ;;  %v1063_v7 = vld [vmem:[#allocation12 + $0x390] sm:$0xff] }
 0x338   :  { %v1067_v10 = vld [vmem:[#allocation12 + $0x3b0] sm:$0xff] }
 0x339   :  { %v1191_v11 = vld [vmem:[#allocation12 + $0x790] sm:$0xff] }
 0x33a   :  { %2638 = vmatpush2.bf16.msra.mxu0 %v6754_v27  ;;  %2681 = vmatpush2.bf16.msra.mxu1 %v6882_v28  ;;  %v1107_v27 = vld [vmem:[#allocation12 + $0x4f0] sm:$0xff]  ;;  %v6700_v28 = vcombine.low %v983_v16, %v987_v17 }
 0x33b   :  { %2639 = vmatprep.subr.bf16.mxu0 %v6747_v29  ;;  %2682 = vmatprep.subr.bf16.mxu1 %v6875_v30  ;;  %v6828_v29 = vcombine.low %v1111_v18, %v1115_v19  ;;  %v6693_v30 = vcombine.high %v975_v24, %v979_v25  ;;  %v6821_v31 = vcombine.high %v1103_v26, %v1107_v27  ;;  %v1055_v17 = vld [vmem:[#allocation12 + $0x350] sm:$0xff] }
 0x33c   :  { %v1059_v18 = vld [vmem:[#allocation12 + $0x370] sm:$0xff] }
 0x33d   :  { %v1183_v19 = vld [vmem:[#allocation12 + $0x750] sm:$0xff] }
 0x33e   :  { %2640 = vmatpush2.bf16.msra.mxu0 %v6746_v35  ;;  %2683 = vmatpush2.bf16.msra.mxu1 %v6874_v36  ;;  %v1099_v35 = vld [vmem:[#allocation12 + $0x4b0] sm:$0xff]  ;;  %v6692_v36 = vcombine.low %v975_v24, %v979_v25 }
 0x33f   :  { %2641 = vmatprep.subr.bf16.mxu0 %v6739_v37  ;;  %2684 = vmatprep.subr.bf16.mxu1 %v6867_v38  ;;  %v6820_v37 = vcombine.low %v1103_v26, %v1107_v27  ;;  %v6685_v38 = vcombine.high %v967_v32, %v971_v33  ;;  %v6813_v39 = vcombine.high %v1095_v34, %v1099_v35  ;;  %v1047_v25 = vld [vmem:[#allocation12 + $0x310] sm:$0xff] }
 0x340   :  { %v1051_v26 = vld [vmem:[#allocation12 + $0x330] sm:$0xff] }
 0x341   :  { %v1175_v27 = vld [vmem:[#allocation12 + $0x710] sm:$0xff] }
 0x342   :  { %2642 = vmatpush2.bf16.msra.mxu0 %v6738_v50  ;;  %2685 = vmatpush2.bf16.msra.mxu1 %v6866_v51  ;;  %v1091_v50 = vld [vmem:[#allocation12 + $0x470] sm:$0xff]  ;;  %v6684_v51 = vcombine.low %v967_v32, %v971_v33 }
 0x343   :  { %2643 = vmatprep.subr.bf16.mxu0 %v6731_v52  ;;  %2686 = vmatprep.subr.bf16.mxu1 %v6859_v53  ;;  %v6812_v52 = vcombine.low %v1095_v34, %v1099_v35  ;;  %v6677_v53 = vcombine.high %v959_v40, %v963_v41  ;;  %v6805_v54 = vcombine.high %v1087_v42, %v1091_v50  ;;  %v1039_v33 = vld [vmem:[#allocation12 + $0x2d0] sm:$0xff] }
 0x344   :  { %v1043_v34 = vld [vmem:[#allocation12 + $0x2f0] sm:$0xff] }
 0x345   :  { %v1167_v35 = vld [vmem:[#allocation12 + $0x6d0] sm:$0xff] }
 0x346   :  { %2644 = vmatpush2.bf16.msra.mxu0 %v6730_v58  ;;  %2687 = vmatpush2.bf16.msra.mxu1 %v6858_v59  ;;  %v1083_v58 = vld [vmem:[#allocation12 + $0x430] sm:$0xff]  ;;  %v6676_v59 = vcombine.low %v959_v40, %v963_v41 }
 0x347   :  { %2699 = vmatprep.subr.bf16.mxu0 %v6725_v60  ;;  %2742 = vmatprep.subr.bf16.mxu1 %v6853_v61  ;;  %v6804_v60 = vcombine.low %v1087_v42, %v1091_v50  ;;  %v6669_v61 = vcombine.high %v951_v55, %v955_v56  ;;  %v6797_v62 = vcombine.high %v1079_v57, %v1083_v58  ;;  %v1031_v41 = vld [vmem:[#allocation12 + $0x290] sm:$0xff] }
 0x348   :  { %v1035_v42 = vld [vmem:[#allocation12 + $0x2b0] sm:$0xff] }
 0x349   :  { %2646 = vmatmul.mubr.bf16.vlgmr.msra.gmra.mxu0 %v8715_v45  ;;  %2689 = vmatmul.mubr.bf16.vlgmr.msra.gmra.mxu1 %v8717_v49  ;;  %v1159_v50 = vld [vmem:[#allocation12 + $0x690] sm:$0xff] }
 0x34a   :  { %2700 = vmatpush1.bf16.msra.mxu0 %v6724_v2  ;;  %2731 = vmatprep.mubr.bf16.mxu0 %v8711_v43  ;;  %v1203_v2 = vld [vmem:[#allocation12 + $0x7f0] sm:$0xff] }
 0x34b   :  { %2743 = vmatpush1.bf16.msra.mxu1 %v6852_v3  ;;  %2774 = vmatprep.mubr.bf16.mxu1 %v8713_v44  ;;  %v6668_v3 = vcombine.low %v951_v55, %v955_v56  ;;  %v6917_v6 = vcombine.high %v1199_v1, %v1203_v2  ;;  %v1023_v56 = vld [vmem:[#allocation12 + $0x250] sm:$0xff] }
 0x34c   :  { %2701 = vmatprep.subr.bf16.mxu0 %v6717_v4  ;;  %2744 = vmatprep.subr.bf16.mxu1 %v6845_v5  ;;  %v6796_v4 = vcombine.low %v1079_v57, %v1083_v58  ;;  %v6789_v5 = vcombine.high %v1071_v63, %v1075_v0  ;;  %v1027_v57 = vld [vmem:[#allocation12 + $0x270] sm:$0xff] }
 0x34d   :  { %v1151_v58 = vld [vmem:[#allocation12 + $0x650] sm:$0xff] }
 0x34e   :  { %2702 = vmatpush1.bf16.msra.mxu0 %v6716_v12  ;;  %v1195_v12 = vld [vmem:[#allocation12 + $0x7b0] sm:$0xff] }
 0x34f   :  { %2745 = vmatpush1.bf16.msra.mxu1 %v6844_v13  ;;  %2703 = vmatprep.subr.bf16.mxu0 %v6709_v14  ;;  %v6788_v13 = vcombine.low %v1071_v63, %v1075_v0  ;;  %v6916_v14 = vcombine.low %v1199_v1, %v1203_v2  ;;  %v6909_v16 = vcombine.high %v1191_v11, %v1195_v12  ;;  %v1015_v0 = vld [vmem:[#allocation12 + $0x210] sm:$0xff] }
 0x350   :  { %2746 = vmatprep.subr.bf16.mxu1 %v6837_v15  ;;  %v6781_v15 = vcombine.high %v1063_v7, %v1067_v10  ;;  %v1019_v1 = vld [vmem:[#allocation12 + $0x230] sm:$0xff] }
 0x351   :  { %v1143_v2 = vld [vmem:[#allocation12 + $0x610] sm:$0xff] }
 0x352   :  { %2704 = vmatpush1.bf16.msra.mxu0 %v6708_v20  ;;  %v1187_v20 = vld [vmem:[#allocation12 + $0x770] sm:$0xff] }
 0x353   :  { %2747 = vmatpush1.bf16.msra.mxu1 %v6836_v21  ;;  %2705 = vmatprep.subr.bf16.mxu0 %v6701_v22  ;;  %v6780_v21 = vcombine.low %v1063_v7, %v1067_v10  ;;  %v6908_v22 = vcombine.low %v1191_v11, %v1195_v12  ;;  %v6901_v24 = vcombine.high %v1183_v19, %v1187_v20  ;;  %v1008_v10 = vld [vmem:[#allocation12 + $0x1d8] sm:$0xff] }
 0x354   :  { %2748 = vmatprep.subr.bf16.mxu1 %v6829_v23  ;;  %v6773_v23 = vcombine.high %v1055_v17, %v1059_v18  ;;  %v1012_v11 = vld [vmem:[#allocation12 + $0x1f8] sm:$0xff] }
 0x355   :  { %v1136_v12 = vld [vmem:[#allocation12 + $0x5d8] sm:$0xff] }
 0x356   :  { %2706 = vmatpush1.bf16.msra.mxu0 %v6700_v28  ;;  %v1179_v28 = vld [vmem:[#allocation12 + $0x730] sm:$0xff] }
 0x357   :  { %2749 = vmatpush1.bf16.msra.mxu1 %v6828_v29  ;;  %2707 = vmatprep.subr.bf16.mxu0 %v6693_v30  ;;  %v6772_v29 = vcombine.low %v1055_v17, %v1059_v18  ;;  %v6900_v30 = vcombine.low %v1183_v19, %v1187_v20  ;;  %v6893_v32 = vcombine.high %v1175_v27, %v1179_v28  ;;  %v1000_v18 = vld [vmem:[#allocation12 + $0x198] sm:$0xff] }
 0x358   :  { %2750 = vmatprep.subr.bf16.mxu1 %v6821_v31  ;;  %v6765_v31 = vcombine.high %v1047_v25, %v1051_v26  ;;  %v1004_v19 = vld [vmem:[#allocation12 + $0x1b8] sm:$0xff]  ;;  %v6726_v20 = vcombine.low %v1008_v10, %v1012_v11 }
 0x35a   :  { %2708 = vmatpush1.bf16.msra.mxu0 %v6692_v36  ;;  %v1171_v36 = vld [vmem:[#allocation12 + $0x6f0] sm:$0xff] }
 0x35b   :  { %2751 = vmatpush1.bf16.msra.mxu1 %v6820_v37  ;;  %2709 = vmatprep.subr.bf16.mxu0 %v6685_v38  ;;  %v6764_v37 = vcombine.low %v1047_v25, %v1051_v26  ;;  %v6892_v38 = vcombine.low %v1175_v27, %v1179_v28  ;;  %v6885_v40 = vcombine.high %v1167_v35, %v1171_v36  ;;  %v992_v25 = vld [vmem:[#allocation12 + $0x158] sm:$0xff] }
 0x35c   :  { %2752 = vmatprep.subr.bf16.mxu1 %v6813_v39  ;;  %v6757_v39 = vcombine.high %v1039_v33, %v1043_v34  ;;  %v996_v26 = vld [vmem:[#allocation12 + $0x178] sm:$0xff] }
 0x35d   :  { %v1120_v28 = vld [vmem:[#allocation12 + $0x558] sm:$0xff] }
 0x35e   :  { %2710 = vmatpush1.bf16.msra.mxu0 %v6684_v51  ;;  %v1163_v51 = vld [vmem:[#allocation12 + $0x6b0] sm:$0xff] }
 0x35f   :  { %2753 = vmatpush1.bf16.msra.mxu1 %v6812_v52  ;;  %2711 = vmatprep.subr.bf16.mxu0 %v6677_v53  ;;  %v6756_v52 = vcombine.low %v1039_v33, %v1043_v34  ;;  %v6884_v53 = vcombine.low %v1167_v35, %v1171_v36  ;;  %v6877_v55 = vcombine.high %v1159_v50, %v1163_v51  ;;  %v984_v34 = vld [vmem:[#allocation12 + $0x118] sm:$0xff] }
 0x360   :  { %2754 = vmatprep.subr.bf16.mxu1 %v6805_v54  ;;  %v6749_v54 = vcombine.high %v1031_v41, %v1035_v42  ;;  %v988_v35 = vld [vmem:[#allocation12 + $0x138] sm:$0xff] }
 0x361   :  { %v1112_v36 = vld [vmem:[#allocation12 + $0x518] sm:$0xff] }
 0x362   :  { %2712 = vmatpush1.bf16.msra.mxu0 %v6676_v59  ;;  %v1155_v59 = vld [vmem:[#allocation12 + $0x670] sm:$0xff] }
 0x363   :  { %2755 = vmatpush1.bf16.msra.mxu1 %v6804_v60  ;;  %2713 = vmatprep.subr.bf16.mxu0 %v6669_v61  ;;  %v6748_v60 = vcombine.low %v1031_v41, %v1035_v42  ;;  %v6876_v61 = vcombine.low %v1159_v50, %v1163_v51  ;;  %v6869_v63 = vcombine.high %v1151_v58, %v1155_v59  ;;  %v976_v41 = vld [vmem:[#allocation12 + $0xd8] sm:$0xff] }
 0x364   :  { %2756 = vmatprep.subr.bf16.mxu1 %v6797_v62  ;;  %v6741_v62 = vcombine.high %v1023_v56, %v1027_v57  ;;  %v980_v42 = vld [vmem:[#allocation12 + $0xf8] sm:$0xff] }
 0x365   :  { %v1104_v50 = vld [vmem:[#allocation12 + $0x4d8] sm:$0xff] }
 0x366   :  { %2714 = vmatpush1.bf16.msra.mxu0 %v6668_v3  ;;  %v1147_v3 = vld [vmem:[#allocation12 + $0x630] sm:$0xff]  ;;  %v1108_v51 = vld [vmem:[#allocation12 + $0x4f8] sm:$0xff] }
 0x367   :  { %2757 = vmatpush1.bf16.msra.mxu1 %v6796_v4  ;;  %2715 = vmatprep.subr.bf16.mxu0 %v6789_v5  ;;  %v6740_v4 = vcombine.low %v1023_v56, %v1027_v57  ;;  %v6868_v5 = vcombine.low %v1151_v58, %v1155_v59  ;;  %v6861_v7 = vcombine.high %v1143_v2, %v1147_v3  ;;  %v972_v56 = vld [vmem:[#allocation12 + $0xb8] sm:$0xff] }
 0x368   :  { %2758 = vmatprep.subr.bf16.mxu1 %v6917_v6  ;;  %v6733_v6 = vcombine.high %v1015_v0, %v1019_v1  ;;  %v1096_v57 = vld [vmem:[#allocation12 + $0x498] sm:$0xff]  ;;  %v6694_v59 = vcombine.low %v976_v41, %v980_v42 }
 0x369   :  { %v1100_v58 = vld [vmem:[#allocation12 + $0x4b8] sm:$0xff] }
 0x36a   :  { %2716 = vmatpush2.bf16.msra.mxu0 %v6788_v13  ;;  %v1140_v13 = vld [vmem:[#allocation12 + $0x5f8] sm:$0xff] }
 0x36b   :  { %2759 = vmatpush2.bf16.msra.mxu1 %v6916_v14  ;;  %2717 = vmatprep.subr.bf16.mxu0 %v6781_v15  ;;  %v6732_v14 = vcombine.low %v1015_v0, %v1019_v1  ;;  %v6860_v15 = vcombine.low %v1143_v2, %v1147_v3  ;;  %v6855_v17 = vcombine.high %v1136_v12, %v1140_v13  ;;  %v964_v0 = vld [vmem:[#allocation12 + $0x78] sm:$0xff] }
 0x36c   :  { %2760 = vmatprep.subr.bf16.mxu1 %v6909_v16  ;;  %v6727_v16 = vcombine.high %v1008_v10, %v1012_v11  ;;  %v1088_v1 = vld [vmem:[#allocation12 + $0x458] sm:$0xff] }
 0x36d   :  { %v1092_v2 = vld [vmem:[#allocation12 + $0x478] sm:$0xff] }
 0x36e   :  { %2718 = vmatpush2.bf16.msra.mxu0 %v6780_v21  ;;  %v1128_v21 = vld [vmem:[#allocation12 + $0x598] sm:$0xff] }
 0x36f   :  { %2761 = vmatpush2.bf16.msra.mxu1 %v6908_v22  ;;  %2719 = vmatprep.subr.bf16.mxu0 %v6773_v23  ;;  %v1132_v22 = vld [vmem:[#allocation12 + $0x5b8] sm:$0xff]  ;;  %v6854_v23 = vcombine.low %v1136_v12, %v1140_v13 }
 0x370   :  { %2762 = vmatprep.subr.bf16.mxu1 %v6901_v24  ;;  %v6719_v24 = vcombine.high %v1000_v18, %v1004_v19  ;;  %v6847_v27 = vcombine.high %v1128_v21, %v1132_v22  ;;  %v956_v10 = vld [vmem:[#allocation12 + $0x38] sm:$0xff] }
 0x371   :  { %v1080_v11 = vld [vmem:[#allocation12 + $0x418] sm:$0xff] }
 0x372   :  { %2720 = vmatpush2.bf16.msra.mxu0 %v6772_v29  ;;  %v1124_v29 = vld [vmem:[#allocation12 + $0x578] sm:$0xff] }
 0x373   :  { %2763 = vmatpush2.bf16.msra.mxu1 %v6900_v30  ;;  %2721 = vmatprep.subr.bf16.mxu0 %v6765_v31  ;;  %v6718_v30 = vcombine.low %v1000_v18, %v1004_v19  ;;  %v6846_v31 = vcombine.low %v1128_v21, %v1132_v22  ;;  %v6839_v33 = vcombine.high %v1120_v28, %v1124_v29  ;;  %v1084_v12 = vld [vmem:[#allocation12 + $0x438] sm:$0xff] }
 0x374   :  { %2764 = vmatprep.subr.bf16.mxu1 %v6893_v32  ;;  %v6711_v32 = vcombine.high %v992_v25, %v996_v26  ;;  %v1076_v18 = vld [vmem:[#allocation12 + $0x3f8] sm:$0xff]  ;;  %v6798_v22 = vcombine.low %v1080_v11, %v1084_v12 }
 0x375   :  { %v1200_v19 = vld [vmem:[#allocation12 + $0x7d8] sm:$0xff] }
 0x376   :  { %2722 = vmatpush2.bf16.msra.mxu0 %v6764_v37  ;;  %v1116_v37 = vld [vmem:[#allocation12 + $0x538] sm:$0xff] }
 0x377   :  { %2765 = vmatpush2.bf16.msra.mxu1 %v6892_v38  ;;  %2723 = vmatprep.subr.bf16.mxu0 %v6757_v39  ;;  %v6710_v38 = vcombine.low %v992_v25, %v996_v26  ;;  %v6838_v39 = vcombine.low %v1120_v28, %v1124_v29  ;;  %v1064_v25 = vld [vmem:[#allocation12 + $0x398] sm:$0xff] }
 0x378   :  { %2766 = vmatprep.subr.bf16.mxu1 %v6885_v40  ;;  %v6703_v40 = vcombine.high %v984_v34, %v988_v35  ;;  %v1068_v26 = vld [vmem:[#allocation12 + $0x3b8] sm:$0xff] }
 0x379   :  { %v1196_v28 = vld [vmem:[#allocation12 + $0x7b8] sm:$0xff] }
 0x37a   :  { %2724 = vmatpush2.bf16.msra.mxu0 %v6756_v52  ;;  %v6830_v52 = vcombine.low %v1112_v36, %v1116_v37 }
 0x37b   :  { %2767 = vmatpush2.bf16.msra.mxu1 %v6884_v53  ;;  %2725 = vmatprep.subr.bf16.mxu0 %v6749_v54  ;;  %v6695_v53 = vcombine.high %v976_v41, %v980_v42  ;;  %v6823_v54 = vcombine.high %v1104_v50, %v1108_v51  ;;  %v1052_v41 = vld [vmem:[#allocation12 + $0x338] sm:$0xff] }
 0x37c   :  { %2768 = vmatprep.subr.bf16.mxu1 %v6877_v55  ;;  %v968_v55 = vld [vmem:[#allocation12 + $0x98] sm:$0xff] }
 0x37d   :  { %v6686_v3 = vcombine.low %v968_v55, %v972_v56  ;;  %v1176_v42 = vld [vmem:[#allocation12 + $0x718] sm:$0xff] }
 0x37e   :  { %2726 = vmatpush2.bf16.msra.mxu0 %v6748_v60  ;;  %v6822_v60 = vcombine.low %v1104_v50, %v1108_v51  ;;  %v1180_v50 = vld [vmem:[#allocation12 + $0x738] sm:$0xff] }
 0x37f   :  { %2769 = vmatpush2.bf16.msra.mxu1 %v6876_v61  ;;  %2727 = vmatprep.subr.bf16.mxu0 %v6741_v62  ;;  %v6687_v61 = vcombine.high %v968_v55, %v972_v56  ;;  %v6815_v62 = vcombine.high %v1096_v57, %v1100_v58  ;;  %v1044_v55 = vld [vmem:[#allocation12 + $0x2f8] sm:$0xff] }
 0x380   :  { %2770 = vmatprep.subr.bf16.mxu1 %v6869_v63  ;;  %v960_v63 = vld [vmem:[#allocation12 + $0x58] sm:$0xff] }
 0x381   :  { %v6678_v13 = vcombine.low %v960_v63, %v964_v0  ;;  %v1168_v56 = vld [vmem:[#allocation12 + $0x6d8] sm:$0xff] }
 0x382   :  { %2728 = vmatpush2.bf16.msra.mxu0 %v6740_v4  ;;  %v6814_v4 = vcombine.low %v1096_v57, %v1100_v58  ;;  %v1172_v57 = vld [vmem:[#allocation12 + $0x6f8] sm:$0xff] }
 0x383   :  { %2771 = vmatpush2.bf16.msra.mxu1 %v6868_v5  ;;  %2729 = vmatprep.subr.bf16.mxu0 %v6733_v6  ;;  %v6679_v5 = vcombine.high %v960_v63, %v964_v0  ;;  %v6807_v6 = vcombine.high %v1088_v1, %v1092_v2  ;;  %v1036_v63 = vld [vmem:[#allocation12 + $0x2b8] sm:$0xff] }
 0x384   :  { %2772 = vmatprep.subr.bf16.mxu1 %v6861_v7  ;;  %v952_v7 = vld [vmem:[#allocation12 + $0x18] sm:$0xff] }
 0x385   :  { %v6670_v21 = vcombine.low %v952_v7, %v956_v10  ;;  %v1160_v0 = vld [vmem:[#allocation12 + $0x698] sm:$0xff] }
 0x386   :  { %2730 = vmatpush2.bf16.msra.mxu0 %v6732_v14  ;;  %v6806_v14 = vcombine.low %v1088_v1, %v1092_v2  ;;  %v1164_v1 = vld [vmem:[#allocation12 + $0x6b8] sm:$0xff] }
 0x387   :  { %2773 = vmatpush2.bf16.msra.mxu1 %v6860_v15  ;;  %2785 = vmatprep.subr.bf16.mxu0 %v6727_v16  ;;  %v6671_v15 = vcombine.high %v952_v7, %v956_v10  ;;  %v6799_v16 = vcombine.high %v1080_v11, %v1084_v12  ;;  %v1028_v7 = vld [vmem:[#allocation12 + $0x278] sm:$0xff] }
 0x388   :  { %2828 = vmatprep.subr.bf16.mxu1 %v6855_v17  ;;  %v1072_v17 = vld [vmem:[#allocation12 + $0x3d8] sm:$0xff] }
 0x389   :  { %2732 = vmatmul.mubr.bf16.vlgmr.msra.gmra.mxu0 %v8715_v45  ;;  %v6790_v29 = vcombine.low %v1072_v17, %v1076_v18  ;;  %v1152_v10 = vld [vmem:[#allocation12 + $0x658] sm:$0xff] }
 0x38a   :  { %2775 = vmatmul.mubr.bf16.vlgmr.msra.gmra.mxu1 %v8717_v49  ;;  %2786 = vmatpush1.bf16.msra.mxu0 %v6726_v20  ;;  %v1204_v20 = vld [vmem:[#allocation12 + $0x7f8] sm:$0xff] }
 0x38b   :  { %2817 = vmatprep.mubr.bf16.mxu0 %v8711_v43  ;;  %2829 = vmatpush1.bf16.msra.mxu1 %v6854_v23  ;;  %v6831_v43 = vcombine.high %v1112_v36, %v1116_v37  ;;  %v6791_v23 = vcombine.high %v1072_v17, %v1076_v18  ;;  %v1188_v36 = vld [vmem:[#allocation12 + $0x778] sm:$0xff]  ;;  %v6782_v37 = vcombine.low %v1064_v25, %v1068_v26 }
 0x38c   :  { %2860 = vmatprep.mubr.bf16.mxu1 %v8713_v44  ;;  %2787 = vmatprep.subr.bf16.mxu0 %v6719_v24  ;;  %v6702_v44 = vcombine.low %v984_v34, %v988_v35  ;;  %v6919_v24 = vcombine.high %v1200_v19, %v1204_v20  ;;  %v1060_v34 = vld [vmem:[#allocation12 + $0x378] sm:$0xff] }
 0x38d   :  { %2830 = vmatprep.subr.bf16.mxu1 %v6847_v27  ;;  %v1192_v27 = vld [vmem:[#allocation12 + $0x798] sm:$0xff] }
 0x38e   :  { %2788 = vmatpush1.bf16.msra.mxu0 %v6718_v30  ;;  %v6918_v30 = vcombine.low %v1200_v19, %v1204_v20  ;;  %v1184_v35 = vld [vmem:[#allocation12 + $0x758] sm:$0xff] }
 0x38f   :  { %2831 = vmatpush1.bf16.msra.mxu1 %v6846_v31  ;;  %2789 = vmatprep.subr.bf16.mxu0 %v6711_v32  ;;  %v6783_v31 = vcombine.high %v1064_v25, %v1068_v26  ;;  %v6911_v32 = vcombine.high %v1192_v27, %v1196_v28  ;;  %v1156_v11 = vld [vmem:[#allocation12 + $0x678] sm:$0xff]  ;;  %v7669_v26 = vld [vmem:[#allocation15 + $0x18c] ss:$28 sps:$4 sm:$0xff]  }
 0x390   :  { %2832 = vmatprep.subr.bf16.mxu1 %v6839_v33  ;;  %v1056_v33 = vld [vmem:[#allocation12 + $0x358] sm:$0xff] }
 0x391   :  { %v6774_v51 = vcombine.low %v1056_v33, %v1060_v34  ;;  %v1020_v17 = vld [vmem:[#allocation12 + $0x238] sm:$0xff] }
 0x392   :  { %2790 = vmatpush1.bf16.msra.mxu0 %v6710_v38  ;;  %v6910_v38 = vcombine.low %v1192_v27, %v1196_v28  ;;  %v1144_v18 = vld [vmem:[#allocation12 + $0x618] sm:$0xff]  ;;  %v7684_v27 = vld [vmem:[#allocation15 + $0x50c] ss:$28 sps:$4 sm:$0xff]  }
 0x393   :  { %2833 = vmatpush1.bf16.msra.mxu1 %v6838_v39  ;;  %2791 = vmatprep.subr.bf16.mxu0 %v6703_v40  ;;  %v6775_v39 = vcombine.high %v1056_v33, %v1060_v34  ;;  %v6903_v40 = vcombine.high %v1184_v35, %v1188_v36  ;;  %v1148_v19 = vld [vmem:[#allocation12 + $0x638] sm:$0xff]  ;;  %v7667_v28 = vld [vmem:[#allocation15 + $0x188] ss:$28 sps:$4 sm:$0xff]  }
 0x394   :  { %2834 = vmatprep.subr.bf16.mxu1 %v6831_v43  ;;  %v1048_v43 = vld [vmem:[#allocation12 + $0x318] sm:$0xff]  ;;  %v6862_v25 = vcombine.low %v1144_v18, %v1148_v19 }
 0x395   :  { %v6766_v58 = vcombine.low %v1048_v43, %v1052_v41  ;;  %v7690_v33 = vld [vmem:[#allocation15 + $0x4d4] ss:$28 sps:$4 sm:$0xff]  }
 0x396   :  { %2792 = vmatpush1.bf16.msra.mxu0 %v6702_v44  ;;  %v6902_v44 = vcombine.low %v1184_v35, %v1188_v36  ;;  %v7670_v36 = vld [vmem:[#allocation15 + $0x150] ss:$28 sps:$4 sm:$0xff]  }
 0x397   :  { %2835 = vmatpush1.bf16.msra.mxu1 %v6830_v52  ;;  %2793 = vmatprep.subr.bf16.mxu0 %v6695_v53  ;;  %v6767_v52 = vcombine.high %v1048_v43, %v1052_v41  ;;  %v6895_v53 = vcombine.high %v1176_v42, %v1180_v50  ;;  %v7696_v41 = vld [vmem:[#allocation15 + $0x49c] ss:$28 sps:$4 sm:$0xff]  }
 0x398   :  { %2836 = vmatprep.subr.bf16.mxu1 %v6823_v54  ;;  %v1040_v54 = vld [vmem:[#allocation12 + $0x2d8] sm:$0xff] }
 0x399   :  { %v6758_v2 = vcombine.low %v1040_v54, %v1044_v55 }
 0x39a   :  { %2794 = vmatpush1.bf16.msra.mxu0 %v6694_v59  ;;  %v6894_v59 = vcombine.low %v1176_v42, %v1180_v50  ;;  %v7673_v50 = vld [vmem:[#allocation15 + $0x118] ss:$28 sps:$4 sm:$0xff]  }
 0x39b   :  { %2837 = vmatpush1.bf16.msra.mxu1 %v6822_v60  ;;  %2795 = vmatprep.subr.bf16.mxu0 %v6687_v61  ;;  %v6759_v60 = vcombine.high %v1040_v54, %v1044_v55  ;;  %v6887_v61 = vcombine.high %v1168_v56, %v1172_v57  ;;  %v7702_v54 = vld [vmem:[#allocation15 + $0x464] ss:$28 sps:$4 sm:$0xff]  }
 0x39c   :  { %2838 = vmatprep.subr.bf16.mxu1 %v6815_v62  ;;  %v1032_v62 = vld [vmem:[#allocation12 + $0x298] sm:$0xff] }
 0x39d   :  { %v6750_v12 = vcombine.low %v1032_v62, %v1036_v63 }
 0x39e   :  { %2796 = vmatpush1.bf16.msra.mxu0 %v6686_v3  ;;  %v6886_v3 = vcombine.low %v1168_v56, %v1172_v57  ;;  %v7676_v57 = vld [vmem:[#allocation15 + $0xe0] ss:$28 sps:$4 sm:$0xff]  }
 0x39f   :  { %2839 = vmatpush1.bf16.msra.mxu1 %v6814_v4  ;;  %2797 = vmatprep.subr.bf16.mxu0 %v6679_v5  ;;  %v6751_v4 = vcombine.high %v1032_v62, %v1036_v63  ;;  %v6879_v5 = vcombine.high %v1160_v0, %v1164_v1  ;;  %v7708_v62 = vld [vmem:[#allocation15 + $0x42c] ss:$28 sps:$4 sm:$0xff]  }
 0x3a0   :  { %2840 = vmatprep.subr.bf16.mxu1 %v6807_v6  ;;  %v1024_v6 = vld [vmem:[#allocation12 + $0x258] sm:$0xff] }
 0x3a1   :  { %v6742_v20 = vcombine.low %v1024_v6, %v1028_v7 }
 0x3a2   :  { %2798 = vmatpush1.bf16.msra.mxu0 %v6678_v13  ;;  %v6878_v13 = vcombine.low %v1160_v0, %v1164_v1  ;;  %v7679_v0 = vld [vmem:[#allocation15 + $0xa8] ss:$28 sps:$4 sm:$0xff]   ;;  %v7687_v1 = vld [vmem:[#allocation15 + $0x74] ss:$28 sps:$4 sm:$0xff]  }
 0x3a3   :  { %2841 = vmatpush1.bf16.msra.mxu1 %v6806_v14  ;;  %2799 = vmatprep.subr.bf16.mxu0 %v6671_v15  ;;  %v6743_v14 = vcombine.high %v1024_v6, %v1028_v7  ;;  %v6871_v15 = vcombine.high %v1152_v10, %v1156_v11  ;;  %v7712_v6 = vld [vmem:[#allocation15 + $0x3f0] ss:$28 sps:$4 sm:$0xff]   ;;  %v7720_v7 = vld [vmem:[#allocation15 + $0x3bc] ss:$28 sps:$4 sm:$0xff]  }
 0x3a4   :  { %2842 = vmatprep.subr.bf16.mxu1 %v6799_v16  ;;  %v1016_v16 = vld [vmem:[#allocation12 + $0x218] sm:$0xff] }
 0x3a6   :  { %2800 = vmatpush1.bf16.msra.mxu0 %v6670_v21  ;;  %v6870_v21 = vcombine.low %v1152_v10, %v1156_v11  ;;  %v7691_v10 = vld [vmem:[#allocation15 + $0x38] ss:$28 sps:$4 sm:$0xff]   ;;  %v7699_v11 = vld [vmem:[#allocation15 + $0x4] ss:$28 sps:$4 sm:$0xff]  }
 0x3a7   :  { %2843 = vmatpush1.bf16.msra.mxu1 %v6798_v22  ;;  %2801 = vmatprep.subr.bf16.mxu0 %v6791_v23  ;;  %v6735_v22 = vcombine.high %v1016_v16, %v1020_v17  ;;  %v6863_v23 = vcombine.high %v1144_v18, %v1148_v19  ;;  %v7703_v18 = vld [vmem:[#allocation15 + $0x348] ss:$28 sps:$4 sm:$0xff]   ;;  %v7711_v19 = vld [vmem:[#allocation15 + $0x314] ss:$28 sps:$4 sm:$0xff]  }
 0x3a8   :  { %2844 = vmatprep.subr.bf16.mxu1 %v6919_v24  ;;  %v6734_v24 = vcombine.low %v1016_v16, %v1020_v17  ;;  %v7724_v16 = vld [vmem:[#allocation15 + $0x380] ss:$28 sps:$4 sm:$0xff]   ;;  %v7732_v17 = vld [vmem:[#allocation15 + $0x6cc] ss:$28 sps:$4 sm:$0xff]  }
 0x3aa   :  { %2802 = vmatpush2.bf16.msra.mxu0 %v6790_v29  ;;  %v8733_v29 = vld [vmem:[#allocation13] sm:$0xff] }
 0x3ab   :  { %2845 = vmatpush2.bf16.msra.mxu1 %v6918_v30  ;;  %2803 = vmatprep.subr.bf16.mxu0 %v6783_v31  ;;  %v7672_v30 = vld [vmem:[#allocation15 + $0x154] ss:$28 sps:$4 sm:$0xff]   ;;  %v7682_v31 = vld [vmem:[#allocation15 + $0x508] ss:$28 sps:$4 sm:$0xff]  }
 0x3ac   :  { %2846 = vmatprep.subr.bf16.mxu1 %v6911_v32  ;;  %v1214_v32 = vrot.slane %v8733_v29, %v8694_v47 }
 0x3ae   :  { %2804 = vmatpush2.bf16.msra.mxu0 %v6782_v37 }
 0x3af   :  { %2847 = vmatpush2.bf16.msra.mxu1 %v6910_v38  ;;  %2805 = vmatprep.subr.bf16.mxu0 %v6775_v39  ;;  %v7675_v39 = vld [vmem:[#allocation15 + $0x11c] ss:$28 sps:$4 sm:$0xff]  }
 0x3b0   :  { %2848 = vmatprep.subr.bf16.mxu1 %v6903_v40  ;;  %v7688_v40 = vld [vmem:[#allocation15 + $0x4d0] ss:$28 sps:$4 sm:$0xff]  }
 0x3b2   :  { %2806 = vmatpush2.bf16.msra.mxu0 %v6774_v51 }
 0x3b3   :  { %2849 = vmatpush2.bf16.msra.mxu1 %v6902_v44  ;;  %2807 = vmatprep.subr.bf16.mxu0 %v6767_v52  ;;  %v7694_v44 = vld [vmem:[#allocation15 + $0x498] ss:$28 sps:$4 sm:$0xff]  }
 0x3b4   :  { %2850 = vmatprep.subr.bf16.mxu1 %v6895_v53 }
 0x3b6   :  { %2808 = vmatpush2.bf16.msra.mxu0 %v6766_v58  ;;  %v7681_v58 = vld [vmem:[#allocation15 + $0xac] ss:$28 sps:$4 sm:$0xff]  }
 0x3b7   :  { %2851 = vmatpush2.bf16.msra.mxu1 %v6894_v59  ;;  %2809 = vmatprep.subr.bf16.mxu0 %v6759_v60  ;;  %v7700_v59 = vld [vmem:[#allocation15 + $0x460] ss:$28 sps:$4 sm:$0xff]  }
 0x3b8   :  { %2852 = vmatprep.subr.bf16.mxu1 %v6887_v61 }
 0x3ba   :  { %2810 = vmatpush2.bf16.msra.mxu0 %v6758_v2  ;;  %v7706_v2 = vld [vmem:[#allocation15 + $0x428] ss:$28 sps:$4 sm:$0xff]  }
 0x3bb   :  { %2853 = vmatpush2.bf16.msra.mxu1 %v6886_v3  ;;  %2811 = vmatprep.subr.bf16.mxu0 %v6751_v4  ;;  %v7714_v3 = vld [vmem:[#allocation15 + $0x3f4] ss:$28 sps:$4 sm:$0xff]  }
 0x3bc   :  { %2854 = vmatprep.subr.bf16.mxu1 %v6879_v5  ;;  %v7685_v4 = vld [vmem:[#allocation15 + $0x70] ss:$28 sps:$4 sm:$0xff]   ;;  %v7693_v5 = vld [vmem:[#allocation15 + $0x3c] ss:$28 sps:$4 sm:$0xff]  }
 0x3be   :  { %2812 = vmatpush2.bf16.msra.mxu0 %v6750_v12  ;;  %v7718_v12 = vld [vmem:[#allocation15 + $0x3b8] ss:$28 sps:$4 sm:$0xff]  }
 0x3bf   :  { %2855 = vmatpush2.bf16.msra.mxu1 %v6878_v13  ;;  %2813 = vmatprep.subr.bf16.mxu0 %v6743_v14  ;;  %v7726_v13 = vld [vmem:[#allocation15 + $0x384] ss:$28 sps:$4 sm:$0xff]  }
 0x3c0   :  { %2856 = vmatprep.subr.bf16.mxu1 %v6871_v15  ;;  %v7697_v14 = vld [vmem:[#allocation15] ss:$28 sps:$4 sm:$0xff]   ;;  %v7705_v15 = vld [vmem:[#allocation15 + $0x34c] ss:$28 sps:$4 sm:$0xff]  }
 0x3c2   :  { %2814 = vmatpush2.bf16.msra.mxu0 %v6742_v20  ;;  %v7730_v20 = vld [vmem:[#allocation15 + $0x6c8] ss:$28 sps:$4 sm:$0xff]  }
 0x3c3   :  { %2857 = vmatpush2.bf16.msra.mxu1 %v6870_v21  ;;  %2815 = vmatprep.subr.bf16.mxu0 %v6735_v22  ;;  %v7738_v21 = vld [vmem:[#allocation15 + $0x694] ss:$28 sps:$4 sm:$0xff]  }
 0x3c4   :  { %2858 = vmatprep.subr.bf16.mxu1 %v6863_v23  ;;  %v7709_v22 = vld [vmem:[#allocation15 + $0x310] ss:$28 sps:$4 sm:$0xff]   ;;  %v7717_v23 = vld [vmem:[#allocation15 + $0x2dc] ss:$28 sps:$4 sm:$0xff]  }
 0x3c6   :  { %2816 = vmatpush2.bf16.msra.mxu0 %v6734_v24  ;;  %v7736_v24 = vld [vmem:[#allocation15 + $0x690] ss:$28 sps:$4 sm:$0xff]  }
 0x3c7   :  { %2859 = vmatpush2.bf16.msra.mxu1 %v6862_v25  ;;  %5748 = vmatprep.subr.bf16.mxu0 %v7669_v26  ;;  %v7744_v25 = vld [vmem:[#allocation15 + $0x65c] ss:$28 sps:$4 sm:$0xff]  }
 0x3c8   :  { %5791 = vmatprep.subr.bf16.mxu1 %v7684_v27  ;;  %v7715_v26 = vld [vmem:[#allocation15 + $0x2d8] ss:$28 sps:$4 sm:$0xff]   ;;  %v7723_v27 = vld [vmem:[#allocation15 + $0x2a4] ss:$28 sps:$4 sm:$0xff]  }
 0x3c9   :  { %2818 = vmatmul.mubr.bf16.vlgmr.msra.gmra.mxu0 %v8715_v45  ;;  %v8738_v34 = vpop.f32.mrf.mxu0  ;;  %v8740_v35 = vpop.f32.mrf.mxu1 }
 0x3ca   :  { %2861 = vmatmul.mubr.bf16.vlgmr.msra.gmra.mxu1 %v8717_v49  ;;  %5749 = vmatpush1.bf16.msra.mxu0 %v7667_v28  ;;  %v7678_v49 = vld [vmem:[#allocation15 + $0xe4] ss:$28 sps:$4 sm:$0xff]   ;;  %v7742_v28 = vld [vmem:[#allocation15 + $0x658] ss:$28 sps:$4 sm:$0xff]  }
 0x3cb   :  { %v2563_v37 = vpop.f32.mrf.mxu0  ;;  %v2606_v38 = vpop.f32.mrf.mxu1  ;;  %5750 = vmatprep.subr.bf16.mxu0 %v7672_v30  ;;  %5792 = vmatpush1.bf16.msra.mxu1 %v7682_v31  ;;  %v7750_v30 = vld [vmem:[#allocation15 + $0x624] ss:$28 sps:$4 sm:$0xff]  }
 0x3cc   :  { %v2564_v43 = vadd.f32 %v2563_v37, %v1214_v32  ;;  %5793 = vmatprep.subr.bf16.mxu1 %v7690_v33  ;;  %v7721_v31 = vld [vmem:[#allocation15 + $0x2a0] ss:$28 sps:$4 sm:$0xff]   ;;  %v7727_v37 = vld [vmem:[#allocation15 + $0x268] ss:$28 sps:$4 sm:$0xff]  }
 0x3cd   :  { %v8743_v42 = vpop.f32.mrf.mxu0  ;;  %v8745_v45 = vpop.f32.mrf.mxu1  ;;  %v7748_v33 = vld [vmem:[#allocation15 + $0x620] ss:$28 sps:$4 sm:$0xff]  }
 0x3ce   :  { %5751 = vmatpush1.bf16.msra.mxu0 %v7670_v36  ;;  %v2607_v52 = vadd.f32 %v2606_v38, %v2564_v43  ;;  %v7753_v36 = vld [vmem:[#allocation15 + $0x5ec] ss:$28 sps:$4 sm:$0xff]   ;;  %v7735_v38 = vld [vmem:[#allocation15 + $0x234] ss:$28 sps:$4 sm:$0xff]   ;;  %v1210_v43 = vrot.slane %v8733_v29, %v8697_v48 }
 0x3cf   :  { %v2567_v51 = vpop.f32.mrf.mxu0  ;;  %5752 = vmatprep.subr.bf16.mxu0 %v7675_v39  ;;  %5794 = vmatpush1.bf16.msra.mxu1 %v7688_v40  ;;  %v2610_v55 = vpop.f32.mrf.mxu1  ;;  %v7751_v39 = vld [vmem:[#allocation15 + $0x5e8] ss:$28 sps:$4 sm:$0xff]   ;;  %v7756_v40 = vld [vmem:[#allocation15 + $0x5b4] ss:$28 sps:$4 sm:$0xff]  }
 0x3d0   :  { %v2568_v53 = vadd.f32 %v2567_v51, %v1214_v32  ;;  %5795 = vmatprep.subr.bf16.mxu1 %v7696_v41  ;;  %v2872_v60 = vmax.f32 %v2607_v52, 0.0  ;;  %v7729_v32 = vld [vmem:[#allocation15 + $0x26c] ss:$28 sps:$4 sm:$0xff]   ;;  %v7741_v51 = vld [vmem:[#allocation15 + $0x1fc] ss:$28 sps:$4 sm:$0xff]   ;;  %v2562_v52 = vadd.f32 %v8738_v34, %v1210_v43 }
 0x3d1   :  { %v7733_v41 = vld [vmem:[#allocation15 + $0x230] ss:$28 sps:$4 sm:$0xff]  }
 0x3d2   :  { %v2611_v56 = vadd.f32 %v2610_v55, %v2568_v53  ;;  %5753 = vmatpush1.bf16.msra.mxu0 %v7673_v50  ;;  %v2566_v50 = vadd.f32 %v8743_v42, %v1210_v43  ;;  %v7739_v53 = vld [vmem:[#allocation15 + $0x1f8] ss:$28 sps:$4 sm:$0xff]   ;;  %v7747_v55 = vld [vmem:[#allocation15 + $0x1c4] ss:$28 sps:$4 sm:$0xff]   ;;  %v2605_v42 = vadd.f32 %v8740_v35, %v2562_v52  ;;  %v7813_v34 = vld [vmem:[#allocation15 + $0xc0c] ss:$28 sps:$4 sm:$0xff]   ;;  %v1222_v35 = vrot.slane %v8733_v29, %v8702_v8 }
 0x3d3   :  { %5754 = vmatprep.subr.bf16.mxu0 %v7678_v49  ;;  %5796 = vmatpush1.bf16.msra.mxu1 %v7694_v44  ;;  %v7754_v49 = vld [vmem:[#allocation15 + $0x5b0] ss:$28 sps:$4 sm:$0xff]   ;;  %v7759_v44 = vld [vmem:[#allocation15 + $0x57c] ss:$28 sps:$4 sm:$0xff]   ;;  %v7831_v52 = vld [vmem:[#allocation15 + $0xb64] ss:$28 sps:$4 sm:$0xff]  }
 0x3d4   :  { %v2880_v61 = vmax.f32 %v2611_v56, 0.0  ;;  %5797 = vmatprep.subr.bf16.mxu1 %v7702_v54  ;;  %v2609_v54 = vadd.f32 %v8745_v45, %v2566_v50  ;;  %v7757_v56 = vld [vmem:[#allocation15 + $0x578] ss:$28 sps:$4 sm:$0xff]   ;;  %v7763_v45 = vld [vmem:[#allocation15 + $0x888] ss:$28 sps:$4 sm:$0xff]  }
 0x3d5   :  { %v7817_v43 = vld [vmem:[#allocation15 + $0xbd0] ss:$28 sps:$4 sm:$0xff]   ;;  %v7825_v50 = vld [vmem:[#allocation15 + $0xb9c] ss:$28 sps:$4 sm:$0xff]  }
 0x3d6   :  { %v8747_v63 = vpack.c.bf16 %v2880_v61, %v2872_v60  ;;  %5755 = vmatpush1.bf16.msra.mxu0 %v7676_v57  ;;  %v7762_v57 = vld [vmem:[#allocation15 + $0x544] ss:$28 sps:$4 sm:$0xff]   ;;  %v7765_v61 = vld [vmem:[#allocation15 + $0x88c] ss:$28 sps:$4 sm:$0xff]  }
 0x3d7   :  { %5756 = vmatprep.subr.bf16.mxu0 %v7681_v58  ;;  %5798 = vmatpush1.bf16.msra.mxu1 %v7700_v59  ;;  %v7745_v58 = vld [vmem:[#allocation15 + $0x1c0] ss:$28 sps:$4 sm:$0xff]   ;;  %v2879_v59 = vmax.f32 %v2609_v54, 0.0 }
 0x3d8   :  { %5780 = vmatprep.mubr.bf16.mxu0 %v8747_v63  ;;  %5799 = vmatprep.subr.bf16.mxu1 %v7708_v62  ;;  %v7760_v60 = vld [vmem:[#allocation15 + $0x540] ss:$28 sps:$4 sm:$0xff]   ;;  %v2871_v62 = vmax.f32 %v2605_v42, 0.0  ;;  %v7835_v42 = vld [vmem:[#allocation15 + $0xb28] ss:$28 sps:$4 sm:$0xff]  }
 0x3d9   :  { %v7829_v54 = vld [vmem:[#allocation15 + $0xb60] ss:$28 sps:$4 sm:$0xff]  }
 0x3da   :  { %5757 = vmatpush1.bf16.msra.mxu0 %v7679_v0  ;;  %v8756_v0 = vpack.c.bf16 %v2879_v59, %v2871_v62  ;;  %v7843_v59 = vld [vmem:[#allocation15 + $0xaf4] ss:$28 sps:$4 sm:$0xff]   ;;  %v7849_v62 = vld [vmem:[#allocation15 + $0xabc] ss:$28 sps:$4 sm:$0xff]  }
 0x3db   :  { %5758 = vmatprep.subr.bf16.mxu0 %v7687_v1  ;;  %5800 = vmatpush1.bf16.msra.mxu1 %v7706_v2  ;;  %v7768_v1 = vld [vmem:[#allocation15 + $0x854] ss:$28 sps:$4 sm:$0xff]   ;;  %v1218_v2 = vrot.slane %v8733_v29, %v8705_v9 }
 0x3dc   :  { %5801 = vmatprep.subr.bf16.mxu1 %v7714_v3 }
 0x3de   :  { %5759 = vmatpush1.bf16.msra.mxu0 %v7685_v4 }
 0x3df   :  { %5760 = vmatprep.subr.bf16.mxu0 %v7693_v5  ;;  %5802 = vmatpush1.bf16.msra.mxu1 %v7712_v6  ;;  %v7766_v5 = vld [vmem:[#allocation15 + $0x850] ss:$28 sps:$4 sm:$0xff]  }
 0x3e0   :  { %5803 = vmatprep.subr.bf16.mxu1 %v7720_v7 }
 0x3e2   :  { %5761 = vmatpush1.bf16.msra.mxu0 %v7691_v10  ;;  %v7771_v10 = vld [vmem:[#allocation15 + $0x81c] ss:$28 sps:$4 sm:$0xff]  }
 0x3e3   :  { %5762 = vmatprep.subr.bf16.mxu0 %v7699_v11  ;;  %5804 = vmatpush1.bf16.msra.mxu1 %v7718_v12 }
 0x3e4   :  { %5805 = vmatprep.subr.bf16.mxu1 %v7726_v13 }
 0x3e6   :  { %5763 = vmatpush1.bf16.msra.mxu0 %v7697_v14 }
 0x3e7   :  { %5764 = vmatprep.subr.bf16.mxu0 %v7705_v15  ;;  %5806 = vmatpush1.bf16.msra.mxu1 %v7724_v16  ;;  %v7769_v16 = vld [vmem:[#allocation15 + $0x818] ss:$28 sps:$4 sm:$0xff]  }
 0x3e8   :  { %5807 = vmatprep.subr.bf16.mxu1 %v7732_v17 }
 0x3ea   :  { %5765 = vmatpush2.bf16.msra.mxu0 %v7703_v18  ;;  %v7774_v18 = vld [vmem:[#allocation15 + $0x7e4] ss:$28 sps:$4 sm:$0xff]  }
 0x3eb   :  { %5766 = vmatprep.subr.bf16.mxu0 %v7711_v19  ;;  %5808 = vmatpush2.bf16.msra.mxu1 %v7730_v20 }
 0x3ec   :  { %5809 = vmatprep.subr.bf16.mxu1 %v7738_v21 }
 0x3ee   :  { %5767 = vmatpush2.bf16.msra.mxu0 %v7709_v22 }
 0x3ef   :  { %5768 = vmatprep.subr.bf16.mxu0 %v7717_v23  ;;  %5810 = vmatpush2.bf16.msra.mxu1 %v7736_v24 }
 0x3f0   :  { %5811 = vmatprep.subr.bf16.mxu1 %v7744_v25  ;;  %v7772_v25 = vld [vmem:[#allocation15 + $0x7e0] ss:$28 sps:$4 sm:$0xff]  }
 0x3f2   :  { %5769 = vmatpush2.bf16.msra.mxu0 %v7715_v26 }
 0x3f3   :  { %5770 = vmatprep.subr.bf16.mxu0 %v7723_v27  ;;  %5812 = vmatpush2.bf16.msra.mxu1 %v7742_v28  ;;  %v7777_v27 = vld [vmem:[#allocation15 + $0x7ac] ss:$28 sps:$4 sm:$0xff]  }
 0x3f4   :  { %5813 = vmatprep.subr.bf16.mxu1 %v7750_v30 }
 0x3f6   :  { %5771 = vmatpush2.bf16.msra.mxu0 %v7721_v31 }
 0x3f7   :  { %5772 = vmatprep.subr.bf16.mxu0 %v7729_v32  ;;  %5814 = vmatpush2.bf16.msra.mxu1 %v7748_v33  ;;  %v7775_v33 = vld [vmem:[#allocation15 + $0x7a8] ss:$28 sps:$4 sm:$0xff]  }
 0x3f8   :  { %5815 = vmatprep.subr.bf16.mxu1 %v7753_v36  ;;  %v7811_v36 = vld [vmem:[#allocation15 + $0xc08] ss:$28 sps:$4 sm:$0xff]  }
 0x3fa   :  { %5773 = vmatpush2.bf16.msra.mxu0 %v7727_v37 }
 0x3fb   :  { %5774 = vmatprep.subr.bf16.mxu0 %v7735_v38  ;;  %5816 = vmatpush2.bf16.msra.mxu1 %v7751_v39  ;;  %v7780_v38 = vld [vmem:[#allocation15 + $0x774] ss:$28 sps:$4 sm:$0xff]  }
 0x3fc   :  { %5817 = vmatprep.subr.bf16.mxu1 %v7756_v40  ;;  %v7819_v39 = vld [vmem:[#allocation15 + $0xbd4] ss:$28 sps:$4 sm:$0xff]  }
 0x3fd   :  { %v7778_v40 = vld [vmem:[#allocation15 + $0x770] ss:$28 sps:$4 sm:$0xff]  }
 0x3fe   :  { %5775 = vmatpush2.bf16.msra.mxu0 %v7733_v41  ;;  %v7783_v41 = vld [vmem:[#allocation15 + $0x73c] ss:$28 sps:$4 sm:$0xff]  }
 0x3ff   :  { %5776 = vmatprep.subr.bf16.mxu0 %v7741_v51  ;;  %5818 = vmatpush2.bf16.msra.mxu1 %v7754_v49  ;;  %v7781_v51 = vld [vmem:[#allocation15 + $0x738] ss:$28 sps:$4 sm:$0xff]  }
 0x400   :  { %5819 = vmatprep.subr.bf16.mxu1 %v7759_v44  ;;  %v7823_v49 = vld [vmem:[#allocation15 + $0xb98] ss:$28 sps:$4 sm:$0xff]   ;;  %v7786_v44 = vld [vmem:[#allocation15 + $0x704] ss:$28 sps:$4 sm:$0xff]  }
 0x402   :  { %5777 = vmatpush2.bf16.msra.mxu0 %v7739_v53  ;;  %v7784_v53 = vld [vmem:[#allocation15 + $0x700] ss:$28 sps:$4 sm:$0xff]  }
 0x403   :  { %5778 = vmatprep.subr.bf16.mxu0 %v7747_v55  ;;  %5820 = vmatpush2.bf16.msra.mxu1 %v7757_v56  ;;  %v7789_v55 = vld [vmem:[#allocation15 + $0xa4c] ss:$28 sps:$4 sm:$0xff]  }
 0x404   :  { %5821 = vmatprep.subr.bf16.mxu1 %v7762_v57  ;;  %v7837_v56 = vld [vmem:[#allocation15 + $0xb2c] ss:$28 sps:$4 sm:$0xff]  }
 0x405   :  { %v7787_v57 = vld [vmem:[#allocation15 + $0xa48] ss:$28 sps:$4 sm:$0xff]  }
 0x406   :  { %5779 = vmatpush2.bf16.msra.mxu0 %v7745_v58  ;;  %v7792_v58 = vld [vmem:[#allocation15 + $0xa14] ss:$28 sps:$4 sm:$0xff]  }
 0x407   :  { %5822 = vmatpush2.bf16.msra.mxu1 %v7760_v60  ;;  %5834 = vmatprep.subr.bf16.mxu0 %v7765_v61  ;;  %v7790_v60 = vld [vmem:[#allocation15 + $0xa10] ss:$28 sps:$4 sm:$0xff]  }
 0x408   :  { %5877 = vmatprep.subr.bf16.mxu1 %v7813_v34  ;;  %v7841_v61 = vld [vmem:[#allocation15 + $0xaf0] ss:$28 sps:$4 sm:$0xff]   ;;  %v7795_v34 = vld [vmem:[#allocation15 + $0x9dc] ss:$28 sps:$4 sm:$0xff]  }
 0x409   :  { %v2647_v3 = vpop.f32.mrf.mxu0  ;;  %v2690_v4 = vpop.f32.mrf.mxu1  ;;  %5781 = vmatmul.mubr.bf16.vlgmr.msra.gmra.mxu0 %v8756_v0 }
 0x40a   :  { %5835 = vmatpush1.bf16.msra.mxu0 %v7763_v45  ;;  %v2648_v12 = vadd.f32 %v2647_v3, %v1218_v2  ;;  %v7793_v45 = vld [vmem:[#allocation15 + $0x9d8] ss:$28 sps:$4 sm:$0xff]   ;;  %v7796_v3 = vld [vmem:[#allocation15 + $0x9a0] ss:$28 sps:$4 sm:$0xff]  }
 0x40b   :  { %v2649_v6 = vpop.f32.mrf.mxu0  ;;  %v2692_v7 = vpop.f32.mrf.mxu1  ;;  %5836 = vmatprep.subr.bf16.mxu0 %v7768_v1  ;;  %v7847_v1 = vld [vmem:[#allocation15 + $0xab8] ss:$28 sps:$4 sm:$0xff]  }
 0x40c   :  { %v2650_v11 = vadd.f32 %v2649_v6, %v1222_v35  ;;  %v2691_v22 = vadd.f32 %v2690_v4, %v2648_v12  ;;  %v7853_v4 = vld [vmem:[#allocation15 + $0xa80] ss:$28 sps:$4 sm:$0xff]   ;;  %v7861_v6 = vld [vmem:[#allocation15 + $0xdcc] ss:$28 sps:$4 sm:$0xff]   ;;  %v7867_v12 = vld [vmem:[#allocation15 + $0xd94] ss:$28 sps:$4 sm:$0xff]  }
 0x40d   :  { %v2651_v13 = vpop.f32.mrf.mxu0  ;;  %v2694_v14 = vpop.f32.mrf.mxu1 }
 0x40e   :  { %v2652_v15 = vadd.f32 %v2651_v13, %v1218_v2  ;;  %5837 = vmatpush1.bf16.msra.mxu0 %v7766_v5  ;;  %v2693_v19 = vadd.f32 %v2692_v7, %v2650_v11  ;;  %v2873_v31 = vmax.f32 %v2691_v22, 0.0  ;;  %v7855_v2 = vld [vmem:[#allocation15 + $0xa84] ss:$28 sps:$4 sm:$0xff]   ;;  %v7801_v5 = vld [vmem:[#allocation15 + $0x96c] ss:$28 sps:$4 sm:$0xff]  }
 0x40f   :  { %v2653_v17 = vpop.f32.mrf.mxu0  ;;  %5838 = vmatprep.subr.bf16.mxu0 %v7771_v10  ;;  %v2696_v23 = vpop.f32.mrf.mxu1  ;;  %v7799_v7 = vld [vmem:[#allocation15 + $0x968] ss:$28 sps:$4 sm:$0xff]   ;;  %v7804_v11 = vld [vmem:[#allocation15 + $0x934] ss:$28 sps:$4 sm:$0xff]   ;;  %v7877_v22 = vld [vmem:[#allocation15 + $0xd20] ss:$28 sps:$4 sm:$0xff]  }
 0x410   :  { %v2695_v20 = vadd.f32 %v2694_v14, %v2652_v15  ;;  %v2654_v21 = vadd.f32 %v2653_v17, %v1222_v35  ;;  %v2874_v28 = vmax.f32 %v2693_v19, 0.0  ;;  %v7798_v35 = vld [vmem:[#allocation15 + $0x9a4] ss:$28 sps:$4 sm:$0xff]   ;;  %v7802_v13 = vld [vmem:[#allocation15 + $0x930] ss:$28 sps:$4 sm:$0xff]  }
 0x411   :  { %v7859_v10 = vld [vmem:[#allocation15 + $0xdc8] ss:$28 sps:$4 sm:$0xff]   ;;  %v7865_v14 = vld [vmem:[#allocation15 + $0xd90] ss:$28 sps:$4 sm:$0xff]   ;;  %v7807_v15 = vld [vmem:[#allocation15 + $0x8fc] ss:$28 sps:$4 sm:$0xff]  }
 0x412   :  { %v2697_v24 = vadd.f32 %v2696_v23, %v2654_v21  ;;  %5839 = vmatpush1.bf16.msra.mxu0 %v7769_v16  ;;  %v2881_v26 = vmax.f32 %v2695_v20, 0.0  ;;  %v7873_v16 = vld [vmem:[#allocation15 + $0xd5c] ss:$28 sps:$4 sm:$0xff]   ;;  %v7810_v19 = vld [vmem:[#allocation15 + $0x8c4] ss:$28 sps:$4 sm:$0xff]  }
 0x413   :  { %5840 = vmatprep.subr.bf16.mxu0 %v7774_v18  ;;  %v7805_v17 = vld [vmem:[#allocation15 + $0x8f8] ss:$28 sps:$4 sm:$0xff]   ;;  %v7879_v20 = vld [vmem:[#allocation15 + $0xd24] ss:$28 sps:$4 sm:$0xff]  }
 0x414   :  { %v2882_v30 = vmax.f32 %v2697_v24, 0.0  ;;  %v8765_v37 = vpack.c.bf16 %v2881_v26, %v2873_v31  ;;  %v7871_v18 = vld [vmem:[#allocation15 + $0xd58] ss:$28 sps:$4 sm:$0xff]   ;;  %v7808_v21 = vld [vmem:[#allocation15 + $0x8c0] ss:$28 sps:$4 sm:$0xff]   ;;  %v1225_v26 = vsub.s32 4, %v8691_v46 }
 0x415   :  { %v7816_v23 = vld [vmem:[#allocation15 + $0x194] ss:$28 sps:$4 sm:$0xff]   ;;  %v7885_v24 = vld [vmem:[#allocation15 + $0xcec] ss:$28 sps:$4 sm:$0xff]  }
 0x416   :  { %v8763_v32 = vpack.c.bf16 %v2882_v30, %v2874_v28  ;;  %5841 = vmatpush1.bf16.msra.mxu0 %v7772_v25  ;;  %v1229_v25 = vsub.s32 5, %v8691_v46  ;;  %v7891_v28 = vld [vmem:[#allocation15 + $0xcb4] ss:$28 sps:$4 sm:$0xff]   ;;  %v1226_v31 = vrot.slane %v8733_v29, %v1225_v26 }
 0x417   :  { %5842 = vmatprep.subr.bf16.mxu0 %v7777_v27  ;;  %v7883_v27 = vld [vmem:[#allocation15 + $0xce8] ss:$28 sps:$4 sm:$0xff]  }
 0x418   :  { %5823 = vmatprep.mubr.bf16.mxu1 %v8763_v32  ;;  %v1230_v30 = vrot.slane %v8733_v29, %v1229_v25 }
 0x419   :  { %5824 = vmatmul.mubr.bf16.vlgmr.msra.gmra.mxu1 %v8765_v37 }
 0x41a   :  { %5843 = vmatpush1.bf16.msra.mxu0 %v7775_v33  ;;  %5878 = vmatpush1.bf16.msra.mxu1 %v7811_v36 }
 0x41b   :  { %5844 = vmatprep.subr.bf16.mxu0 %v7780_v38  ;;  %5879 = vmatprep.subr.bf16.mxu1 %v7819_v39  ;;  %v7889_v38 = vld [vmem:[#allocation15 + $0xcb0] ss:$28 sps:$4 sm:$0xff]  }
 0x41e   :  { %5845 = vmatpush1.bf16.msra.mxu0 %v7778_v40  ;;  %5880 = vmatpush1.bf16.msra.mxu1 %v7817_v43  ;;  %v7897_v40 = vld [vmem:[#allocation15 + $0xc7c] ss:$28 sps:$4 sm:$0xff]  }
 0x41f   :  { %5846 = vmatprep.subr.bf16.mxu0 %v7783_v41  ;;  %5881 = vmatprep.subr.bf16.mxu1 %v7825_v50 }
 0x422   :  { %5847 = vmatpush1.bf16.msra.mxu0 %v7781_v51  ;;  %5882 = vmatpush1.bf16.msra.mxu1 %v7823_v49 }
 0x423   :  { %5848 = vmatprep.subr.bf16.mxu0 %v7786_v44  ;;  %5883 = vmatprep.subr.bf16.mxu1 %v7831_v52  ;;  %v7895_v52 = vld [vmem:[#allocation15 + $0xc78] ss:$28 sps:$4 sm:$0xff]  }
 0x426   :  { %5849 = vmatpush1.bf16.msra.mxu0 %v7784_v53  ;;  %5884 = vmatpush1.bf16.msra.mxu1 %v7829_v54  ;;  %v7903_v54 = vld [vmem:[#allocation15 + $0xc44] ss:$28 sps:$4 sm:$0xff]  }
 0x427   :  { %5850 = vmatprep.subr.bf16.mxu0 %v7789_v55  ;;  %5885 = vmatprep.subr.bf16.mxu1 %v7837_v56 }
 0x42a   :  { %5851 = vmatpush2.bf16.msra.mxu0 %v7787_v57  ;;  %5886 = vmatpush1.bf16.msra.mxu1 %v7835_v42 }
 0x42b   :  { %5852 = vmatprep.subr.bf16.mxu0 %v7792_v58  ;;  %5887 = vmatprep.subr.bf16.mxu1 %v7843_v59 }
 0x42e   :  { %5853 = vmatpush2.bf16.msra.mxu0 %v7790_v60  ;;  %5888 = vmatpush1.bf16.msra.mxu1 %v7841_v61  ;;  %v7901_v60 = vld [vmem:[#allocation15 + $0xc40] ss:$28 sps:$4 sm:$0xff]  }
 0x42f   :  { %5854 = vmatprep.subr.bf16.mxu0 %v7795_v34  ;;  %5889 = vmatprep.subr.bf16.mxu1 %v7849_v62  ;;  %v7909_v34 = vld [vmem:[#allocation15 + $0x514] ss:$28 sps:$4 sm:$0xff]  }
 0x432   :  { %5855 = vmatpush2.bf16.msra.mxu0 %v7793_v45  ;;  %5890 = vmatpush1.bf16.msra.mxu1 %v7847_v1 }
 0x433   :  { %5856 = vmatprep.subr.bf16.mxu0 %v7798_v35  ;;  %5891 = vmatprep.subr.bf16.mxu1 %v7855_v2  ;;  %v7814_v2 = vld [vmem:[#allocation15 + $0x190] ss:$28 sps:$4 sm:$0xff]  }
 0x436   :  { %5857 = vmatpush2.bf16.msra.mxu0 %v7796_v3  ;;  %5892 = vmatpush1.bf16.msra.mxu1 %v7853_v4  ;;  %v7822_v4 = vld [vmem:[#allocation15 + $0x15c] ss:$28 sps:$4 sm:$0xff]  }
 0x437   :  { %5858 = vmatprep.subr.bf16.mxu0 %v7801_v5  ;;  %5893 = vmatprep.subr.bf16.mxu1 %v7861_v6  ;;  %v7820_v5 = vld [vmem:[#allocation15 + $0x158] ss:$28 sps:$4 sm:$0xff]   ;;  %v7828_v6 = vld [vmem:[#allocation15 + $0x124] ss:$28 sps:$4 sm:$0xff]  }
 0x43a   :  { %5859 = vmatpush2.bf16.msra.mxu0 %v7799_v7  ;;  %5894 = vmatpush2.bf16.msra.mxu1 %v7859_v10  ;;  %v7826_v7 = vld [vmem:[#allocation15 + $0x120] ss:$28 sps:$4 sm:$0xff]   ;;  %v7834_v10 = vld [vmem:[#allocation15 + $0xec] ss:$28 sps:$4 sm:$0xff]  }
 0x43b   :  { %5860 = vmatprep.subr.bf16.mxu0 %v7804_v11  ;;  %5895 = vmatprep.subr.bf16.mxu1 %v7867_v12  ;;  %v7832_v11 = vld [vmem:[#allocation15 + $0xe8] ss:$28 sps:$4 sm:$0xff]   ;;  %v7840_v12 = vld [vmem:[#allocation15 + $0xb4] ss:$28 sps:$4 sm:$0xff]  }
 0x43e   :  { %5861 = vmatpush2.bf16.msra.mxu0 %v7802_v13  ;;  %5896 = vmatpush2.bf16.msra.mxu1 %v7865_v14  ;;  %v7838_v13 = vld [vmem:[#allocation15 + $0xb0] ss:$28 sps:$4 sm:$0xff]   ;;  %v7846_v14 = vld [vmem:[#allocation15 + $0x7c] ss:$28 sps:$4 sm:$0xff]  }
 0x43f   :  { %5862 = vmatprep.subr.bf16.mxu0 %v7807_v15  ;;  %5897 = vmatprep.subr.bf16.mxu1 %v7873_v16  ;;  %v7844_v15 = vld [vmem:[#allocation15 + $0x78] ss:$28 sps:$4 sm:$0xff]   ;;  %v7852_v16 = vld [vmem:[#allocation15 + $0x44] ss:$28 sps:$4 sm:$0xff]  }
 0x442   :  { %5863 = vmatpush2.bf16.msra.mxu0 %v7805_v17  ;;  %5898 = vmatpush2.bf16.msra.mxu1 %v7871_v18  ;;  %v7850_v17 = vld [vmem:[#allocation15 + $0x40] ss:$28 sps:$4 sm:$0xff]   ;;  %v7858_v18 = vld [vmem:[#allocation15 + $0xc] ss:$28 sps:$4 sm:$0xff]  }
 0x443   :  { %5864 = vmatprep.subr.bf16.mxu0 %v7810_v19  ;;  %5899 = vmatprep.subr.bf16.mxu1 %v7879_v20  ;;  %v7856_v19 = vld [vmem:[#allocation15 + $0x8] ss:$28 sps:$4 sm:$0xff]   ;;  %v7864_v20 = vld [vmem:[#allocation15 + $0x354] ss:$28 sps:$4 sm:$0xff]  }
 0x446   :  { %5865 = vmatpush2.bf16.msra.mxu0 %v7808_v21  ;;  %5900 = vmatpush2.bf16.msra.mxu1 %v7877_v22  ;;  %v7862_v21 = vld [vmem:[#allocation15 + $0x350] ss:$28 sps:$4 sm:$0xff]   ;;  %v7870_v22 = vld [vmem:[#allocation15 + $0x31c] ss:$28 sps:$4 sm:$0xff]  }
 0x447   :  { %5920 = vmatprep.subr.bf16.mxu0 %v7816_v23  ;;  %5901 = vmatprep.subr.bf16.mxu1 %v7885_v24  ;;  %v7868_v23 = vld [vmem:[#allocation15 + $0x318] ss:$28 sps:$4 sm:$0xff]   ;;  %v7876_v24 = vld [vmem:[#allocation15 + $0x2e4] ss:$28 sps:$4 sm:$0xff]  }
 0x449   :  { %v2733_v33 = vpop.f32.mrf.mxu0 }
 0x44a   :  { %v2776_v36 = vpop.f32.mrf.mxu1  ;;  %5902 = vmatpush2.bf16.msra.mxu1 %v7883_v27  ;;  %v2734_v50 = vadd.f32 %v2733_v33, %v1226_v31  ;;  %v7874_v27 = vld [vmem:[#allocation15 + $0x2e0] ss:$28 sps:$4 sm:$0xff]   ;;  %v1237_v33 = vsub.s32 7, %v8691_v46 }
 0x44b   :  { %v2735_v39 = vpop.f32.mrf.mxu0  ;;  %5903 = vmatprep.subr.bf16.mxu1 %v7891_v28  ;;  %v7882_v28 = vld [vmem:[#allocation15 + $0x2ac] ss:$28 sps:$4 sm:$0xff]  }
 0x44c   :  { %v2736_v43 = vadd.f32 %v2735_v39, %v1230_v30  ;;  %v2778_v41 = vpop.f32.mrf.mxu1  ;;  %v2777_v42 = vadd.f32 %v2776_v36, %v2734_v50  ;;  %v1233_v36 = vsub.s32 6, %v8691_v46  ;;  %v7894_v39 = vld [vmem:[#allocation15 + $0x23c] ss:$28 sps:$4 sm:$0xff]  }
 0x44d   :  { %v2737_v51 = vpop.f32.mrf.mxu0 }
 0x44e   :  { %v2738_v49 = vadd.f32 %v2737_v51, %v1226_v31  ;;  %v2780_v44 = vpop.f32.mrf.mxu1  ;;  %5904 = vmatpush2.bf16.msra.mxu1 %v7889_v38  ;;  %v2779_v55 = vadd.f32 %v2778_v41, %v2736_v43  ;;  %v2875_v1 = vmax.f32 %v2777_v42, 0.0  ;;  %v7888_v31 = vld [vmem:[#allocation15 + $0x274] ss:$28 sps:$4 sm:$0xff]   ;;  %v1234_v43 = vrot.slane %v8733_v29, %v1233_v36  ;;  %v7898_v42 = vld [vmem:[#allocation15 + $0x200] ss:$28 sps:$4 sm:$0xff]  }
 0x44f   :  { %v2739_v53 = vpop.f32.mrf.mxu0  ;;  %5905 = vmatprep.subr.bf16.mxu1 %v7897_v40  ;;  %v7886_v38 = vld [vmem:[#allocation15 + $0x270] ss:$28 sps:$4 sm:$0xff]   ;;  %v1238_v40 = vrot.slane %v8733_v29, %v1237_v33  ;;  %v7892_v51 = vld [vmem:[#allocation15 + $0x238] ss:$28 sps:$4 sm:$0xff]  }
 0x450   :  { %v2781_v56 = vadd.f32 %v2780_v44, %v2738_v49  ;;  %v2740_v57 = vadd.f32 %v2739_v53, %v1230_v30  ;;  %v2782_v58 = vpop.f32.mrf.mxu1  ;;  %v2876_v62 = vmax.f32 %v2779_v55, 0.0  ;;  %v7880_v30 = vld [vmem:[#allocation15 + $0x2a8] ss:$28 sps:$4 sm:$0xff]   ;;  %v7934_v33 = vld [vmem:[#allocation15 + $0x7b0] ss:$28 sps:$4 sm:$0xff]  }
 0x451   :  { %v7900_v44 = vld [vmem:[#allocation15 + $0x204] ss:$28 sps:$4 sm:$0xff]  }
 0x452   :  { %v2783_v59 = vadd.f32 %v2782_v58, %v2740_v57  ;;  %5906 = vmatpush2.bf16.msra.mxu1 %v7895_v52  ;;  %v2883_v61 = vmax.f32 %v2781_v56, 0.0 }
 0x453   :  { %5907 = vmatprep.subr.bf16.mxu1 %v7903_v54 }
 0x454   :  { %v2884_v45 = vmax.f32 %v2783_v59, 0.0  ;;  %v8779_v3 = vpack.c.bf16 %v2883_v61, %v2875_v1  ;;  %v7906_v59 = vld [vmem:[#allocation15 + $0x1cc] ss:$28 sps:$4 sm:$0xff]  }
 0x455   :  { %v7904_v1 = vld [vmem:[#allocation15 + $0x1c8] ss:$28 sps:$4 sm:$0xff]  }
 0x456   :  { %v8777_v35 = vpack.c.bf16 %v2884_v45, %v2876_v62  ;;  %5908 = vmatpush2.bf16.msra.mxu1 %v7901_v60 }
 0x457   :  { %5963 = vmatprep.subr.bf16.mxu1 %v7909_v34 }
 0x458   :  { %5866 = vmatprep.mubr.bf16.mxu0 %v8777_v35 }
 0x459   :  { %5867 = vmatmul.mubr.bf16.vlgmr.msra.gmra.mxu0 %v8779_v3 }
 0x45a   :  { %5921 = vmatpush1.bf16.msra.mxu0 %v7814_v2  ;;  %5952 = vmatprep.mubr.bf16.mxu0 %v8747_v63 }
 0x45b   :  { %5922 = vmatprep.subr.bf16.mxu0 %v7822_v4  ;;  %v7912_v4 = vld [vmem:[#allocation15 + $0x894] ss:$28 sps:$4 sm:$0xff]  }
 0x45e   :  { %5923 = vmatpush1.bf16.msra.mxu0 %v7820_v5 }
 0x45f   :  { %5924 = vmatprep.subr.bf16.mxu0 %v7828_v6 }
 0x462   :  { %5925 = vmatpush1.bf16.msra.mxu0 %v7826_v7 }
 0x463   :  { %5926 = vmatprep.subr.bf16.mxu0 %v7834_v10 }
 0x466   :  { %5927 = vmatpush1.bf16.msra.mxu0 %v7832_v11  ;;  %v7907_v11 = vld [vmem:[#allocation15 + $0x510] ss:$28 sps:$4 sm:$0xff]  }
 0x467   :  { %5928 = vmatprep.subr.bf16.mxu0 %v7840_v12  ;;  %v7910_v12 = vld [vmem:[#allocation15 + $0x890] ss:$28 sps:$4 sm:$0xff]  }
 0x46a   :  { %5929 = vmatpush1.bf16.msra.mxu0 %v7838_v13 }
 0x46b   :  { %5930 = vmatprep.subr.bf16.mxu0 %v7846_v14  ;;  %v7915_v14 = vld [vmem:[#allocation15 + $0x4dc] ss:$28 sps:$4 sm:$0xff]  }
 0x46e   :  { %5931 = vmatpush1.bf16.msra.mxu0 %v7844_v15  ;;  %v7918_v15 = vld [vmem:[#allocation15 + $0x85c] ss:$28 sps:$4 sm:$0xff]  }
 0x46f   :  { %5932 = vmatprep.subr.bf16.mxu0 %v7852_v16  ;;  %v7913_v16 = vld [vmem:[#allocation15 + $0x4d8] ss:$28 sps:$4 sm:$0xff]  }
 0x472   :  { %5933 = vmatpush1.bf16.msra.mxu0 %v7850_v17  ;;  %v7916_v17 = vld [vmem:[#allocation15 + $0x858] ss:$28 sps:$4 sm:$0xff]  }
 0x473   :  { %5934 = vmatprep.subr.bf16.mxu0 %v7858_v18  ;;  %v7921_v18 = vld [vmem:[#allocation15 + $0x4a4] ss:$28 sps:$4 sm:$0xff]  }
 0x476   :  { %5935 = vmatpush1.bf16.msra.mxu0 %v7856_v19  ;;  %v7924_v19 = vld [vmem:[#allocation15 + $0x824] ss:$28 sps:$4 sm:$0xff]  }
 0x477   :  { %5936 = vmatprep.subr.bf16.mxu0 %v7864_v20  ;;  %v7919_v20 = vld [vmem:[#allocation15 + $0x4a0] ss:$28 sps:$4 sm:$0xff]  }
 0x47a   :  { %5937 = vmatpush2.bf16.msra.mxu0 %v7862_v21  ;;  %v7922_v21 = vld [vmem:[#allocation15 + $0x820] ss:$28 sps:$4 sm:$0xff]  }
 0x47b   :  { %5938 = vmatprep.subr.bf16.mxu0 %v7870_v22  ;;  %v7927_v22 = vld [vmem:[#allocation15 + $0x46c] ss:$28 sps:$4 sm:$0xff]  }
 0x47e   :  { %5939 = vmatpush2.bf16.msra.mxu0 %v7868_v23  ;;  %v7930_v23 = vld [vmem:[#allocation15 + $0x7ec] ss:$28 sps:$4 sm:$0xff]  }
 0x47f   :  { %5940 = vmatprep.subr.bf16.mxu0 %v7876_v24  ;;  %v7925_v24 = vld [vmem:[#allocation15 + $0x468] ss:$28 sps:$4 sm:$0xff]  }
 0x482   :  { %5941 = vmatpush2.bf16.msra.mxu0 %v7874_v27  ;;  %v7928_v27 = vld [vmem:[#allocation15 + $0x7e8] ss:$28 sps:$4 sm:$0xff]  }
 0x483   :  { %5942 = vmatprep.subr.bf16.mxu0 %v7882_v28  ;;  %v7933_v28 = vld [vmem:[#allocation15 + $0x434] ss:$28 sps:$4 sm:$0xff]  }
 0x486   :  { %5943 = vmatpush2.bf16.msra.mxu0 %v7880_v30  ;;  %v7936_v30 = vld [vmem:[#allocation15 + $0x7b4] ss:$28 sps:$4 sm:$0xff]  }
 0x487   :  { %5944 = vmatprep.subr.bf16.mxu0 %v7888_v31  ;;  %v7931_v31 = vld [vmem:[#allocation15 + $0x430] ss:$28 sps:$4 sm:$0xff]  }
 0x489   :  { %v2819_v41 = vpop.f32.mrf.mxu0 }
 0x48a   :  { %v2862_v50 = vpop.f32.mrf.mxu1  ;;  %5945 = vmatpush2.bf16.msra.mxu0 %v7886_v38  ;;  %v2820_v54 = vadd.f32 %v2819_v41, %v1234_v43  ;;  %v7939_v38 = vld [vmem:[#allocation15 + $0x3fc] ss:$28 sps:$4 sm:$0xff]   ;;  %v7945_v41 = vld [vmem:[#allocation15 + $0x3c4] ss:$28 sps:$4 sm:$0xff]  }
 0x48b   :  { %v2821_v49 = vpop.f32.mrf.mxu0  ;;  %5946 = vmatprep.subr.bf16.mxu0 %v7894_v39  ;;  %v7942_v39 = vld [vmem:[#allocation15 + $0x77c] ss:$28 sps:$4 sm:$0xff]  }
 0x48c   :  { %v2822_v52 = vadd.f32 %v2821_v49, %v1238_v40  ;;  %v2864_v53 = vpop.f32.mrf.mxu1  ;;  %v2863_v34 = vadd.f32 %v2862_v50, %v2820_v54  ;;  %v7948_v50 = vld [vmem:[#allocation15 + $0x744] ss:$28 sps:$4 sm:$0xff]  }
 0x48d   :  { %v2823_v55 = vpop.f32.mrf.mxu0  ;;  %v7946_v49 = vld [vmem:[#allocation15 + $0x740] ss:$28 sps:$4 sm:$0xff]   ;;  %v7952_v54 = vld [vmem:[#allocation15 + $0x708] ss:$28 sps:$4 sm:$0xff]  }
 0x48e   :  { %v2824_v56 = vadd.f32 %v2823_v55, %v1234_v43  ;;  %v2866_v57 = vpop.f32.mrf.mxu1  ;;  %5947 = vmatpush2.bf16.msra.mxu0 %v7892_v51  ;;  %v2865_v60 = vadd.f32 %v2864_v53, %v2822_v52  ;;  %v2877_v7 = vmax.f32 %v2863_v34, 0.0  ;;  %v7940_v43 = vld [vmem:[#allocation15 + $0x778] ss:$28 sps:$4 sm:$0xff]   ;;  %v7943_v51 = vld [vmem:[#allocation15 + $0x3c0] ss:$28 sps:$4 sm:$0xff]  }
 0x48f   :  { %v2825_v58 = vpop.f32.mrf.mxu0  ;;  %5948 = vmatprep.subr.bf16.mxu0 %v7900_v44  ;;  %v7951_v44 = vld [vmem:[#allocation15 + $0x38c] ss:$28 sps:$4 sm:$0xff]   ;;  %v7957_v55 = vld [vmem:[#allocation15 + $0x6d4] ss:$28 sps:$4 sm:$0xff]   ;;  %v7972_v34 = vld [vmem:[#allocation15 + $0x9e4] ss:$28 sps:$4 sm:$0xff]  }
 0x490   :  { %v2867_v29 = vadd.f32 %v2866_v57, %v2824_v56  ;;  %v2826_v61 = vadd.f32 %v2825_v58, %v1238_v40  ;;  %v2868_v62 = vpop.f32.mrf.mxu1  ;;  %v2878_v5 = vmax.f32 %v2865_v60, 0.0  ;;  %v7937_v40 = vld [vmem:[#allocation15 + $0x3f8] ss:$28 sps:$4 sm:$0xff]   ;;  %v7954_v52 = vld [vmem:[#allocation15 + $0x70c] ss:$28 sps:$4 sm:$0xff]  }
 0x491   :  { %v7949_v53 = vld [vmem:[#allocation15 + $0x388] ss:$28 sps:$4 sm:$0xff]   ;;  %v7960_v56 = vld [vmem:[#allocation15 + $0xa54] ss:$28 sps:$4 sm:$0xff]   ;;  %v7963_v58 = vld [vmem:[#allocation15 + $0x69c] ss:$28 sps:$4 sm:$0xff]  }
 0x492   :  { %v2869_v45 = vadd.f32 %v2868_v62, %v2826_v61  ;;  %5949 = vmatpush2.bf16.msra.mxu0 %v7898_v42  ;;  %v2885_v2 = vmax.f32 %v2867_v29, 0.0  ;;  %v7955_v57 = vld [vmem:[#allocation15 + $0x6d0] ss:$28 sps:$4 sm:$0xff]   ;;  %v7961_v60 = vld [vmem:[#allocation15 + $0x698] ss:$28 sps:$4 sm:$0xff]  }
 0x493   :  { %5950 = vmatprep.subr.bf16.mxu0 %v7906_v59  ;;  %v7958_v42 = vld [vmem:[#allocation15 + $0xa50] ss:$28 sps:$4 sm:$0xff]   ;;  %v7966_v59 = vld [vmem:[#allocation15 + $0xa1c] ss:$28 sps:$4 sm:$0xff]   ;;  %v7969_v61 = vld [vmem:[#allocation15 + $0x664] ss:$28 sps:$4 sm:$0xff]  }
 0x494   :  { %v2886_v6 = vmax.f32 %v2869_v45, 0.0  ;;  %v8792_v13 = vpack.c.bf16 %v2885_v2, %v2877_v7  ;;  %v7964_v29 = vld [vmem:[#allocation15 + $0xa18] ss:$28 sps:$4 sm:$0xff]   ;;  %v7967_v62 = vld [vmem:[#allocation15 + $0x660] ss:$28 sps:$4 sm:$0xff]  }
 0x495   :  { %v7970_v45 = vld [vmem:[#allocation15 + $0x9e0] ss:$28 sps:$4 sm:$0xff]   ;;  %v7978_v2 = vld [vmem:[#allocation15 + $0x9ac] ss:$28 sps:$4 sm:$0xff]   ;;  %v7984_v7 = vld [vmem:[#allocation15 + $0x974] ss:$28 sps:$4 sm:$0xff]  }
 0x496   :  { %v8790_v10 = vpack.c.bf16 %v2886_v6, %v2878_v5  ;;  %5951 = vmatpush2.bf16.msra.mxu0 %v7904_v1  ;;  %v7975_v1 = vld [vmem:[#allocation15 + $0x62c] ss:$28 sps:$4 sm:$0xff]   ;;  %v7981_v6 = vld [vmem:[#allocation15 + $0x5f4] ss:$28 sps:$4 sm:$0xff]  }
 0x497   :  { %6006 = vmatprep.subr.bf16.mxu0 %v7912_v4  ;;  %v7973_v4 = vld [vmem:[#allocation15 + $0x628] ss:$28 sps:$4 sm:$0xff]  }
 0x498   :  { %5909 = vmatprep.mubr.bf16.mxu1 %v8790_v10  ;;  %v7976_v5 = vld [vmem:[#allocation15 + $0x9a8] ss:$28 sps:$4 sm:$0xff]  }
 0x499   :  { %5953 = vmatmul.mubr.bf16.vlgmr.msra.gmra.mxu0 %v8756_v0  ;;  %5910 = vmatmul.mubr.bf16.vlgmr.msra.gmra.mxu1 %v8792_v13 }
 0x49a   :  { %5964 = vmatpush1.bf16.msra.mxu1 %v7907_v11  ;;  %6007 = vmatpush1.bf16.msra.mxu0 %v7910_v12  ;;  %v7979_v11 = vld [vmem:[#allocation15 + $0x5f0] ss:$28 sps:$4 sm:$0xff]  }
 0x49b   :  { %6038 = vmatprep.mubr.bf16.mxu0 %v8777_v35  ;;  %5995 = vmatprep.mubr.bf16.mxu1 %v8763_v32  ;;  %v7982_v12 = vld [vmem:[#allocation15 + $0x970] ss:$28 sps:$4 sm:$0xff]  }
 0x49c   :  { %5965 = vmatprep.subr.bf16.mxu1 %v7915_v14  ;;  %6008 = vmatprep.subr.bf16.mxu0 %v7918_v15  ;;  %v7987_v14 = vld [vmem:[#allocation15 + $0x5bc] ss:$28 sps:$4 sm:$0xff]  }
 0x49d   :  { %v7990_v15 = vld [vmem:[#allocation15 + $0x93c] ss:$28 sps:$4 sm:$0xff]  }
 0x49e   :  { %5966 = vmatpush1.bf16.msra.mxu1 %v7913_v16  ;;  %6009 = vmatpush1.bf16.msra.mxu0 %v7916_v17  ;;  %v7985_v16 = vld [vmem:[#allocation15 + $0x5b8] ss:$28 sps:$4 sm:$0xff]  }
 0x49f   :  { %5967 = vmatprep.subr.bf16.mxu1 %v7921_v18  ;;  %6010 = vmatprep.subr.bf16.mxu0 %v7924_v19  ;;  %v7988_v17 = vld [vmem:[#allocation15 + $0x938] ss:$28 sps:$4 sm:$0xff]   ;;  %v7993_v18 = vld [vmem:[#allocation15 + $0x584] ss:$28 sps:$4 sm:$0xff]  }
 0x4a0   :  { %v7996_v19 = vld [vmem:[#allocation15 + $0x904] ss:$28 sps:$4 sm:$0xff]  }
 0x4a2   :  { %5968 = vmatpush1.bf16.msra.mxu1 %v7919_v20  ;;  %6011 = vmatpush1.bf16.msra.mxu0 %v7922_v21  ;;  %v7991_v20 = vld [vmem:[#allocation15 + $0x580] ss:$28 sps:$4 sm:$0xff]  }
 0x4a3   :  { %5969 = vmatprep.subr.bf16.mxu1 %v7927_v22  ;;  %6012 = vmatprep.subr.bf16.mxu0 %v7930_v23  ;;  %v7994_v21 = vld [vmem:[#allocation15 + $0x900] ss:$28 sps:$4 sm:$0xff]   ;;  %v7999_v22 = vld [vmem:[#allocation15 + $0x54c] ss:$28 sps:$4 sm:$0xff]  }
 0x4a4   :  { %v8002_v23 = vld [vmem:[#allocation15 + $0x8cc] ss:$28 sps:$4 sm:$0xff]  }
 0x4a6   :  { %5970 = vmatpush1.bf16.msra.mxu1 %v7925_v24  ;;  %6013 = vmatpush1.bf16.msra.mxu0 %v7928_v27  ;;  %v7997_v24 = vld [vmem:[#allocation15 + $0x548] ss:$28 sps:$4 sm:$0xff]  }
 0x4a7   :  { %5971 = vmatprep.subr.bf16.mxu1 %v7933_v28  ;;  %6014 = vmatprep.subr.bf16.mxu0 %v7936_v30  ;;  %v8000_v27 = vld [vmem:[#allocation15 + $0x8c8] ss:$28 sps:$4 sm:$0xff]   ;;  %v8005_v28 = vld [vmem:[#allocation15 + $0xc14] ss:$28 sps:$4 sm:$0xff]   ;;  %v8008_v30 = vld [vmem:[#allocation15 + $0x19c] ss:$28 sps:$4 sm:$0xff]  }
 0x4aa   :  { %5972 = vmatpush1.bf16.msra.mxu1 %v7931_v31  ;;  %6015 = vmatpush1.bf16.msra.mxu0 %v7934_v33  ;;  %v8003_v31 = vld [vmem:[#allocation15 + $0xc10] ss:$28 sps:$4 sm:$0xff]   ;;  %v8006_v33 = vld [vmem:[#allocation15 + $0x198] ss:$28 sps:$4 sm:$0xff]  }
 0x4ab   :  { %5973 = vmatprep.subr.bf16.mxu1 %v7939_v38  ;;  %6016 = vmatprep.subr.bf16.mxu0 %v7942_v39  ;;  %v8011_v38 = vld [vmem:[#allocation15 + $0xbdc] ss:$28 sps:$4 sm:$0xff]   ;;  %v8014_v39 = vld [vmem:[#allocation15 + $0x164] ss:$28 sps:$4 sm:$0xff]  }
 0x4ae   :  { %5974 = vmatpush1.bf16.msra.mxu1 %v7937_v40  ;;  %6017 = vmatpush1.bf16.msra.mxu0 %v7940_v43  ;;  %v8009_v40 = vld [vmem:[#allocation15 + $0xbd8] ss:$28 sps:$4 sm:$0xff]   ;;  %v8012_v43 = vld [vmem:[#allocation15 + $0x160] ss:$28 sps:$4 sm:$0xff]  }
 0x4af   :  { %5975 = vmatprep.subr.bf16.mxu1 %v7945_v41  ;;  %6018 = vmatprep.subr.bf16.mxu0 %v7948_v50  ;;  %v8017_v41 = vld [vmem:[#allocation15 + $0xba4] ss:$28 sps:$4 sm:$0xff]   ;;  %v8020_v50 = vld [vmem:[#allocation15 + $0x12c] ss:$28 sps:$4 sm:$0xff]  }
 0x4b2   :  { %5976 = vmatpush1.bf16.msra.mxu1 %v7943_v51  ;;  %6019 = vmatpush1.bf16.msra.mxu0 %v7946_v49  ;;  %v8015_v51 = vld [vmem:[#allocation15 + $0xba0] ss:$28 sps:$4 sm:$0xff]   ;;  %v8018_v49 = vld [vmem:[#allocation15 + $0x128] ss:$28 sps:$4 sm:$0xff]  }
 0x4b3   :  { %5977 = vmatprep.subr.bf16.mxu1 %v7951_v44  ;;  %6020 = vmatprep.subr.bf16.mxu0 %v7954_v52  ;;  %v8023_v44 = vld [vmem:[#allocation15 + $0xb6c] ss:$28 sps:$4 sm:$0xff]   ;;  %v8026_v52 = vld [vmem:[#allocation15 + $0xf4] ss:$28 sps:$4 sm:$0xff]  }
 0x4b6   :  { %5978 = vmatpush1.bf16.msra.mxu1 %v7949_v53  ;;  %6021 = vmatpush1.bf16.msra.mxu0 %v7952_v54  ;;  %v8021_v53 = vld [vmem:[#allocation15 + $0xb68] ss:$28 sps:$4 sm:$0xff]   ;;  %v8024_v54 = vld [vmem:[#allocation15 + $0xf0] ss:$28 sps:$4 sm:$0xff]  }
 0x4b7   :  { %5979 = vmatprep.subr.bf16.mxu1 %v7957_v55  ;;  %6022 = vmatprep.subr.bf16.mxu0 %v7960_v56  ;;  %v8029_v55 = vld [vmem:[#allocation15 + $0xb34] ss:$28 sps:$4 sm:$0xff]   ;;  %v8032_v56 = vld [vmem:[#allocation15 + $0xbc] ss:$28 sps:$4 sm:$0xff]  }
 0x4ba   :  { %5980 = vmatpush2.bf16.msra.mxu1 %v7955_v57  ;;  %6023 = vmatpush2.bf16.msra.mxu0 %v7958_v42  ;;  %v8027_v57 = vld [vmem:[#allocation15 + $0xb30] ss:$28 sps:$4 sm:$0xff]   ;;  %v8030_v42 = vld [vmem:[#allocation15 + $0xb8] ss:$28 sps:$4 sm:$0xff]  }
 0x4bb   :  { %5981 = vmatprep.subr.bf16.mxu1 %v7963_v58  ;;  %6024 = vmatprep.subr.bf16.mxu0 %v7966_v59  ;;  %v8035_v58 = vld [vmem:[#allocation15 + $0xafc] ss:$28 sps:$4 sm:$0xff]   ;;  %v8038_v59 = vld [vmem:[#allocation15 + $0x84] ss:$28 sps:$4 sm:$0xff]  }
 0x4be   :  { %5982 = vmatpush2.bf16.msra.mxu1 %v7961_v60  ;;  %6025 = vmatpush2.bf16.msra.mxu0 %v7964_v29  ;;  %v8033_v60 = vld [vmem:[#allocation15 + $0xaf8] ss:$28 sps:$4 sm:$0xff]   ;;  %v8036_v29 = vld [vmem:[#allocation15 + $0x80] ss:$28 sps:$4 sm:$0xff]  }
 0x4bf   :  { %5983 = vmatprep.subr.bf16.mxu1 %v7969_v61  ;;  %6026 = vmatprep.subr.bf16.mxu0 %v7972_v34  ;;  %v8041_v61 = vld [vmem:[#allocation15 + $0xac4] ss:$28 sps:$4 sm:$0xff]   ;;  %v8044_v34 = vld [vmem:[#allocation15 + $0x4c] ss:$28 sps:$4 sm:$0xff]  }
 0x4c2   :  { %5984 = vmatpush2.bf16.msra.mxu1 %v7967_v62  ;;  %6027 = vmatpush2.bf16.msra.mxu0 %v7970_v45  ;;  %v8039_v62 = vld [vmem:[#allocation15 + $0xac0] ss:$28 sps:$4 sm:$0xff]   ;;  %v8042_v45 = vld [vmem:[#allocation15 + $0x48] ss:$28 sps:$4 sm:$0xff]  }
 0x4c3   :  { %5985 = vmatprep.subr.bf16.mxu1 %v7975_v1  ;;  %6028 = vmatprep.subr.bf16.mxu0 %v7978_v2  ;;  %v8047_v1 = vld [vmem:[#allocation15 + $0xa8c] ss:$28 sps:$4 sm:$0xff]   ;;  %v8050_v2 = vld [vmem:[#allocation15 + $0x14] ss:$28 sps:$4 sm:$0xff]  }
 0x4c6   :  { %5986 = vmatpush2.bf16.msra.mxu1 %v7973_v4  ;;  %6029 = vmatpush2.bf16.msra.mxu0 %v7976_v5  ;;  %v8045_v4 = vld [vmem:[#allocation15 + $0xa88] ss:$28 sps:$4 sm:$0xff]   ;;  %v8048_v5 = vld [vmem:[#allocation15 + $0x10] ss:$28 sps:$4 sm:$0xff]  }
 0x4c7   :  { %5987 = vmatprep.subr.bf16.mxu1 %v7981_v6  ;;  %6030 = vmatprep.subr.bf16.mxu0 %v7984_v7  ;;  %v8053_v6 = vld [vmem:[#allocation15 + $0xdd4] ss:$28 sps:$4 sm:$0xff]   ;;  %v8056_v7 = vld [vmem:[#allocation15 + $0x35c] ss:$28 sps:$4 sm:$0xff]  }
 0x4ca   :  { %5988 = vmatpush2.bf16.msra.mxu1 %v7979_v11  ;;  %6031 = vmatpush2.bf16.msra.mxu0 %v7982_v12  ;;  %v8051_v11 = vld [vmem:[#allocation15 + $0xdd0] ss:$28 sps:$4 sm:$0xff]   ;;  %v8054_v12 = vld [vmem:[#allocation15 + $0x358] ss:$28 sps:$4 sm:$0xff]  }
 0x4cb   :  { %5989 = vmatprep.subr.bf16.mxu1 %v7987_v14  ;;  %6032 = vmatprep.subr.bf16.mxu0 %v7990_v15  ;;  %v8059_v14 = vld [vmem:[#allocation15 + $0xd9c] ss:$28 sps:$4 sm:$0xff]   ;;  %v8062_v15 = vld [vmem:[#allocation15 + $0x324] ss:$28 sps:$4 sm:$0xff]  }
 0x4ce   :  { %5990 = vmatpush2.bf16.msra.mxu1 %v7985_v16  ;;  %6033 = vmatpush2.bf16.msra.mxu0 %v7988_v17  ;;  %v8057_v16 = vld [vmem:[#allocation15 + $0xd98] ss:$28 sps:$4 sm:$0xff]   ;;  %v8060_v17 = vld [vmem:[#allocation15 + $0x320] ss:$28 sps:$4 sm:$0xff]  }
 0x4cf   :  { %5991 = vmatprep.subr.bf16.mxu1 %v7993_v18  ;;  %6034 = vmatprep.subr.bf16.mxu0 %v7996_v19  ;;  %v8065_v18 = vld [vmem:[#allocation15 + $0xd64] ss:$28 sps:$4 sm:$0xff]   ;;  %v8068_v19 = vld [vmem:[#allocation15 + $0x2ec] ss:$28 sps:$4 sm:$0xff]  }
 0x4d2   :  { %5992 = vmatpush2.bf16.msra.mxu1 %v7991_v20  ;;  %6035 = vmatpush2.bf16.msra.mxu0 %v7994_v21  ;;  %v8063_v20 = vld [vmem:[#allocation15 + $0xd60] ss:$28 sps:$4 sm:$0xff]   ;;  %v8066_v21 = vld [vmem:[#allocation15 + $0x2e8] ss:$28 sps:$4 sm:$0xff]  }
 0x4d3   :  { %5993 = vmatprep.subr.bf16.mxu1 %v7999_v22  ;;  %6036 = vmatprep.subr.bf16.mxu0 %v8002_v23  ;;  %v8071_v22 = vld [vmem:[#allocation15 + $0xd2c] ss:$28 sps:$4 sm:$0xff]   ;;  %v8074_v23 = vld [vmem:[#allocation15 + $0x2b4] ss:$28 sps:$4 sm:$0xff]  }
 0x4d6   :  { %5994 = vmatpush2.bf16.msra.mxu1 %v7997_v24  ;;  %6037 = vmatpush2.bf16.msra.mxu0 %v8000_v27  ;;  %v8069_v24 = vld [vmem:[#allocation15 + $0xd28] ss:$28 sps:$4 sm:$0xff]   ;;  %v8072_v27 = vld [vmem:[#allocation15 + $0x2b0] ss:$28 sps:$4 sm:$0xff]  }
 0x4d7   :  { %6049 = vmatprep.subr.bf16.mxu1 %v8005_v28  ;;  %6092 = vmatprep.subr.bf16.mxu0 %v8008_v30  ;;  %v8077_v28 = vld [vmem:[#allocation15 + $0xcf4] ss:$28 sps:$4 sm:$0xff]   ;;  %v8080_v30 = vld [vmem:[#allocation15 + $0x27c] ss:$28 sps:$4 sm:$0xff]  }
 0x4d9   :  { %5996 = vmatmul.mubr.bf16.vlgmr.msra.gmra.mxu1 %v8765_v37  ;;  %6039 = vmatmul.mubr.bf16.vlgmr.msra.gmra.mxu0 %v8779_v3 }
 0x4da   :  { %6050 = vmatpush1.bf16.msra.mxu1 %v8003_v31  ;;  %6081 = vmatprep.mubr.bf16.mxu1 %v8790_v10  ;;  %v8075_v31 = vld [vmem:[#allocation15 + $0xcf0] ss:$28 sps:$4 sm:$0xff]  }
 0x4db   :  { %6093 = vmatpush1.bf16.msra.mxu0 %v8006_v33  ;;  %6124 = vmatprep.mubr.bf16.mxu0 %v8747_v63  ;;  %v8078_v33 = vld [vmem:[#allocation15 + $0x278] ss:$28 sps:$4 sm:$0xff]  }
 0x4dc   :  { %6051 = vmatprep.subr.bf16.mxu1 %v8011_v38  ;;  %6094 = vmatprep.subr.bf16.mxu0 %v8014_v39  ;;  %v8083_v38 = vld [vmem:[#allocation15 + $0xcbc] ss:$28 sps:$4 sm:$0xff]   ;;  %v8086_v39 = vld [vmem:[#allocation15 + $0x244] ss:$28 sps:$4 sm:$0xff]  }
 0x4de   :  { %6052 = vmatpush1.bf16.msra.mxu1 %v8009_v40  ;;  %v8081_v40 = vld [vmem:[#allocation15 + $0xcb8] ss:$28 sps:$4 sm:$0xff]  }
 0x4df   :  { %6095 = vmatpush1.bf16.msra.mxu0 %v8012_v43  ;;  %6053 = vmatprep.subr.bf16.mxu1 %v8017_v41  ;;  %v8084_v43 = vld [vmem:[#allocation15 + $0x240] ss:$28 sps:$4 sm:$0xff]  }
 0x4e0   :  { %6096 = vmatprep.subr.bf16.mxu0 %v8020_v50  ;;  %v8089_v41 = vld [vmem:[#allocation15 + $0xc84] ss:$28 sps:$4 sm:$0xff]   ;;  %v8092_v50 = vld [vmem:[#allocation15 + $0x20c] ss:$28 sps:$4 sm:$0xff]  }
 0x4e2   :  { %6054 = vmatpush1.bf16.msra.mxu1 %v8015_v51  ;;  %v8087_v51 = vld [vmem:[#allocation15 + $0xc80] ss:$28 sps:$4 sm:$0xff]  }
 0x4e3   :  { %6097 = vmatpush1.bf16.msra.mxu0 %v8018_v49  ;;  %6055 = vmatprep.subr.bf16.mxu1 %v8023_v44  ;;  %v8090_v49 = vld [vmem:[#allocation15 + $0x208] ss:$28 sps:$4 sm:$0xff]  }
 0x4e4   :  { %6098 = vmatprep.subr.bf16.mxu0 %v8026_v52  ;;  %v8095_v44 = vld [vmem:[#allocation15 + $0xc4c] ss:$28 sps:$4 sm:$0xff]   ;;  %v8098_v52 = vld [vmem:[#allocation15 + $0x1d4] ss:$28 sps:$4 sm:$0xff]  }
 0x4e6   :  { %6056 = vmatpush1.bf16.msra.mxu1 %v8021_v53  ;;  %v8093_v53 = vld [vmem:[#allocation15 + $0xc48] ss:$28 sps:$4 sm:$0xff]  }
 0x4e7   :  { %6099 = vmatpush1.bf16.msra.mxu0 %v8024_v54  ;;  %6057 = vmatprep.subr.bf16.mxu1 %v8029_v55  ;;  %v8096_v54 = vld [vmem:[#allocation15 + $0x1d0] ss:$28 sps:$4 sm:$0xff]   ;;  %v8101_v55 = vld [vmem:[#allocation15 + $0x51c] ss:$28 sps:$4 sm:$0xff]  }
 0x4e8   :  { %6100 = vmatprep.subr.bf16.mxu0 %v8032_v56  ;;  %v8104_v56 = vld [vmem:[#allocation15 + $0x89c] ss:$28 sps:$4 sm:$0xff]  }
 0x4ea   :  { %6058 = vmatpush1.bf16.msra.mxu1 %v8027_v57  ;;  %v8099_v57 = vld [vmem:[#allocation15 + $0x518] ss:$28 sps:$4 sm:$0xff]  }
 0x4eb   :  { %6101 = vmatpush1.bf16.msra.mxu0 %v8030_v42  ;;  %6059 = vmatprep.subr.bf16.mxu1 %v8035_v58  ;;  %v8102_v42 = vld [vmem:[#allocation15 + $0x898] ss:$28 sps:$4 sm:$0xff]   ;;  %v8107_v58 = vld [vmem:[#allocation15 + $0x4e4] ss:$28 sps:$4 sm:$0xff]  }
 0x4ec   :  { %6102 = vmatprep.subr.bf16.mxu0 %v8038_v59  ;;  %v8110_v59 = vld [vmem:[#allocation15 + $0x864] ss:$28 sps:$4 sm:$0xff]  }
 0x4ee   :  { %6060 = vmatpush1.bf16.msra.mxu1 %v8033_v60  ;;  %v8105_v60 = vld [vmem:[#allocation15 + $0x4e0] ss:$28 sps:$4 sm:$0xff]  }
 0x4ef   :  { %6103 = vmatpush1.bf16.msra.mxu0 %v8036_v29  ;;  %6061 = vmatprep.subr.bf16.mxu1 %v8041_v61  ;;  %v8108_v29 = vld [vmem:[#allocation15 + $0x860] ss:$28 sps:$4 sm:$0xff]   ;;  %v8113_v61 = vld [vmem:[#allocation15 + $0x4ac] ss:$28 sps:$4 sm:$0xff]  }
 0x4f0   :  { %6104 = vmatprep.subr.bf16.mxu0 %v8044_v34  ;;  %v8116_v34 = vld [vmem:[#allocation15 + $0x82c] ss:$28 sps:$4 sm:$0xff]  }
 0x4f2   :  { %6062 = vmatpush1.bf16.msra.mxu1 %v8039_v62  ;;  %v8111_v62 = vld [vmem:[#allocation15 + $0x4a8] ss:$28 sps:$4 sm:$0xff]  }
 0x4f3   :  { %6105 = vmatpush1.bf16.msra.mxu0 %v8042_v45  ;;  %6063 = vmatprep.subr.bf16.mxu1 %v8047_v1  ;;  %v8114_v45 = vld [vmem:[#allocation15 + $0x828] ss:$28 sps:$4 sm:$0xff]   ;;  %v8119_v1 = vld [vmem:[#allocation15 + $0x474] ss:$28 sps:$4 sm:$0xff]  }
 0x4f4   :  { %6106 = vmatprep.subr.bf16.mxu0 %v8050_v2  ;;  %v8122_v2 = vld [vmem:[#allocation15 + $0x7f4] ss:$28 sps:$4 sm:$0xff]  }
 0x4f6   :  { %6064 = vmatpush1.bf16.msra.mxu1 %v8045_v4  ;;  %v8117_v4 = vld [vmem:[#allocation15 + $0x470] ss:$28 sps:$4 sm:$0xff]  }
 0x4f7   :  { %6107 = vmatpush1.bf16.msra.mxu0 %v8048_v5  ;;  %6065 = vmatprep.subr.bf16.mxu1 %v8053_v6  ;;  %v8120_v5 = vld [vmem:[#allocation15 + $0x7f0] ss:$28 sps:$4 sm:$0xff]   ;;  %v8125_v6 = vld [vmem:[#allocation15 + $0x43c] ss:$28 sps:$4 sm:$0xff]  }
 0x4f8   :  { %6108 = vmatprep.subr.bf16.mxu0 %v8056_v7  ;;  %v8128_v7 = vld [vmem:[#allocation15 + $0x7bc] ss:$28 sps:$4 sm:$0xff]  }
 0x4fa   :  { %6066 = vmatpush2.bf16.msra.mxu1 %v8051_v11  ;;  %v8123_v11 = vld [vmem:[#allocation15 + $0x438] ss:$28 sps:$4 sm:$0xff]  }
 0x4fb   :  { %6109 = vmatpush2.bf16.msra.mxu0 %v8054_v12  ;;  %6067 = vmatprep.subr.bf16.mxu1 %v8059_v14  ;;  %v8126_v12 = vld [vmem:[#allocation15 + $0x7b8] ss:$28 sps:$4 sm:$0xff]   ;;  %v8131_v14 = vld [vmem:[#allocation15 + $0x404] ss:$28 sps:$4 sm:$0xff]  }
 0x4fc   :  { %6110 = vmatprep.subr.bf16.mxu0 %v8062_v15  ;;  %v8134_v15 = vld [vmem:[#allocation15 + $0x784] ss:$28 sps:$4 sm:$0xff]  }
 0x4fe   :  { %6068 = vmatpush2.bf16.msra.mxu1 %v8057_v16  ;;  %v8129_v16 = vld [vmem:[#allocation15 + $0x400] ss:$28 sps:$4 sm:$0xff]  }
 0x4ff   :  { %6111 = vmatpush2.bf16.msra.mxu0 %v8060_v17  ;;  %6069 = vmatprep.subr.bf16.mxu1 %v8065_v18  ;;  %v8132_v17 = vld [vmem:[#allocation15 + $0x780] ss:$28 sps:$4 sm:$0xff]   ;;  %v8137_v18 = vld [vmem:[#allocation15 + $0x3cc] ss:$28 sps:$4 sm:$0xff]  }
 0x500   :  { %6112 = vmatprep.subr.bf16.mxu0 %v8068_v19  ;;  %v8140_v19 = vld [vmem:[#allocation15 + $0x74c] ss:$28 sps:$4 sm:$0xff]  }
 0x502   :  { %6070 = vmatpush2.bf16.msra.mxu1 %v8063_v20  ;;  %v8135_v20 = vld [vmem:[#allocation15 + $0x3c8] ss:$28 sps:$4 sm:$0xff]  }
 0x503   :  { %6113 = vmatpush2.bf16.msra.mxu0 %v8066_v21  ;;  %6071 = vmatprep.subr.bf16.mxu1 %v8071_v22  ;;  %v8138_v21 = vld [vmem:[#allocation15 + $0x748] ss:$28 sps:$4 sm:$0xff]   ;;  %v8143_v22 = vld [vmem:[#allocation15 + $0x394] ss:$28 sps:$4 sm:$0xff]  }
 0x504   :  { %6114 = vmatprep.subr.bf16.mxu0 %v8074_v23  ;;  %v8146_v23 = vld [vmem:[#allocation15 + $0x714] ss:$28 sps:$4 sm:$0xff]  }
 0x506   :  { %6072 = vmatpush2.bf16.msra.mxu1 %v8069_v24  ;;  %v8141_v24 = vld [vmem:[#allocation15 + $0x390] ss:$28 sps:$4 sm:$0xff]  }
 0x507   :  { %6115 = vmatpush2.bf16.msra.mxu0 %v8072_v27  ;;  %6073 = vmatprep.subr.bf16.mxu1 %v8077_v28  ;;  %v8144_v27 = vld [vmem:[#allocation15 + $0x710] ss:$28 sps:$4 sm:$0xff]   ;;  %v8149_v28 = vld [vmem:[#allocation15 + $0x6dc] ss:$28 sps:$4 sm:$0xff]  }
 0x508   :  { %6116 = vmatprep.subr.bf16.mxu0 %v8080_v30  ;;  %v8152_v30 = vld [vmem:[#allocation15 + $0xa5c] ss:$28 sps:$4 sm:$0xff]  }
 0x50a   :  { %6074 = vmatpush2.bf16.msra.mxu1 %v8075_v31  ;;  %v8147_v31 = vld [vmem:[#allocation15 + $0x6d8] ss:$28 sps:$4 sm:$0xff]  }
 0x50b   :  { %6117 = vmatpush2.bf16.msra.mxu0 %v8078_v33  ;;  %6075 = vmatprep.subr.bf16.mxu1 %v8083_v38  ;;  %v8150_v33 = vld [vmem:[#allocation15 + $0xa58] ss:$28 sps:$4 sm:$0xff]   ;;  %v8155_v38 = vld [vmem:[#allocation15 + $0x6a4] ss:$28 sps:$4 sm:$0xff]  }
 0x50c   :  { %6118 = vmatprep.subr.bf16.mxu0 %v8086_v39  ;;  %v8158_v39 = vld [vmem:[#allocation15 + $0xa24] ss:$28 sps:$4 sm:$0xff]  }
 0x50e   :  { %6076 = vmatpush2.bf16.msra.mxu1 %v8081_v40  ;;  %v8153_v40 = vld [vmem:[#allocation15 + $0x6a0] ss:$28 sps:$4 sm:$0xff]  }
 0x50f   :  { %6119 = vmatpush2.bf16.msra.mxu0 %v8084_v43  ;;  %6077 = vmatprep.subr.bf16.mxu1 %v8089_v41  ;;  %v8156_v43 = vld [vmem:[#allocation15 + $0xa20] ss:$28 sps:$4 sm:$0xff]   ;;  %v8161_v41 = vld [vmem:[#allocation15 + $0x66c] ss:$28 sps:$4 sm:$0xff]  }
 0x510   :  { %6120 = vmatprep.subr.bf16.mxu0 %v8092_v50  ;;  %v8164_v50 = vld [vmem:[#allocation15 + $0x9ec] ss:$28 sps:$4 sm:$0xff]  }
 0x512   :  { %6078 = vmatpush2.bf16.msra.mxu1 %v8087_v51  ;;  %v8159_v51 = vld [vmem:[#allocation15 + $0x668] ss:$28 sps:$4 sm:$0xff]  }
 0x513   :  { %6121 = vmatpush2.bf16.msra.mxu0 %v8090_v49  ;;  %6079 = vmatprep.subr.bf16.mxu1 %v8095_v44  ;;  %v8162_v49 = vld [vmem:[#allocation15 + $0x9e8] ss:$28 sps:$4 sm:$0xff]   ;;  %v8167_v44 = vld [vmem:[#allocation15 + $0x634] ss:$28 sps:$4 sm:$0xff]  }
 0x514   :  { %6122 = vmatprep.subr.bf16.mxu0 %v8098_v52  ;;  %v8170_v52 = vld [vmem:[#allocation15 + $0x9b4] ss:$28 sps:$4 sm:$0xff]  }
 0x516   :  { %6080 = vmatpush2.bf16.msra.mxu1 %v8093_v53  ;;  %v5782_v53 = vpop.f32.mrf.mxu0 }
 0x517   :  { %6123 = vmatpush2.bf16.msra.mxu0 %v8096_v54  ;;  %6135 = vmatprep.subr.bf16.mxu1 %v8101_v55  ;;  %v8165_v54 = vld [vmem:[#allocation15 + $0x630] ss:$28 sps:$4 sm:$0xff]  }
 0x518   :  { %6178 = vmatprep.subr.bf16.mxu0 %v8104_v56  ;;  %v8168_v55 = vld [vmem:[#allocation15 + $0x9b0] ss:$28 sps:$4 sm:$0xff]   ;;  %v8173_v56 = vld [vmem:[#allocation15 + $0x5fc] ss:$28 sps:$4 sm:$0xff]  }
 0x519   :  { %6082 = vmatmul.mubr.bf16.vlgmr.msra.gmra.mxu1 %v8792_v13 }
 0x51a   :  { %6125 = vmatmul.mubr.bf16.vlgmr.msra.gmra.mxu0 %v8756_v0  ;;  %6136 = vmatpush1.bf16.msra.mxu1 %v8099_v57  ;;  %v8176_v57 = vld [vmem:[#allocation15 + $0x97c] ss:$28 sps:$4 sm:$0xff]  }
 0x51b   :  { %6167 = vmatprep.mubr.bf16.mxu1 %v8763_v32  ;;  %6179 = vmatpush1.bf16.msra.mxu0 %v8102_v42  ;;  %v5784_v42 = vpop.f32.mrf.mxu0 }
 0x51c   :  { %6210 = vmatprep.mubr.bf16.mxu0 %v8777_v35  ;;  %6137 = vmatprep.subr.bf16.mxu1 %v8107_v58  ;;  %v8171_v58 = vld [vmem:[#allocation15 + $0x5f8] ss:$28 sps:$4 sm:$0xff]  }
 0x51d   :  { %6180 = vmatprep.subr.bf16.mxu0 %v8110_v59  ;;  %v8174_v59 = vld [vmem:[#allocation15 + $0x978] ss:$28 sps:$4 sm:$0xff]  }
 0x51e   :  { %6138 = vmatpush1.bf16.msra.mxu1 %v8105_v60  ;;  %v8179_v60 = vld [vmem:[#allocation15 + $0x5c4] ss:$28 sps:$4 sm:$0xff]  }
 0x51f   :  { %6181 = vmatpush1.bf16.msra.mxu0 %v8108_v29  ;;  %6139 = vmatprep.subr.bf16.mxu1 %v8113_v61  ;;  %v8182_v29 = vld [vmem:[#allocation15 + $0x944] ss:$28 sps:$4 sm:$0xff]   ;;  %v5786_v61 = vpop.f32.mrf.mxu0 }
 0x520   :  { %6182 = vmatprep.subr.bf16.mxu0 %v8116_v34  ;;  %v8177_v34 = vld [vmem:[#allocation15 + $0x5c0] ss:$28 sps:$4 sm:$0xff]  }
 0x522   :  { %6140 = vmatpush1.bf16.msra.mxu1 %v8111_v62  ;;  %v5825_v62 = vpop.f32.mrf.mxu1 }
 0x523   :  { %6183 = vmatpush1.bf16.msra.mxu0 %v8114_v45  ;;  %6141 = vmatprep.subr.bf16.mxu1 %v8119_v1  ;;  %v8180_v45 = vld [vmem:[#allocation15 + $0x940] ss:$28 sps:$4 sm:$0xff]   ;;  %v8185_v1 = vld [vmem:[#allocation15 + $0x58c] ss:$28 sps:$4 sm:$0xff]  }
 0x524   :  { %6184 = vmatprep.subr.bf16.mxu0 %v8122_v2  ;;  %v8188_v2 = vld [vmem:[#allocation15 + $0x90c] ss:$28 sps:$4 sm:$0xff]  }
 0x526   :  { %6142 = vmatpush1.bf16.msra.mxu1 %v8117_v4  ;;  %v8807_v4 = vld [vmem:[#allocation16] sm:$0xff] }
 0x527   :  { %6185 = vmatpush1.bf16.msra.mxu0 %v8120_v5  ;;  %6143 = vmatprep.subr.bf16.mxu1 %v8125_v6  ;;  %v5788_v5 = vpop.f32.mrf.mxu0  ;;  %v8183_v6 = vld [vmem:[#allocation15 + $0x588] ss:$28 sps:$4 sm:$0xff]  }
 0x528   :  { %6186 = vmatprep.subr.bf16.mxu0 %v8128_v7  ;;  %v5827_v7 = vpop.f32.mrf.mxu1 }
 0x52a   :  { %6144 = vmatpush1.bf16.msra.mxu1 %v8123_v11  ;;  %v5868_v11 = vpop.f32.mrf.mxu0 }
 0x52b   :  { %6187 = vmatpush1.bf16.msra.mxu0 %v8126_v12  ;;  %6145 = vmatprep.subr.bf16.mxu1 %v8131_v14  ;;  %v8186_v12 = vld [vmem:[#allocation15 + $0x908] ss:$28 sps:$4 sm:$0xff]   ;;  %v8191_v14 = vld [vmem:[#allocation15 + $0x554] ss:$28 sps:$4 sm:$0xff]  }
 0x52c   :  { %6188 = vmatprep.subr.bf16.mxu0 %v8134_v15  ;;  %v3412_v15 = vrot.slane %v8807_v4, %v8697_v48  ;;  %v8195_v48 = vld [vmem:[#allocation15 + $0xc18] ss:$28 sps:$4 sm:$0xff]  }
 0x52e   :  { %6146 = vmatpush1.bf16.msra.mxu1 %v8129_v16  ;;  %v8194_v16 = vld [vmem:[#allocation15 + $0x8d4] ss:$28 sps:$4 sm:$0xff]  }
 0x52f   :  { %6189 = vmatpush1.bf16.msra.mxu0 %v8132_v17  ;;  %6147 = vmatprep.subr.bf16.mxu1 %v8137_v18  ;;  %v3416_v17 = vrot.slane %v8807_v4, %v8694_v47  ;;  %v8189_v18 = vld [vmem:[#allocation15 + $0x550] ss:$28 sps:$4 sm:$0xff]   ;;  %v8199_v47 = vld [vmem:[#allocation15 + $0x1a0] ss:$28 sps:$4 sm:$0xff]  }
 0x530   :  { %6190 = vmatprep.subr.bf16.mxu0 %v8140_v19  ;;  %v5829_v19 = vpop.f32.mrf.mxu1 }
 0x532   :  { %6148 = vmatpush1.bf16.msra.mxu1 %v8135_v20  ;;  %v5870_v20 = vpop.f32.mrf.mxu0 }
 0x533   :  { %6191 = vmatpush1.bf16.msra.mxu0 %v8138_v21  ;;  %6149 = vmatprep.subr.bf16.mxu1 %v8143_v22  ;;  %v8192_v21 = vld [vmem:[#allocation15 + $0x8d0] ss:$28 sps:$4 sm:$0xff]   ;;  %v8197_v22 = vld [vmem:[#allocation15 + $0xc1c] ss:$28 sps:$4 sm:$0xff]  }
 0x534   :  { %6192 = vmatprep.subr.bf16.mxu0 %v8146_v23  ;;  %v5783_v23 = vadd.f32 %v5782_v53, %v3412_v15 }
 0x536   :  { %6150 = vmatpush1.bf16.msra.mxu1 %v8141_v24  ;;  %v8198_v24 = vld [vmem:[#allocation15 + $0x360] ss:$28 sps:$4 sm:$0xff]  }
 0x537   :  { %6193 = vmatpush1.bf16.msra.mxu0 %v8144_v27  ;;  %6151 = vmatprep.subr.bf16.mxu1 %v8149_v28  ;;  %v5785_v27 = vadd.f32 %v5784_v42, %v3416_v17  ;;  %v5826_v28 = vadd.f32 %v5825_v62, %v5783_v23  ;;  %v8224_v23 = vld [vmem:[#allocation15 + $0x88] ss:$28 sps:$4 sm:$0xff]  }
 0x538   :  { %6194 = vmatprep.subr.bf16.mxu0 %v8152_v30  ;;  %v5831_v30 = vpop.f32.mrf.mxu1 }
 0x53a   :  { %6152 = vmatpush2.bf16.msra.mxu1 %v8147_v31  ;;  %v5872_v31 = vpop.f32.mrf.mxu0 }
 0x53b   :  { %6195 = vmatpush2.bf16.msra.mxu0 %v8150_v33  ;;  %6153 = vmatprep.subr.bf16.mxu1 %v8155_v38  ;;  %v5787_v33 = vadd.f32 %v5786_v61, %v3412_v15  ;;  %v5828_v38 = vadd.f32 %v5827_v7, %v5785_v27  ;;  %v8217_v15 = vld [vmem:[#allocation15 + $0xb3c] ss:$28 sps:$4 sm:$0xff]  }
 0x53c   :  { %6196 = vmatprep.subr.bf16.mxu0 %v8158_v39  ;;  %v5869_v39 = vadd.f32 %v5868_v11, %v5826_v28  ;;  %v5874_v53 = vpop.f32.mrf.mxu0  ;;  %v8228_v28 = vld [vmem:[#allocation15 + $0x210] ss:$28 sps:$4 sm:$0xff]  }
 0x53e   :  { %6154 = vmatpush2.bf16.msra.mxu1 %v8153_v40  ;;  %v8202_v40 = vld [vmem:[#allocation15 + $0xbe4] ss:$28 sps:$4 sm:$0xff]  }
 0x53f   :  { %6197 = vmatpush2.bf16.msra.mxu0 %v8156_v43  ;;  %6155 = vmatprep.subr.bf16.mxu1 %v8161_v41  ;;  %v5789_v43 = vadd.f32 %v5788_v5, %v3416_v17  ;;  %v8212_v5 = vld [vmem:[#allocation15 + $0xb74] ss:$28 sps:$4 sm:$0xff]  }
 0x540   :  { %6198 = vmatprep.subr.bf16.mxu0 %v8164_v50  ;;  %v8203_v50 = vld [vmem:[#allocation15 + $0x328] ss:$28 sps:$4 sm:$0xff]   ;;  %v8215_v17 = vld [vmem:[#allocation15 + $0xb38] ss:$28 sps:$4 sm:$0xff]  }
 0x542   :  { %6156 = vmatpush2.bf16.msra.mxu1 %v8159_v51  ;;  %v5830_v51 = vadd.f32 %v5829_v19, %v5787_v33  ;;  %v8222_v19 = vld [vmem:[#allocation15 + $0xb04] ss:$28 sps:$4 sm:$0xff]   ;;  %v8229_v33 = vld [vmem:[#allocation15 + $0x50] ss:$28 sps:$4 sm:$0xff]  }
 0x543   :  { %6199 = vmatpush2.bf16.msra.mxu0 %v8162_v49  ;;  %6157 = vmatprep.subr.bf16.mxu1 %v8167_v44  ;;  %v5871_v49 = vadd.f32 %v5870_v20, %v5828_v38  ;;  %v8223_v20 = vld [vmem:[#allocation15 + $0x248] ss:$28 sps:$4 sm:$0xff]   ;;  %v8232_v38 = vld [vmem:[#allocation15 + $0xa94] ss:$28 sps:$4 sm:$0xff]  }
 0x544   :  { %6200 = vmatprep.subr.bf16.mxu0 %v8170_v52  ;;  %v8200_v52 = vld [vmem:[#allocation15 + $0xbe0] ss:$28 sps:$4 sm:$0xff]   ;;  %v5873_v42 = vadd.f32 %v5872_v31, %v5830_v51  ;;  %v8225_v31 = vld [vmem:[#allocation15 + $0xac8] ss:$28 sps:$4 sm:$0xff]   ;;  %v8234_v51 = vld [vmem:[#allocation15 + $0x18] ss:$28 sps:$4 sm:$0xff]  }
 0x546   :  { %6158 = vmatpush2.bf16.msra.mxu1 %v8165_v54 }
 0x547   :  { %6201 = vmatpush2.bf16.msra.mxu0 %v8168_v55  ;;  %6159 = vmatprep.subr.bf16.mxu1 %v8173_v56  ;;  %v8204_v55 = vld [vmem:[#allocation15 + $0x168] ss:$28 sps:$4 sm:$0xff]  }
 0x548   :  { %6202 = vmatprep.subr.bf16.mxu0 %v8176_v57  ;;  %v8207_v56 = vld [vmem:[#allocation15 + $0xbac] ss:$28 sps:$4 sm:$0xff]   ;;  %v5832_v57 = vadd.f32 %v5831_v30, %v5789_v43 }
 0x54a   :  { %6160 = vmatpush2.bf16.msra.mxu1 %v8171_v58  ;;  %v5875_v61 = vadd.f32 %v5874_v53, %v5832_v57  ;;  %v8239_v53 = vld [vmem:[#allocation15 + $0x8a0] ss:$28 sps:$4 sm:$0xff]   ;;  %v8244_v57 = vld [vmem:[#allocation15 + $0x868] ss:$28 sps:$4 sm:$0xff]  }
 0x54b   :  { %6203 = vmatpush2.bf16.msra.mxu0 %v8174_v59  ;;  %6161 = vmatprep.subr.bf16.mxu1 %v8179_v60  ;;  %v8208_v60 = vld [vmem:[#allocation15 + $0x2f0] ss:$28 sps:$4 sm:$0xff]  }
 0x54c   :  { %6204 = vmatprep.subr.bf16.mxu0 %v8182_v29 }
 0x54e   :  { %6162 = vmatpush2.bf16.msra.mxu1 %v8177_v34 }
 0x54f   :  { %6205 = vmatpush2.bf16.msra.mxu0 %v8180_v45  ;;  %6163 = vmatprep.subr.bf16.mxu1 %v8185_v1  ;;  %v8205_v45 = vld [vmem:[#allocation15 + $0xba8] ss:$28 sps:$4 sm:$0xff]  }
 0x550   :  { %6206 = vmatprep.subr.bf16.mxu0 %v8188_v2  ;;  %v8209_v2 = vld [vmem:[#allocation15 + $0x130] ss:$28 sps:$4 sm:$0xff]  }
 0x552   :  { %6164 = vmatpush2.bf16.msra.mxu1 %v8183_v6 }
 0x553   :  { %6207 = vmatpush2.bf16.msra.mxu0 %v8186_v12  ;;  %6165 = vmatprep.subr.bf16.mxu1 %v8191_v14  ;;  %v8210_v12 = vld [vmem:[#allocation15 + $0xb70] ss:$28 sps:$4 sm:$0xff]   ;;  %v8214_v14 = vld [vmem:[#allocation15 + $0xf8] ss:$28 sps:$4 sm:$0xff]  }
 0x554   :  { %6208 = vmatprep.subr.bf16.mxu0 %v8194_v16  ;;  %v8218_v16 = vld [vmem:[#allocation15 + $0x280] ss:$28 sps:$4 sm:$0xff]  }
 0x556   :  { %6166 = vmatpush2.bf16.msra.mxu1 %v8189_v18  ;;  %v8219_v18 = vld [vmem:[#allocation15 + $0xc0] ss:$28 sps:$4 sm:$0xff]  }
 0x557   :  { %6209 = vmatpush2.bf16.msra.mxu0 %v8192_v21  ;;  %6221 = vmatprep.subr.bf16.mxu1 %v8197_v22  ;;  %v8220_v21 = vld [vmem:[#allocation15 + $0xb00] ss:$28 sps:$4 sm:$0xff]  }
 0x558   :  { %7407 = vmatprep.subr.bf16.mxu0 %v8198_v24  ;;  %v8227_v24 = vld [vmem:[#allocation15 + $0xacc] ss:$28 sps:$4 sm:$0xff]  }
 0x559   :  { %6168 = vmatmul.mubr.bf16.vlgmr.msra.gmra.mxu1 %v8765_v37  ;;  %v5911_v41 = vpop.f32.mrf.mxu1 }
 0x55a   :  { %6211 = vmatmul.mubr.bf16.vlgmr.msra.gmra.mxu0 %v8779_v3  ;;  %v5912_v44 = vadd.f32 %v5911_v41, %v5869_v39  ;;  %6222 = vmatpush1.bf16.msra.mxu1 %v8195_v48 }
 0x55b   :  { %6253 = vmatprep.mubr.bf16.mxu1 %v8790_v10  ;;  %7408 = vmatpush3.bf16.msra.mxu0 %v8199_v47  ;;  %v5913_v54 = vpop.f32.mrf.mxu1 }
 0x55c   :  { %v7368_v58 = vmul.f32 -1.442695, %v5912_v44  ;;  %6296 = vmatprep.mubr.bf16.mxu0 %v8747_v63  ;;  %v5914_v59 = vadd.f32 %v5913_v54, %v5871_v49  ;;  %6223 = vmatprep.subr.bf16.mxu1 %v8202_v40  ;;  %v8213_v63 = vld [vmem:[#allocation15 + $0x2b8] ss:$28 sps:$4 sm:$0xff]   ;;  %v8238_v44 = vld [vmem:[#allocation15 + $0xa60] ss:$28 sps:$4 sm:$0xff]  }
 0x55d   :  { %7409 = vmatprep.subr.bf16.mxu0 %v8203_v50  ;;  %v5915_v29 = vpop.f32.mrf.mxu1  ;;  %v8233_v40 = vld [vmem:[#allocation15 + $0x1d8] ss:$28 sps:$4 sm:$0xff]   ;;  %v8230_v50 = vld [vmem:[#allocation15 + $0xa90] ss:$28 sps:$4 sm:$0xff]   ;;  %v8242_v54 = vld [vmem:[#allocation15 + $0xda4] ss:$28 sps:$4 sm:$0xff]  }
 0x55e   :  { %8307 = vpow2.f32 %v7368_v58  ;;  %v7369_v34 = vmul.f32 -1.442695, %v5914_v59  ;;  %v5916_v62 = vadd.f32 %v5915_v29, %v5873_v42  ;;  %6224 = vmatpush1.bf16.msra.mxu1 %v8200_v52  ;;  %v8237_v49 = vld [vmem:[#allocation15 + $0xddc] ss:$28 sps:$4 sm:$0xff]   ;;  %v8247_v42 = vld [vmem:[#allocation15 + $0xd6c] ss:$28 sps:$4 sm:$0xff]  }
 0x55f   :  { %7410 = vmatpush3.bf16.msra.mxu0 %v8204_v55  ;;  %v5917_v1 = vpop.f32.mrf.mxu1  ;;  %6225 = vmatprep.subr.bf16.mxu1 %v8207_v56  ;;  %v8235_v52 = vld [vmem:[#allocation15 + $0xdd8] ss:$28 sps:$4 sm:$0xff]   ;;  %v8243_v55 = vld [vmem:[#allocation15 + $0xa28] ss:$28 sps:$4 sm:$0xff]   ;;  %v8240_v56 = vld [vmem:[#allocation15 + $0xda0] ss:$28 sps:$4 sm:$0xff]  }
 0x560   :  { %8309 = vpow2.f32 %v7369_v34  ;;  %v7375_v6 = vmul.f32 -1.442695, %v5916_v62  ;;  %v5918_v7 = vadd.f32 %v5917_v1, %v5875_v61  ;;  %7411 = vmatprep.subr.bf16.mxu0 %v8208_v60  ;;  %v8248_v59 = vld [vmem:[#allocation15 + $0x9f0] ss:$28 sps:$4 sm:$0xff]   ;;  %v8245_v61 = vld [vmem:[#allocation15 + $0xd68] ss:$28 sps:$4 sm:$0xff]  }
 0x561   :  { %v8249_v34 = vld [vmem:[#allocation15 + $0x830] ss:$28 sps:$4 sm:$0xff]  }
 0x562   :  { %8311 = vpow2.f32 %v7375_v6  ;;  %v7376_v11 = vmul.f32 -1.442695, %v5918_v7  ;;  %6226 = vmatpush1.bf16.msra.mxu1 %v8205_v45  ;;  %v8252_v62 = vld [vmem:[#allocation15 + $0xd34] ss:$28 sps:$4 sm:$0xff]   ;;  %v8257_v6 = vld [vmem:[#allocation15 + $0xcfc] ss:$28 sps:$4 sm:$0xff]  }
 0x563   :  { %7412 = vmatpush3.bf16.msra.mxu0 %v8209_v2  ;;  %6227 = vmatprep.subr.bf16.mxu1 %v8212_v5  ;;  %v8250_v2 = vld [vmem:[#allocation15 + $0xd30] ss:$28 sps:$4 sm:$0xff]   ;;  %v8254_v5 = vld [vmem:[#allocation15 + $0x7f8] ss:$28 sps:$4 sm:$0xff]   ;;  %v8258_v7 = vld [vmem:[#allocation15 + $0x980] ss:$28 sps:$4 sm:$0xff]  }
 0x564   :  { %8313 = vpow2.f32 %v7376_v11  ;;  %7413 = vmatprep.subr.bf16.mxu0 %v8213_v63  ;;  %v8255_v63 = vld [vmem:[#allocation15 + $0xcf8] ss:$28 sps:$4 sm:$0xff]   ;;  %v8259_v11 = vld [vmem:[#allocation15 + $0x7c0] ss:$28 sps:$4 sm:$0xff]  }
 0x566   :  { %6228 = vmatpush1.bf16.msra.mxu1 %v8210_v12  ;;  %v8262_v12 = vld [vmem:[#allocation15 + $0xcc4] ss:$28 sps:$4 sm:$0xff]  }
 0x567   :  { %7414 = vmatpush3.bf16.msra.mxu0 %v8214_v14  ;;  %6229 = vmatprep.subr.bf16.mxu1 %v8217_v15  ;;  %v8263_v14 = vld [vmem:[#allocation15 + $0x948] ss:$28 sps:$4 sm:$0xff]   ;;  %v8260_v15 = vld [vmem:[#allocation15 + $0xcc0] ss:$28 sps:$4 sm:$0xff]  }
 0x568   :  { %7415 = vmatprep.subr.bf16.mxu0 %v8218_v16  ;;  %v8264_v16 = vld [vmem:[#allocation15 + $0x788] ss:$28 sps:$4 sm:$0xff]  }
 0x56a   :  { %6230 = vmatpush1.bf16.msra.mxu1 %v8215_v17  ;;  %v8267_v17 = vld [vmem:[#allocation15 + $0xc8c] ss:$28 sps:$4 sm:$0xff]  }
 0x56b   :  { %v8308_v22 = vpop.eup %8307  ;;  %7416 = vmatpush3.bf16.msra.mxu0 %v8219_v18  ;;  %6231 = vmatprep.subr.bf16.mxu1 %v8222_v19  ;;  %v8268_v18 = vld [vmem:[#allocation15 + $0x910] ss:$28 sps:$4 sm:$0xff]   ;;  %v8265_v19 = vld [vmem:[#allocation15 + $0xc88] ss:$28 sps:$4 sm:$0xff]  }
 0x56c   :  { %v6470_v27 = vadd.f32 1.0, %v8308_v22  ;;  %7417 = vmatprep.subr.bf16.mxu0 %v8223_v20  ;;  %v8269_v20 = vld [vmem:[#allocation15 + $0x750] ss:$28 sps:$4 sm:$0xff]   ;;  %v8273_v22 = vld [vmem:[#allocation15 + $0x8d8] ss:$28 sps:$4 sm:$0xff]  }
 0x56d   :  { %v8310_v48 = vpop.eup %8309 }
 0x56e   :  { %v6471_v30 = vadd.f32 1.0, %v8310_v48  ;;  %6232 = vmatpush1.bf16.msra.mxu1 %v8220_v21  ;;  %8315 = vrcp.f32 %v6470_v27  ;;  %v8272_v21 = vld [vmem:[#allocation15 + $0xc54] ss:$28 sps:$4 sm:$0xff]   ;;  %v8275_v27 = vld [vmem:[#allocation15 + $0x6e0] ss:$28 sps:$4 sm:$0xff]  }
 0x56f   :  { %v8312_v47 = vpop.eup %8311  ;;  %7418 = vmatpush3.bf16.msra.mxu0 %v8224_v23  ;;  %6233 = vmatprep.subr.bf16.mxu1 %v8227_v24  ;;  %v8270_v23 = vld [vmem:[#allocation15 + $0xc50] ss:$28 sps:$4 sm:$0xff]   ;;  %v8274_v24 = vld [vmem:[#allocation15 + $0x718] ss:$28 sps:$4 sm:$0xff]   ;;  %v8277_v48 = vld [vmem:[#allocation15 + $0x6a8] ss:$28 sps:$4 sm:$0xff]  }
 0x570   :  { %8317 = vrcp.f32 %v6471_v30  ;;  %v6477_v39 = vadd.f32 1.0, %v8312_v47  ;;  %7419 = vmatprep.subr.bf16.mxu0 %v8228_v28  ;;  %v8276_v28 = vld [vmem:[#allocation15 + $0x520] ss:$28 sps:$4 sm:$0xff]   ;;  %v8278_v30 = vld [vmem:[#allocation15 + $0x4e8] ss:$28 sps:$4 sm:$0xff]  }
 0x571   :  { %v8314_v43 = vpop.eup %8313  ;;  %v8280_v47 = vld [vmem:[#allocation15 + $0x4b0] ss:$28 sps:$4 sm:$0xff]  }
 0x572   :  { %v6478_v41 = vadd.f32 1.0, %v8314_v43  ;;  %6234 = vmatpush1.bf16.msra.mxu1 %v8225_v31  ;;  %8319 = vrcp.f32 %v6477_v39  ;;  %v8279_v31 = vld [vmem:[#allocation15 + $0x670] ss:$28 sps:$4 sm:$0xff]   ;;  %v8283_v39 = vld [vmem:[#allocation15 + $0x600] ss:$28 sps:$4 sm:$0xff]  }
 0x573   :  { %7420 = vmatpush3.bf16.msra.mxu0 %v8229_v33  ;;  %6235 = vmatprep.subr.bf16.mxu1 %v8232_v38  ;;  %v8281_v33 = vld [vmem:[#allocation15 + $0x638] ss:$28 sps:$4 sm:$0xff]   ;;  %v8285_v43 = vld [vmem:[#allocation15 + $0x5c8] ss:$28 sps:$4 sm:$0xff]  }
 0x574   :  { %8321 = vrcp.f32 %v6478_v41  ;;  %7421 = vmatprep.subr.bf16.mxu0 %v8233_v40  ;;  %v8282_v38 = vld [vmem:[#allocation15 + $0x478] ss:$28 sps:$4 sm:$0xff]   ;;  %v8284_v40 = vld [vmem:[#allocation15 + $0x440] ss:$28 sps:$4 sm:$0xff]   ;;  %v8287_v41 = vld [vmem:[#allocation15 + $0x590] ss:$28 sps:$4 sm:$0xff]  }
 0x576   :  { %6236 = vmatpush1.bf16.msra.mxu1 %v8230_v50  ;;  %v8289_v50 = vld [vmem:[#allocation15 + $0x558] ss:$28 sps:$4 sm:$0xff]  }
 0x577   :  { %7422 = vmatpush3.bf16.msra.mxu0 %v8234_v51  ;;  %6237 = vmatprep.subr.bf16.mxu1 %v8237_v49  ;;  %v8290_v51 = vld [vmem:[#allocation15 + $0x398] ss:$28 sps:$4 sm:$0xff]   ;;  %v8291_v49 = vld [vmem:[#allocation15 + $0xde0] ss:$28 sps:$4 sm:$0xff]  }
 0x578   :  { %7451 = vmatprep.subr.bf16.mxu0 %v8238_v44  ;;  %v8292_v44 = vld [vmem:[#allocation15 + $0xc20] ss:$28 sps:$4 sm:$0xff]  }
 0x57a   :  { %6297 = vmatmul.mubr.bf16.vlgmr.msra.gmra.mxu0 %v8756_v0  ;;  %6238 = vmatpush2.bf16.msra.mxu1 %v8235_v52  ;;  %v8293_v52 = vld [vmem:[#allocation15 + $0xda8] ss:$28 sps:$4 sm:$0xff]  }
 0x57b   :  { %7452 = vmatpush3.bf16.msra.mxu0 %v8239_v53  ;;  %6378 = vmatprep.mubr.bf16.mxu0 %v8777_v35  ;;  %v8316_v58 = vpop.eup %8315  ;;  %v8253_v35 = vld [vmem:[#allocation15 + $0x9b8] ss:$28 sps:$4 sm:$0xff]   ;;  %v8294_v53 = vld [vmem:[#allocation15 + $0xbe8] ss:$28 sps:$4 sm:$0xff]  }
 0x57c   :  { %6239 = vmatprep.subr.bf16.mxu1 %v8242_v54  ;;  %7453 = vmatprep.subr.bf16.mxu0 %v8243_v55  ;;  %v8295_v54 = vld [vmem:[#allocation15 + $0xd70] ss:$28 sps:$4 sm:$0xff]  }
 0x57d   :  { %v8318_v60 = vpop.eup %8317  ;;  %v8296_v55 = vld [vmem:[#allocation15 + $0xbb0] ss:$28 sps:$4 sm:$0xff]  }
 0x57e   :  { %v7390_v29 = vpack.c.bf16 %v8318_v60, %v8316_v58  ;;  %6240 = vmatpush2.bf16.msra.mxu1 %v8240_v56  ;;  %v8297_v56 = vld [vmem:[#allocation15 + $0xd38] ss:$28 sps:$4 sm:$0xff]   ;;  %v8299_v58 = vld [vmem:[#allocation15 + $0xd00] ss:$28 sps:$4 sm:$0xff]  }
 0x57f   :  { %7454 = vmatpush3.bf16.msra.mxu0 %v8244_v57  ;;  %6241 = vmatprep.subr.bf16.mxu1 %v8247_v42  ;;  %v8320_v0 = vpop.eup %8319  ;;  %v8298_v57 = vld [vmem:[#allocation15 + $0xb78] ss:$28 sps:$4 sm:$0xff]   ;;  %v5954_v42 = vpop.f32.mrf.mxu0 }
 0x580   :  { %6556 = vst [vmem:[%s8873_s11] sm:$0xff] %v7390_v29  ;;  %7455 = vmatprep.subr.bf16.mxu0 %v8248_v59  ;;  %v8300_v59 = vld [vmem:[#allocation15 + $0xb40] ss:$28 sps:$4 sm:$0xff]   ;;  %v8302_v29 = vld [vmem:[#allocation15 + $0xb08] ss:$28 sps:$4 sm:$0xff]  }
 0x581   :  { %v8322_v45 = vpop.eup %8321  ;;  %v5956_v60 = vpop.f32.mrf.mxu0 }
 0x582   :  { %v7394_v1 = vpack.c.bf16 %v8322_v45, %v8320_v0  ;;  %6242 = vmatpush2.bf16.msra.mxu1 %v8245_v61  ;;  %v8304_v0 = vld [vmem:[#allocation15 + $0xad0] ss:$28 sps:$4 sm:$0xff]  }
 0x583   :  { %7456 = vmatpush3.bf16.msra.mxu0 %v8249_v34  ;;  %6243 = vmatprep.subr.bf16.mxu1 %v8252_v62  ;;  %v8303_v34 = vld [vmem:[#allocation15 + $0xc90] ss:$28 sps:$4 sm:$0xff]   ;;  %v3420_v62 = vrot.slane %v8807_v4, %v8705_v9 }
 0x584   :  { %6560 = vst [vmem:[%s8873_s11 + $0x1c] sm:$0xff] %v7394_v1  ;;  %7457 = vmatprep.subr.bf16.mxu0 %v8253_v35  ;;  %v8305_v1 = vld [vmem:[#allocation15 + $0xc58] ss:$28 sps:$4 sm:$0xff]  }
 0x586   :  { %6244 = vmatpush2.bf16.msra.mxu1 %v8250_v2  ;;  %v3424_v2 = vrot.slane %v8807_v4, %v8702_v8 }
 0x587   :  { %7458 = vmatpush3.bf16.msra.mxu0 %v8254_v5  ;;  %6245 = vmatprep.subr.bf16.mxu1 %v8257_v6  ;;  %v5955_v6 = vadd.f32 %v5954_v42, %v3420_v62 }
 0x588   :  { %7459 = vmatprep.subr.bf16.mxu0 %v8258_v7  ;;  %v8306_v7 = vld [vmem:[#allocation15 + $0xa98] ss:$28 sps:$4 sm:$0xff]  }
 0x58a   :  { %6246 = vmatpush2.bf16.msra.mxu1 %v8255_v63 }
 0x58b   :  { %7460 = vmatpush3.bf16.msra.mxu0 %v8259_v11  ;;  %6247 = vmatprep.subr.bf16.mxu1 %v8262_v12  ;;  %v5957_v11 = vadd.f32 %v5956_v60, %v3424_v2 }
 0x58c   :  { %7461 = vmatprep.subr.bf16.mxu0 %v8263_v14 }
 0x58e   :  { %6248 = vmatpush2.bf16.msra.mxu1 %v8260_v15 }
 0x58f   :  { %7462 = vmatpush3.bf16.msra.mxu0 %v8264_v16  ;;  %6249 = vmatprep.subr.bf16.mxu1 %v8267_v17 }
 0x590   :  { %7463 = vmatprep.subr.bf16.mxu0 %v8268_v18 }
 0x592   :  { %6250 = vmatpush2.bf16.msra.mxu1 %v8265_v19 }
 0x593   :  { %7464 = vmatpush3.bf16.msra.mxu0 %v8269_v20  ;;  %6251 = vmatprep.subr.bf16.mxu1 %v8272_v21 }
 0x594   :  { %7465 = vmatprep.subr.bf16.mxu0 %v8273_v22 }
 0x596   :  { %6252 = vmatpush2.bf16.msra.mxu1 %v8270_v23 }
 0x597   :  { %7466 = vmatpush3.bf16.msra.mxu0 %v8274_v24  ;;  %7429 = vmatprep.subr.bf16.mxu1 %v8275_v27 }
 0x599   :  { %6254 = vmatmul.mubr.bf16.vlgmr.msra.gmra.mxu1 %v8792_v13  ;;  %v5997_v61 = vpop.f32.mrf.mxu1 }
 0x59a   :  { %6379 = vmatmul.mubr.bf16.vlgmr.msra.gmra.mxu0 %v8779_v3  ;;  %7430 = vmatpush3.bf16.msra.mxu1 %v8276_v28  ;;  %v8286_v3 = vld [vmem:[#allocation15 + $0x408] ss:$28 sps:$4 sm:$0xff]   ;;  %v5998_v12 = vadd.f32 %v5997_v61, %v5955_v6 }
 0x59b   :  { %6337 = vmatprep.mubr.bf16.mxu1 %v8763_v32  ;;  %7431 = vmatprep.subr.bf16.mxu1 %v8277_v48  ;;  %v8288_v32 = vld [vmem:[#allocation15 + $0x3d0] ss:$28 sps:$4 sm:$0xff]   ;;  %v5999_v45 = vpop.f32.mrf.mxu1 }
 0x59c   :  { %v6000_v9 = vadd.f32 %v5999_v45, %v5957_v11 }
 0x59d   :  { %v6001_v63 = vpop.f32.mrf.mxu1 }
 0x59e   :  { %7432 = vmatpush3.bf16.msra.mxu1 %v8278_v30 }
 0x59f   :  { %7433 = vmatprep.subr.bf16.mxu1 %v8279_v31  ;;  %v6003_v16 = vpop.f32.mrf.mxu1 }
 0x5a2   :  { %7434 = vmatpush3.bf16.msra.mxu1 %v8280_v47 }
 0x5a3   :  { %7435 = vmatprep.subr.bf16.mxu1 %v8281_v33 }
 0x5a6   :  { %7436 = vmatpush3.bf16.msra.mxu1 %v8282_v38 }
 0x5a7   :  { %7437 = vmatprep.subr.bf16.mxu1 %v8283_v39 }
 0x5aa   :  { %7438 = vmatpush3.bf16.msra.mxu1 %v8284_v40 }
 0x5ab   :  { %7439 = vmatprep.subr.bf16.mxu1 %v8285_v43 }
 0x5ae   :  { %7440 = vmatpush3.bf16.msra.mxu1 %v8286_v3 }
 0x5af   :  { %7441 = vmatprep.subr.bf16.mxu1 %v8287_v41 }
 0x5b2   :  { %7442 = vmatpush3.bf16.msra.mxu1 %v8288_v32 }
 0x5b3   :  { %7443 = vmatprep.subr.bf16.mxu1 %v8289_v50 }
 0x5b6   :  { %7444 = vmatpush3.bf16.msra.mxu1 %v8290_v51 }
 0x5b7   :  { %7473 = vmatprep.subr.bf16.mxu1 %v8291_v49 }
 0x5b9   :  { %6338 = vmatmul.mubr.bf16.vlgmr.msra.gmra.mxu1 %v8765_v37  ;;  %v8301_v37 = vld [vmem:[#allocation15 + $0xcc8] ss:$28 sps:$4 sm:$0xff]  }
 0x5ba   :  { %7474 = vmatpush3.bf16.msra.mxu1 %v8292_v44  ;;  %6419 = vmatprep.mubr.bf16.mxu1 %v8790_v10  ;;  %v5958_v10 = vpop.f32.mrf.mxu0 }
 0x5bb   :  { %7475 = vmatprep.subr.bf16.mxu1 %v8293_v52  ;;  %v5959_v15 = vadd.f32 %v5958_v10, %v3420_v62 }
 0x5bc   :  { %v5960_v35 = vpop.f32.mrf.mxu0 }
 0x5bd   :  { %v5961_v17 = vadd.f32 %v5960_v35, %v3424_v2  ;;  %v6002_v19 = vadd.f32 %v6001_v63, %v5959_v15 }
 0x5be   :  { %7476 = vmatpush3.bf16.msra.mxu1 %v8294_v53  ;;  %v6040_v5 = vpop.f32.mrf.mxu0 }
 0x5bf   :  { %7477 = vmatprep.subr.bf16.mxu1 %v8295_v54  ;;  %v6041_v18 = vadd.f32 %v6040_v5, %v5998_v12  ;;  %v6004_v22 = vadd.f32 %v6003_v16, %v5961_v17 }
 0x5c0   :  { %v6042_v14 = vpop.f32.mrf.mxu0 }
 0x5c1   :  { %v6043_v8 = vadd.f32 %v6042_v14, %v6000_v9 }
 0x5c2   :  { %7478 = vmatpush3.bf16.msra.mxu1 %v8296_v55  ;;  %v6044_v20 = vpop.f32.mrf.mxu0 }
 0x5c3   :  { %7479 = vmatprep.subr.bf16.mxu1 %v8297_v56  ;;  %v6045_v27 = vadd.f32 %v6044_v20, %v6002_v19 }
 0x5c4   :  { %v6046_v30 = vpop.f32.mrf.mxu0 }
 0x5c5   :  { %v6047_v47 = vadd.f32 %v6046_v30, %v6004_v22 }
 0x5c6   :  { %7480 = vmatpush3.bf16.msra.mxu1 %v8298_v57 }
 0x5c7   :  { %7481 = vmatprep.subr.bf16.mxu1 %v8299_v58 }
 0x5ca   :  { %7482 = vmatpush3.bf16.msra.mxu1 %v8300_v59 }
 0x5cb   :  { %7483 = vmatprep.subr.bf16.mxu1 %v8301_v37 }
 0x5ce   :  { %7484 = vmatpush3.bf16.msra.mxu1 %v8302_v29  ;;  %v3428_v29 = vrot.slane %v8807_v4, %v1225_v26 }
 0x5cf   :  { %7485 = vmatprep.subr.bf16.mxu1 %v8303_v34  ;;  %v3432_v34 = vrot.slane %v8807_v4, %v1229_v25 }
 0x5d2   :  { %7486 = vmatpush3.bf16.msra.mxu1 %v8304_v0 }
 0x5d3   :  { %7487 = vmatprep.subr.bf16.mxu1 %v8305_v1 }
 0x5d6   :  { %7488 = vmatpush3.bf16.msra.mxu1 %v8306_v7 }
 0x5d9   :  { %v6083_v21 = vpop.f32.mrf.mxu1  ;;  %6420 = vmatmul.mubr.bf16.vlgmr.msra.gmra.mxu1 %v8792_v13 }
 0x5da   :  { %v6084_v23 = vadd.f32 %v6083_v21, %v6041_v18  ;;  %v6126_v58 = vpop.f32.mrf.mxu0 }
 0x5db   :  { %v6085_v24 = vpop.f32.mrf.mxu1  ;;  %v6127_v0 = vadd.f32 %v6126_v58, %v3428_v29 }
 0x5dc   :  { %v7370_v28 = vmul.f32 -1.442695, %v6084_v23  ;;  %v6086_v48 = vadd.f32 %v6085_v24, %v6043_v8  ;;  %v6128_v59 = vpop.f32.mrf.mxu0 }
 0x5dd   :  { %v6087_v31 = vpop.f32.mrf.mxu1  ;;  %v6129_v45 = vadd.f32 %v6128_v59, %v3432_v34 }
 0x5de   :  { %8323 = vpow2.f32 %v7370_v28  ;;  %v7371_v33 = vmul.f32 -1.442695, %v6086_v48  ;;  %v6088_v38 = vadd.f32 %v6087_v31, %v6045_v27  ;;  %v6130_v60 = vpop.f32.mrf.mxu0 }
 0x5df   :  { %v6089_v39 = vpop.f32.mrf.mxu1  ;;  %v6131_v5 = vadd.f32 %v6130_v60, %v3428_v29 }
 0x5e0   :  { %8325 = vpow2.f32 %v7371_v33  ;;  %v7377_v40 = vmul.f32 -1.442695, %v6088_v38  ;;  %v6090_v43 = vadd.f32 %v6089_v39, %v6047_v47  ;;  %v6132_v10 = vpop.f32.mrf.mxu0 }
 0x5e1   :  { %v6133_v63 = vadd.f32 %v6132_v10, %v3432_v34 }
 0x5e2   :  { %8327 = vpow2.f32 %v7377_v40  ;;  %v7378_v3 = vmul.f32 -1.442695, %v6090_v43 }
 0x5e4   :  { %8329 = vpow2.f32 %v7378_v3 }
 0x5eb   :  { %v8324_v13 = vpop.eup %8323 }
 0x5ec   :  { %v6472_v41 = vadd.f32 1.0, %v8324_v13 }
 0x5ed   :  { %v8326_v32 = vpop.eup %8325 }
 0x5ee   :  { %v6473_v50 = vadd.f32 1.0, %v8326_v32  ;;  %8331 = vrcp.f32 %v6472_v41 }
 0x5ef   :  { %v8328_v51 = vpop.eup %8327 }
 0x5f0   :  { %8333 = vrcp.f32 %v6473_v50  ;;  %v6479_v49 = vadd.f32 1.0, %v8328_v51 }
 0x5f1   :  { %v8330_v44 = vpop.eup %8329 }
 0x5f2   :  { %v6480_v52 = vadd.f32 1.0, %v8330_v44  ;;  %8335 = vrcp.f32 %v6479_v49 }
 0x5f4   :  { %8337 = vrcp.f32 %v6480_v52 }
 0x5fb   :  { %v8332_v53 = vpop.eup %8331 }
 0x5fd   :  { %v8334_v54 = vpop.eup %8333 }
 0x5fe   :  { %v7391_v55 = vpack.c.bf16 %v8334_v54, %v8332_v53 }
 0x5ff   :  { %v8336_v56 = vpop.eup %8335 }
 0x600   :  { %6557 = vst [vmem:[%s8873_s11 + $0x8] sm:$0xff] %v7391_v55 }
 0x601   :  { %v8338_v57 = vpop.eup %8337 }
 0x602   :  { %v7395_v42 = vpack.c.bf16 %v8338_v57, %v8336_v56 }
 0x604   :  { %6561 = vst [vmem:[%s8873_s11 + $0x24] sm:$0xff] %v7395_v42  ;;  %v3436_v42 = vrot.slane %v8807_v4, %v1233_v36 }
 0x619   :  { %v6169_v37 = vpop.f32.mrf.mxu1 }
 0x61a   :  { %v6212_v62 = vpop.f32.mrf.mxu0  ;;  %v6170_v1 = vadd.f32 %v6169_v37, %v6127_v0 }
 0x61b   :  { %v6171_v61 = vpop.f32.mrf.mxu1 }
 0x61c   :  { %v6214_v2 = vpop.f32.mrf.mxu0  ;;  %v6172_v6 = vadd.f32 %v6171_v61, %v6129_v45  ;;  %v6213_v11 = vadd.f32 %v6212_v62, %v6170_v1 }
 0x61d   :  { %v6173_v35 = vpop.f32.mrf.mxu1 }
 0x61e   :  { %v6174_v12 = vadd.f32 %v6173_v35, %v6131_v5  ;;  %v6216_v14 = vpop.f32.mrf.mxu0  ;;  %v6215_v15 = vadd.f32 %v6214_v2, %v6172_v6 }
 0x61f   :  { %v6175_v7 = vpop.f32.mrf.mxu1 }
 0x620   :  { %v6176_v9 = vadd.f32 %v6175_v7, %v6133_v63  ;;  %v6217_v18 = vadd.f32 %v6216_v14, %v6174_v12  ;;  %v6218_v20 = vpop.f32.mrf.mxu0 }
 0x622   :  { %v6219_v8 = vadd.f32 %v6218_v20, %v6176_v9 }
 0x63a   :  { %v7423_v51 = vpop.f32.mrf.mxu0 }
 0x63c   :  { %v7424_v44 = vpop.f32.mrf.mxu0 }
 0x63d   :  { %v7425_v58 = vadd.f32 %v7424_v44, %v7423_v51 }
 0x63e   :  { %v7426_v52 = vpop.f32.mrf.mxu0 }
 0x63f   :  { %v6299_v29 = vadd.f32 %v7425_v58, %v3436_v42 }
 0x640   :  { %v7427_v54 = vpop.f32.mrf.mxu0 }
 0x641   :  { %v7428_v10 = vadd.f32 %v7427_v54, %v7426_v52 }
 0x643   :  { %v6302_v35 = vadd.f32 %v7428_v10, %v3436_v42 }
 0x659   :  { %v6255_v26 = vpop.f32.mrf.mxu1 }
 0x65a   :  { %v6256_v16 = vadd.f32 %v6255_v26, %v6213_v11  ;;  %v7467_v56 = vpop.f32.mrf.mxu0 }
 0x65b   :  { %v6257_v17 = vpop.f32.mrf.mxu1 }
 0x65c   :  { %v7372_v25 = vmul.f32 -1.442695, %v6256_v16  ;;  %v6258_v19 = vadd.f32 %v6257_v17, %v6215_v15  ;;  %v7468_v59 = vpop.f32.mrf.mxu0 }
 0x65d   :  { %v6259_v21 = vpop.f32.mrf.mxu1  ;;  %v7469_v45 = vadd.f32 %v7468_v59, %v7467_v56 }
 0x65e   :  { %8339 = vpow2.f32 %v7372_v25  ;;  %v7373_v22 = vmul.f32 -1.442695, %v6258_v19  ;;  %v6260_v23 = vadd.f32 %v6259_v21, %v6217_v18  ;;  %v7470_v61 = vpop.f32.mrf.mxu0 }
 0x65f   :  { %v6261_v24 = vpop.f32.mrf.mxu1 }
 0x660   :  { %8341 = vpow2.f32 %v7373_v22  ;;  %v7379_v27 = vmul.f32 -1.442695, %v6260_v23  ;;  %v6262_v28 = vadd.f32 %v6261_v24, %v6219_v8  ;;  %v7471_v1 = vpop.f32.mrf.mxu0 }
 0x661   :  { %v7472_v63 = vadd.f32 %v7471_v1, %v7470_v61 }
 0x662   :  { %8343 = vpow2.f32 %v7379_v27  ;;  %v7380_v48 = vmul.f32 -1.442695, %v6262_v28 }
 0x664   :  { %8345 = vpow2.f32 %v7380_v48 }
 0x66b   :  { %v8340_v30 = vpop.eup %8339 }
 0x66c   :  { %v6474_v31 = vadd.f32 1.0, %v8340_v30 }
 0x66d   :  { %v8342_v47 = vpop.eup %8341 }
 0x66e   :  { %v6475_v33 = vadd.f32 1.0, %v8342_v47  ;;  %8347 = vrcp.f32 %v6474_v31 }
 0x66f   :  { %v8344_v38 = vpop.eup %8343 }
 0x670   :  { %8349 = vrcp.f32 %v6475_v33  ;;  %v6481_v39 = vadd.f32 1.0, %v8344_v38 }
 0x671   :  { %v8346_v40 = vpop.eup %8345 }
 0x672   :  { %v6482_v43 = vadd.f32 1.0, %v8346_v40  ;;  %8351 = vrcp.f32 %v6481_v39 }
 0x674   :  { %8353 = vrcp.f32 %v6482_v43 }
 0x679   :  { %v7445_v53 = vpop.f32.mrf.mxu1 }
 0x67b   :  { %v8348_v3 = vpop.eup %8347  ;;  %v7446_v55 = vpop.f32.mrf.mxu1 }
 0x67c   :  { %v7447_v60 = vadd.f32 %v7446_v55, %v7445_v53 }
 0x67d   :  { %v8350_v13 = vpop.eup %8349  ;;  %v7448_v57 = vpop.f32.mrf.mxu1 }
 0x67e   :  { %v7392_v41 = vpack.c.bf16 %v8350_v13, %v8348_v3  ;;  %v6340_v34 = vadd.f32 %v7447_v60, %v6299_v29 }
 0x67f   :  { %v8352_v32 = vpop.eup %8351  ;;  %v7449_v37 = vpop.f32.mrf.mxu1 }
 0x680   :  { %6558 = vst [vmem:[%s8873_s11 + $0x10] sm:$0xff] %v7392_v41  ;;  %v7450_v62 = vadd.f32 %v7449_v37, %v7448_v57  ;;  %v6381_v6 = vadd.f32 %v7469_v45, %v6340_v34 }
 0x681   :  { %v8354_v50 = vpop.eup %8353 }
 0x682   :  { %v7396_v49 = vpack.c.bf16 %v8354_v50, %v8352_v32  ;;  %v6343_v5 = vadd.f32 %v7450_v62, %v6302_v35 }
 0x684   :  { %6562 = vst [vmem:[%s8873_s11 + $0x2c] sm:$0xff] %v7396_v49  ;;  %v6384_v12 = vadd.f32 %v7472_v63, %v6343_v5 }
 0x699   :  { %v7489_v0 = vpop.f32.mrf.mxu1 }
 0x69b   :  { %v7490_v2 = vpop.f32.mrf.mxu1 }
 0x69c   :  { %v7491_v7 = vadd.f32 %v7490_v2, %v7489_v0 }
 0x69d   :  { %v7492_v46 = vpop.f32.mrf.mxu1 }
 0x69e   :  { %v6422_v36 = vadd.f32 %v7491_v7, %v6381_v6 }
 0x69f   :  { %v7493_v4 = vpop.f32.mrf.mxu1 }
 0x6a0   :  { %v7374_v11 = vmul.f32 -1.442695, %v6422_v36  ;;  %v7494_v14 = vadd.f32 %v7493_v4, %v7492_v46 }
 0x6a2   :  { %8355 = vpow2.f32 %v7374_v11  ;;  %v6425_v26 = vadd.f32 %v7494_v14, %v6384_v12 }
 0x6a4   :  { %v7381_v15 = vmul.f32 -1.442695, %v6425_v26 }
 0x6a6   :  { %8357 = vpow2.f32 %v7381_v15 }
 0x6af   :  { %v8356_v9 = vpop.eup %8355 }
 0x6b0   :  { %v6476_v16 = vadd.f32 1.0, %v8356_v9 }
 0x6b2   :  { %8359 = vrcp.f32 %v6476_v16 }
 0x6b3   :  { %v8358_v17 = vpop.eup %8357 }
 0x6b4   :  { %v6483_v18 = vadd.f32 1.0, %v8358_v17 }
 0x6b6   :  { %8361 = vrcp.f32 %v6483_v18 }
 0x6bf   :  { %v8360_v25 = vpop.eup %8359 }
 0x6c0   :  { %v7393_v19 = vpack.c.bf16 %v8360_v25, %v8360_v25 }
 0x6c2   :  { %6559 = vst [vmem:[%s8873_s11 + $0x18] sm:$0xf] %v7393_v19 }
 0x6c3   :  { %v8362_v20 = vpop.eup %8361 }
 0x6c4   :  { %v7397_v21 = vpack.c.bf16 %v8362_v20, %v8362_v20 }
 0x6c6   :  { %6563 = vst [vmem:[%s8873_s11 + $0x34] sm:$0xf] %v7397_v21 }
 0x6c7   :  { %6568 = vsyncpa [#allocation3], 1 }
 0x6c8   :  { %6569 = vsyncpa [#allocation5], 1 }
 0x6c9   :  { %6570 = vsyncpa [#allocation8], 1 }
 0x6ca   :  { %6571 = vsyncpa [#allocation11], 1 }
 0x6cb   :  { %6572 = vsyncpa [#allocation14], 1 }
 0x6cc   :  { %6573 = vsyncpa [#allocation17], 1 }

</bundles_post_ra>
